<compile_context>
chip_gen: v6e
topology: v6e:2x2x1
jax: 0.10.0
libtpu: 0.0.40
codegen_flags: <defaults>
</compile_context>

<pallas_src>
import functools
import math

import jax
import jax.numpy as jnp
from jax.experimental import pallas as pl
from jax.experimental.pallas import tpu as pltpu

MATMUL_DTYPE = jnp.bfloat16          # MXU input dtype (f32 accumulation everywhere)
_VMEM_LIMIT = 32 * 1024 * 1024       # safe on v5e/v6e (128 MiB) and v7x (64 MiB)


# ----------------------------------------------------------------------------
# In-kernel math helpers (float32 elementwise; VPU/EUP/XLU work)
# ----------------------------------------------------------------------------
def _ln(x, g, b=None, eps=1e-5):
    """LayerNorm over the last dim. x: (R, E) f32, g/b: (1, E) f32."""
    mu = jnp.mean(x, axis=-1, keepdims=True)
    xc = x - mu
    var = jnp.mean(xc * xc, axis=-1, keepdims=True)
    y = xc * jax.lax.rsqrt(var + eps) * g
    if b is not None:
        y = y + b
    return y


def _erf_poly(x):
    # Abramowitz & Stegun 7.1.26 rational approximation, |abs err| < 1.5e-7.
    a1, a2, a3, a4, a5 = 0.254829592, -0.284496736, 1.421413741, -1.453152027, 1.061405429
    p = 0.3275911
    sgn = jnp.where(x >= 0.0, 1.0, -1.0)
    ax = jnp.abs(x)
    t = 1.0 / (1.0 + p * ax)
    poly = ((((a5 * t + a4) * t + a3) * t + a2) * t + a1) * t
    return sgn * (1.0 - poly * jnp.exp(-ax * ax))


def _gelu_exact(x):
    # nn.GELU() default (exact erf form), accurate to ~1e-7.
    return 0.5 * x * (1.0 + _erf_poly(x * (1.0 / math.sqrt(2.0))))


def _softmax_rows(s):
    s = s - jnp.max(s, axis=-1, keepdims=True)
    p = jnp.exp(s)
    return p * pl.reciprocal(jnp.sum(p, axis=-1, keepdims=True), approx=True)


def _mha_accumulate(q_src, kv_src, wq_ref, wk_ref, wv_ref, wo_ref,
                    num_heads, causal, bq_ref=None, bk_ref=None, bv_ref=None):
    """Multi-head attention fully inside the kernel.

    q_src: (Lq, E) bf16, kv_src: (Lk, E) bf16 (already layer-normed + cast).
    Per-head weights: wq/wk/wv (H, E, Dh), wo (H, Dh, E); optional biases (H, 1, Dh).
    Returns the already-output-projected (Lq, E) f32 sum over heads (no .T / concat /
    transpose anywhere — the head split lives in the weight layout).
    """
    Lq, E = q_src.shape
    Lk = kv_src.shape[0]
    Dh = E // num_heads
    scale = 1.0 / math.sqrt(Dh)

    if causal:
        row = jax.lax.broadcasted_iota(jnp.int32, (Lq, Lk), 0)
        col = jax.lax.broadcasted_iota(jnp.int32, (Lq, Lk), 1)
        mask = col <= row

    out = jnp.zeros((Lq, E), jnp.float32)
    for h in range(num_heads):
        q = jnp.dot(q_src, wq_ref[h], preferred_element_type=jnp.float32)
        k = jnp.dot(kv_src, wk_ref[h], preferred_element_type=jnp.float32)
        v = jnp.dot(kv_src, wv_ref[h], preferred_element_type=jnp.float32)
        if bq_ref is not None:
            q = q + bq_ref[h]
        if bk_ref is not None:
            k = k + bk_ref[h]
        if bv_ref is not None:
            v = v + bv_ref[h]
        # scores: contract the Dh dim of both operands directly (no k.T relayout)
        s = jax.lax.dot_general(
            q.astype(MATMUL_DTYPE), k.astype(MATMUL_DTYPE),
            (((1,), (1,)), ((), ())), preferred_element_type=jnp.float32) * scale
        if causal:
            s = jnp.where(mask, s, -1e30)
        p = _softmax_rows(s)
        o_h = jnp.dot(p.astype(MATMUL_DTYPE), v.astype(MATMUL_DTYPE),
                      preferred_element_type=jnp.float32)            # (Lq, Dh)
        # fold the output projection per head: concat_h(o_h) @ Wo == sum_h o_h @ Wo[h]
        out = out + jnp.dot(o_h.astype(MATMUL_DTYPE), wo_ref[h],
                            preferred_element_type=jnp.float32)      # (Lq, E)
    return out


# ----------------------------------------------------------------------------
# Fused kernels
# ----------------------------------------------------------------------------
def _gpt_stack_kernel(x_ref, g1_ref, wq_ref, wk_ref, wv_ref, wo_ref,
                      g2_ref, wfc_ref, wpr_ref, o_ref, carry_ref, *, num_heads):
    """All GPT blocks of one stack, grid=(B, depth).

    nanoGPT Block (bias=False): x += attn(ln1(x)); x += mlp(ln2(x)).
    The running activation lives in `carry_ref` (VMEM scratch) across the layer axis;
    per-layer weights are streamed by the BlockSpec index_map; the HBM output tile is
    written once at the final layer.
    """
    layer = pl.program_id(1)

    @pl.when(layer == 0)
    def _():
        carry_ref[...] = x_ref[...]

    x = carry_ref[...]                                                # (L, E) f32

    h = _ln(x, g1_ref[...]).astype(MATMUL_DTYPE)
    x = x + _mha_accumulate(h, h, wq_ref, wk_ref, wv_ref, wo_ref,
                            num_heads, causal=True)

    h2 = _ln(x, g2_ref[...])
    hfc = _gelu_exact(jnp.dot(h2.astype(MATMUL_DTYPE), wfc_ref[...],
                              preferred_element_type=jnp.float32))    # (L, 4E)
    x = x + jnp.dot(hfc.astype(MATMUL_DTYPE), wpr_ref[...],
                    preferred_element_type=jnp.float32)

    carry_ref[...] = x

    @pl.when(layer == pl.num_programs(1) - 1)
    def _():
        o_ref[...] = x


def _cross_block_kernel(z_ref, x_ref, qpos_ref,
                        lnq_g_ref, lnq_b_ref, lnkv_g_ref, lnkv_b_ref,
                        wq_ref, bq_ref, wk_ref, bk_ref, wv_ref, bv_ref,
                        wo_ref, bo_ref,
                        ln2_g_ref, ln2_b_ref, wfc_ref, bfc_ref, wpr_ref, bpr_ref,
                        o_ref, *, num_heads):
    """Pre-LN cross-attention block (query=z, key/value=x) + MLP (with biases),
    followed by the query positional-encoding add (folded epilogue)."""
    z = z_ref[...]                                                    # (Lq, E) query tokens
    x = x_ref[...]                                                    # (Lk, E)

    zn = _ln(z, lnq_g_ref[...], lnq_b_ref[...]).astype(MATMUL_DTYPE)
    xn = _ln(x, lnkv_g_ref[...], lnkv_b_ref[...]).astype(MATMUL_DTYPE)
    attn = _mha_accumulate(zn, xn, wq_ref, wk_ref, wv_ref, wo_ref,
                           num_heads, causal=False,
                           bq_ref=bq_ref, bk_ref=bk_ref, bv_ref=bv_ref)
    z = z + attn + bo_ref[...]

    h = _ln(z, ln2_g_ref[...], ln2_b_ref[...])
    hfc = jnp.dot(h.astype(MATMUL_DTYPE), wfc_ref[...],
                  preferred_element_type=jnp.float32) + bfc_ref[...]
    hfc = _gelu_exact(hfc)
    z = z + jnp.dot(hfc.astype(MATMUL_DTYPE), wpr_ref[...],
                    preferred_element_type=jnp.float32) + bpr_ref[...]

    o_ref[...] = z + qpos_ref[...]                                    # + query pos-enc


def _proj_vq_kernel(z_ref, w_ref, b_ref, e_ref, zp_ref, zq_ref, idx_ref):
    """query_proj (bf16 matmul) + VectorQuantizer distances/argmin/gather, fused."""
    z = jnp.dot(z_ref[...].astype(MATMUL_DTYPE), w_ref[...],
                preferred_element_type=jnp.float32) + b_ref[...]      # (N, D)
    zp_ref[...] = z

    e = e_ref[...]                                                    # (D, K) f32
    # f32 distances on purpose: bf16 here could flip the argmin.
    d = (jnp.sum(z * z, axis=1, keepdims=True)
         - 2.0 * jnp.dot(z, e, preferred_element_type=jnp.float32)
         + jnp.sum(e * e, axis=0, keepdims=True))                     # (N, K)
    K = d.shape[1]
    col = jax.lax.broadcasted_iota(jnp.int32, d.shape, 1)
    d_min = jnp.min(d, axis=1, keepdims=True)
    # first index achieving the minimum (torch.argmin tie-break); exact for K < 2^24
    idx_f = jnp.min(jnp.where(d == d_min, col.astype(jnp.float32), float(K)),
                    axis=1, keepdims=True)
    idx = idx_f.astype(jnp.int32)                                     # (N, 1)
    idx_ref[...] = idx
    onehot = (col == idx).astype(jnp.float32)                         # (N, K)
    # gather winning codebook rows via dot_general contracting K (no e.T relayout)
    zq_ref[...] = jax.lax.dot_general(onehot, e, (((1,), (1,)), ((), ())),
                                      preferred_element_type=jnp.float32)


# ----------------------------------------------------------------------------
# pallas_call wrappers
# ----------------------------------------------------------------------------
def gpt_stack_fused(x, ws, num_heads):
    """x: (B, L, E) f32; ws: per-layer weights stacked on a leading `depth` axis.
    One kernel launch for the whole block stack, grid=(B, depth)."""
    B, L, E = x.shape
    H = num_heads
    Dh = E // H
    depth = ws["wq"].shape[0]
    Hid = ws["w_fc"].shape[2]
    kern = functools.partial(_gpt_stack_kernel, num_heads=H)
    return pl.pallas_call(
        kern,
        grid=(B, depth),
        in_specs=[
            pl.BlockSpec((None, L, E), lambda b, l: (b, 0, 0)),        # x (per-batch tile)
            pl.BlockSpec((None, 1, E), lambda b, l: (l, 0, 0)),        # ln1 gamma
            pl.BlockSpec((None, H, E, Dh), lambda b, l: (l, 0, 0, 0)),  # Wq per head
            pl.BlockSpec((None, H, E, Dh), lambda b, l: (l, 0, 0, 0)),  # Wk per head
            pl.BlockSpec((None, H, E, Dh), lambda b, l: (l, 0, 0, 0)),  # Wv per head
            pl.BlockSpec((None, H, Dh, E), lambda b, l: (l, 0, 0, 0)),  # out-proj per head
            pl.BlockSpec((None, 1, E), lambda b, l: (l, 0, 0)),        # ln2 gamma
            pl.BlockSpec((None, E, Hid), lambda b, l: (l, 0, 0)),      # mlp fc
            pl.BlockSpec((None, Hid, E), lambda b, l: (l, 0, 0)),      # mlp proj
        ],
        out_specs=pl.BlockSpec((None, L, E), lambda b, l: (b, 0, 0)),
        out_shape=jax.ShapeDtypeStruct((B, L, E), jnp.float32),
        scratch_shapes=[pltpu.VMEM((L, E), jnp.float32)],              # layer-loop carry
        compiler_params=pltpu.CompilerParams(
            dimension_semantics=("parallel", "arbitrary"),
            vmem_limit_bytes=_VMEM_LIMIT),
    )(x, ws["ln1_g"], ws["wq"], ws["wk"], ws["wv"], ws["wo"],
      ws["ln2_g"], ws["w_fc"], ws["w_proj"])


def cross_block_fused(query_tokens, x, query_pos, cw, num_heads):
    """query_tokens: (1, Lq, E); x: (B, Lk, E); query_pos: (Lq, E)."""
    B, Lk, E = x.shape
    Lq = query_tokens.shape[1]
    H = num_heads
    Dh = E // H
    Hid = cw["wfc"].shape[1]
    kern = functools.partial(_cross_block_kernel, num_heads=H)
    return pl.pallas_call(
        kern,
        grid=(B,),
        in_specs=[
            pl.BlockSpec((None, Lq, E), lambda b: (0, 0, 0)),     # query tokens (shared)
            pl.BlockSpec((None, Lk, E), lambda b: (b, 0, 0)),     # x (keys/values)
            pl.BlockSpec((Lq, E), lambda b: (0, 0)),              # query pos-enc
            pl.BlockSpec((1, E), lambda b: (0, 0)),               # ln_q gamma
            pl.BlockSpec((1, E), lambda b: (0, 0)),               # ln_q beta
            pl.BlockSpec((1, E), lambda b: (0, 0)),               # ln_kv gamma
            pl.BlockSpec((1, E), lambda b: (0, 0)),               # ln_kv beta
            pl.BlockSpec((H, E, Dh), lambda b: (0, 0, 0)),        # Wq
            pl.BlockSpec((H, 1, Dh), lambda b: (0, 0, 0)),        # bq
            pl.BlockSpec((H, E, Dh), lambda b: (0, 0, 0)),        # Wk
            pl.BlockSpec((H, 1, Dh), lambda b: (0, 0, 0)),        # bk
            pl.BlockSpec((H, E, Dh), lambda b: (0, 0, 0)),        # Wv
            pl.BlockSpec((H, 1, Dh), lambda b: (0, 0, 0)),        # bv
            pl.BlockSpec((H, Dh, E), lambda b: (0, 0, 0)),        # Wo per head
            pl.BlockSpec((1, E), lambda b: (0, 0)),               # bo
            pl.BlockSpec((1, E), lambda b: (0, 0)),               # ln2 gamma
            pl.BlockSpec((1, E), lambda b: (0, 0)),               # ln2 beta
            pl.BlockSpec((E, Hid), lambda b: (0, 0)),             # fc W
            pl.BlockSpec((1, Hid), lambda b: (0, 0)),             # fc b
            pl.BlockSpec((Hid, E), lambda b: (0, 0)),             # proj W
            pl.BlockSpec((1, E), lambda b: (0, 0)),               # proj b
        ],
        out_specs=pl.BlockSpec((None, Lq, E), lambda b: (b, 0, 0)),
        out_shape=jax.ShapeDtypeStruct((B, Lq, E), jnp.float32),
        compiler_params=pltpu.CompilerParams(
            dimension_semantics=("parallel",),
            vmem_limit_bytes=_VMEM_LIMIT),
    )(query_tokens, x, query_pos,
      cw["lnq_g"], cw["lnq_b"], cw["lnkv_g"], cw["lnkv_b"],
      cw["wq"], cw["bq"], cw["wk"], cw["bk"], cw["wv"], cw["bv"],
      cw["wo"], cw["bo"], cw["ln2_g"], cw["ln2_b"],
      cw["wfc"], cw["bfc"], cw["wpr"], cw["bpr"])


def proj_vq_fused(z2d, tw):
    """z2d: (N, E) -> (projected (N, D), quantized (N, D), indices (N,))."""
    N, E = z2d.shape
    Dout = tw["w"].shape[1]
    K = tw["e"].shape[1]
    zp, zq, idx = pl.pallas_call(
        _proj_vq_kernel,
        grid=(1,),
        in_specs=[
            pl.BlockSpec((N, E), lambda i: (0, 0)),
            pl.BlockSpec((E, Dout), lambda i: (0, 0)),
            pl.BlockSpec((1, Dout), lambda i: (0, 0)),
            pl.BlockSpec((Dout, K), lambda i: (0, 0)),
        ],
        out_specs=[
            pl.BlockSpec((N, Dout), lambda i: (0, 0)),
            pl.BlockSpec((N, Dout), lambda i: (0, 0)),
            pl.BlockSpec((N, 1), lambda i: (0, 0)),
        ],
        out_shape=(
            jax.ShapeDtypeStruct((N, Dout), jnp.float32),
            jax.ShapeDtypeStruct((N, Dout), jnp.float32),
            jax.ShapeDtypeStruct((N, 1), jnp.int32),
        ),
        compiler_params=pltpu.CompilerParams(
            dimension_semantics=("arbitrary",),
            vmem_limit_bytes=_VMEM_LIMIT),
    )(z2d, tw["w"], tw["b"], tw["e"])
    return zp, zq, idx[:, 0]


# ----------------------------------------------------------------------------
# Weight packing (per-head layouts, per-stack layer stacking, bf16 casts)
# ----------------------------------------------------------------------------
def _split_heads_w(w, num_heads):      # (E, E) -> (H, E, Dh), head-major outputs
    E, Eo = w.shape
    Dh = Eo // num_heads
    return jnp.transpose(w.reshape(E, num_heads, Dh), (1, 0, 2)).astype(MATMUL_DTYPE)


def _split_heads_b(b, num_heads):      # (E,) -> (H, 1, Dh)
    Dh = b.shape[0] // num_heads
    return b.reshape(num_heads, 1, Dh).astype(jnp.float32)


def _row(v):
    return v.reshape(1, -1).astype(jnp.float32)


def _prep_gpt_block(bp, num_heads):
    E = bp["ln1_g"].shape[0]
    H = num_heads
    Dh = E // H
    aw = bp["attn_w"]                                    # (E, 3E) -> q | k | v
    return {
        "ln1_g": _row(bp["ln1_g"]),
        "wq": _split_heads_w(aw[:, :E], H),
        "wk": _split_heads_w(aw[:, E:2 * E], H),
        "wv": _split_heads_w(aw[:, 2 * E:], H),
        "wo": bp["attn_proj_w"].reshape(H, Dh, E).astype(MATMUL_DTYPE),
        "ln2_g": _row(bp["ln2_g"]),
        "w_fc": bp["mlp_fc_w"].astype(MATMUL_DTYPE),
        "w_proj": bp["mlp_proj_w"].astype(MATMUL_DTYPE),
    }


def _prep_gpt_stack(block_params, num_heads):
    """Stack per-block prepared weights on a leading `depth` axis for one pallas_call."""
    prepped = [_prep_gpt_block(bp, num_heads) for bp in block_params]
    return {k: jnp.stack([p[k] for p in prepped], axis=0) for k in prepped[0]}


def _prep_cross_block(p, num_heads):
    E = p["ln_q_g"].shape[0]
    H = num_heads
    Dh = E // H
    return {
        "lnq_g": _row(p["ln_q_g"]), "lnq_b": _row(p["ln_q_b"]),
        "lnkv_g": _row(p["ln_kv_g"]), "lnkv_b": _row(p["ln_kv_b"]),
        "wq": _split_heads_w(p["q_w"], H), "bq": _split_heads_b(p["q_b"], H),
        "wk": _split_heads_w(p["k_w"], H), "bk": _split_heads_b(p["k_b"], H),
        "wv": _split_heads_w(p["v_w"], H), "bv": _split_heads_b(p["v_b"], H),
        "wo": p["o_w"].reshape(H, Dh, E).astype(MATMUL_DTYPE), "bo": _row(p["o_b"]),
        "ln2_g": _row(p["ln2_g"]), "ln2_b": _row(p["ln2_b"]),
        "wfc": p["fc_w"].astype(MATMUL_DTYPE), "bfc": _row(p["fc_b"]),
        "wpr": p["proj_w"].astype(MATMUL_DTYPE), "bpr": _row(p["proj_b"]),
    }


def _prepare_weights(params, cfg):
    H = cfg["num_heads"]
    return {
        "blocks": _prep_gpt_stack(params["blocks"], H) if params["blocks"] else None,
        "cross": _prep_cross_block(params["cross"], H),
        "query_blocks": (_prep_gpt_stack(params["query_blocks"], H)
                         if params["query_blocks"] else None),
        "tail": {
            "w": params["query_proj_w"].astype(MATMUL_DTYPE),
            "b": _row(params["query_proj_b"]),
            "e": params["vq_e"].astype(jnp.float32),
        },
    }


# ----------------------------------------------------------------------------
# Model forward (dropout p=0.0 -> identity); embedding gathers stay in JAX glue
# ----------------------------------------------------------------------------
def encoder_forward(params, cfg, tokens):
    B, L = tokens.shape
    E = cfg["embed_dim"]
    H = cfg["num_heads"]
    Lo = cfg["output_tokens"]

    prep = _prepare_weights(params, cfg)

    # TODO(synk): embedding-table gathers stay in XLA glue; an in-kernel gather would
    # need scalar-prefetch Element indexing, not worth it at these sizes.
    x = jnp.take(params["tok_emb"], tokens, axis=0)           # (B, L, E)
    x = x + params["pos_emb"][None, :L, :]
    if prep["blocks"] is not None:
        x = gpt_stack_fused(x, prep["blocks"], H)

    # TODO(synk): CrossAttentionBlock source not provided; standard pre-LN
    # cross-attention (query=z, key/value=x) + MLP with residuals is assumed.
    z = cross_block_fused(params["query_tokens"], x, params["query_pos_emb"],
                          prep["cross"], H)                   # includes + query_pos_emb
    if prep["query_blocks"] is not None:
        z = gpt_stack_fused(z, prep["query_blocks"], H)

    zp, zq, idx = proj_vq_fused(z.reshape(B * Lo, E), prep["tail"])
    zp = zp.reshape(B, Lo, cfg["output_dim"])
    zq = zq.reshape(B, Lo, cfg["output_dim"])
    dictionary_loss = jnp.mean((jax.lax.stop_gradient(zp) - zq) ** 2)
    commitment_loss = jnp.mean((zp - jax.lax.stop_gradient(zq)) ** 2)
    z_q = zp + jax.lax.stop_gradient(zq - zp)                 # straight-through
    indices = idx.reshape(B, Lo)
    return z_q, dictionary_loss, commitment_loss, indices


# ----------------------------------------------------------------------------
# Deterministic parameter init (shapes follow the torch module's __init__)
# ----------------------------------------------------------------------------
def _init_gpt_block(key, E):
    ks = jax.random.split(key, 4)
    return {
        "ln1_g": jnp.ones((E,), jnp.float32),
        "attn_w": 0.02 * jax.random.normal(ks[0], (E, 3 * E), jnp.float32),
        "attn_proj_w": 0.02 * jax.random.normal(ks[1], (E, E), jnp.float32),
        "ln2_g": jnp.ones((E,), jnp.float32),
        "mlp_fc_w": 0.02 * jax.random.normal(ks[2], (E, 4 * E), jnp.float32),
        "mlp_proj_w": 0.02 * jax.random.normal(ks[3], (4 * E, E), jnp.float32),
    }


def _init_cross_block(key, E, mlp_ratio):
    ks = jax.random.split(key, 12)
    Hd = mlp_ratio * E

    def lin(kw, kb, din, dout):
        return (0.02 * jax.random.normal(kw, (din, dout), jnp.float32),
                0.01 * jax.random.normal(kb, (dout,), jnp.float32))

    qw, qb = lin(ks[0], ks[1], E, E)
    kw, kb = lin(ks[2], ks[3], E, E)
    vw, vb = lin(ks[4], ks[5], E, E)
    ow, ob = lin(ks[6], ks[7], E, E)
    fw, fb = lin(ks[8], ks[9], E, Hd)
    pw, pb = lin(ks[10], ks[11], Hd, E)
    return {
        "ln_q_g": jnp.ones((E,), jnp.float32), "ln_q_b": jnp.zeros((E,), jnp.float32),
        "ln_kv_g": jnp.ones((E,), jnp.float32), "ln_kv_b": jnp.zeros((E,), jnp.float32),
        "q_w": qw, "q_b": qb, "k_w": kw, "k_b": kb, "v_w": vw, "v_b": vb,
        "o_w": ow, "o_b": ob,
        "ln2_g": jnp.ones((E,), jnp.float32), "ln2_b": jnp.zeros((E,), jnp.float32),
        "fc_w": fw, "fc_b": fb, "proj_w": pw, "proj_b": pb,
    }


def init_params(key, cfg):
    E = cfg["embed_dim"]
    keys = jax.random.split(key, 8 + cfg["depth"] + cfg["query_depth"])
    it = iter(keys)
    limit = 3.0 ** 0.5
    params = {
        "tok_emb": jax.random.normal(next(it), (cfg["input_vocab_size"], E), jnp.float32),
        "pos_emb": jax.random.normal(next(it), (cfg["input_tokens"], E), jnp.float32),
        "query_pos_emb": jax.random.normal(next(it), (cfg["output_tokens"], E), jnp.float32),
        "query_tokens": jnp.zeros((1, cfg["output_tokens"], E), jnp.float32),
        "blocks": [_init_gpt_block(next(it), E) for _ in range(cfg["depth"])],
        "cross": _init_cross_block(next(it), E, cfg["mlp_ratio"]),
        "query_blocks": [_init_gpt_block(next(it), E) for _ in range(cfg["query_depth"])],
        "query_proj_w": 0.02 * jax.random.normal(next(it), (E, cfg["output_dim"]), jnp.float32),
        "query_proj_b": 0.01 * jax.random.normal(next(it), (cfg["output_dim"],), jnp.float32),
        "vq_e": jax.random.uniform(next(it), (cfg["output_dim"], cfg["output_vocab_size"]),
                                   jnp.float32, minval=-limit, maxval=limit),
    }
    return params


# ----------------------------------------------------------------------------
if __name__ == "__main__":
    cfg = dict(
        input_vocab_size=32, output_vocab_size=16, embed_dim=32, num_heads=4,
        mlp_ratio=4, depth=2, query_depth=1, input_tokens=16, output_tokens=8,
        output_dim=16, dropout=0.0,
    )
    key = jax.random.PRNGKey(0)
    pkey, dkey = jax.random.split(key)
    params = init_params(pkey, cfg)
    tokens = jax.random.randint(dkey, (2, cfg["input_tokens"]), 0,
                                cfg["input_vocab_size"], dtype=jnp.int32)

    fwd = jax.jit(lambda p, t: encoder_forward(p, cfg, t))
    z_q, dict_loss, commit_loss, indices = fwd(params, tokens)
    jax.block_until_ready((z_q, dict_loss, commit_loss, indices))

    assert z_q.shape == (2, cfg["output_tokens"], cfg["output_dim"])
    assert z_q.dtype == jnp.float32
    assert indices.shape == (2, cfg["output_tokens"])
    assert indices.dtype == jnp.int32
    assert bool(jnp.all(indices >= 0)) and bool(jnp.all(indices < cfg["output_vocab_size"]))
    assert bool(jnp.isfinite(dict_loss)) and bool(jnp.isfinite(commit_loss))
    print("KERNEL_OK")
</pallas_src>

<mosaic_0001>
module attributes {stable_mosaic.version = 11 : i64} {
  func.func @_gpt_stack_kernel(%arg0: i32, %arg1: i32, %arg2: memref<1x16x32xf32, #tpu.memory_space<vmem>>, %arg3: memref<1x1x32xf32, #tpu.memory_space<vmem>>, %arg4: memref<1x4x32x8xbf16, #tpu.memory_space<vmem>>, %arg5: memref<1x4x32x8xbf16, #tpu.memory_space<vmem>>, %arg6: memref<1x4x32x8xbf16, #tpu.memory_space<vmem>>, %arg7: memref<1x4x8x32xbf16, #tpu.memory_space<vmem>>, %arg8: memref<1x1x32xf32, #tpu.memory_space<vmem>>, %arg9: memref<1x32x128xbf16, #tpu.memory_space<vmem>>, %arg10: memref<1x128x32xbf16, #tpu.memory_space<vmem>>, %arg11: memref<1x16x32xf32, #tpu.memory_space<vmem>>, %arg12: memref<16x32xf32, #tpu.memory_space<vmem>>) attributes {dimension_semantics = [#tpu.dimension_semantics<parallel>, #tpu.dimension_semantics<arbitrary>], iteration_bounds = array<i64: 2, 2>, scalar_prefetch = 0 : i64, scratch_operands = 1 : i64, tpu.core_type = #tpu.core_type<tc>, window_params = [{transform_indices = @transform_0, window_bounds = array<i64: 1, 16, 32>}, {transform_indices = @transform_1, window_bounds = array<i64: 1, 1, 32>}, {transform_indices = @transform_2, window_bounds = array<i64: 1, 4, 32, 8>}, {transform_indices = @transform_3, window_bounds = array<i64: 1, 4, 32, 8>}, {transform_indices = @transform_4, window_bounds = array<i64: 1, 4, 32, 8>}, {transform_indices = @transform_5, window_bounds = array<i64: 1, 4, 8, 32>}, {transform_indices = @transform_6, window_bounds = array<i64: 1, 1, 32>}, {transform_indices = @transform_7, window_bounds = array<i64: 1, 32, 128>}, {transform_indices = @transform_8, window_bounds = array<i64: 1, 128, 32>}, {transform_indices = @transform_9, window_bounds = array<i64: 1, 16, 32>}]} {
    %c0_i32 = arith.constant 0 : i32
    %0 = arith.cmpi eq, %arg1, %c0_i32 : i32
    %1 = arith.extui %0 : i1 to i32
    %c0_i32_0 = arith.constant 0 : i32
    %2 = arith.cmpi ne, %1, %c0_i32_0 : i32
    scf.if %2 {
      %c0_146 = arith.constant 0 : index
      %c0_147 = arith.constant 0 : index
      %c0_148 = arith.constant 0 : index
      %240 = vector.load %arg2[%c0_146, %c0_147, %c0_148] : memref<1x16x32xf32, #tpu.memory_space<vmem>>, vector<1x16x32xf32>
      %241 = vector.shape_cast %240 : vector<1x16x32xf32> to vector<16x32xf32>
      %c0_149 = arith.constant 0 : index
      %c0_150 = arith.constant 0 : index
      %242 = vector.load %arg12[%c0_149, %c0_150] : memref<16x32xf32, #tpu.memory_space<vmem>>, vector<16x32xf32>
      tpu.vector_store %arg12[%c0_149, %c0_150], %241 {strides = array<i32>} : memref<16x32xf32, #tpu.memory_space<vmem>>, vector<16x32xf32>,
    } else {
    }
    %c0 = arith.constant 0 : index
    %c0_1 = arith.constant 0 : index
    %3 = vector.load %arg12[%c0, %c0_1] : memref<16x32xf32, #tpu.memory_space<vmem>>, vector<16x32xf32>
    %c0_2 = arith.constant 0 : index
    %c0_3 = arith.constant 0 : index
    %c0_4 = arith.constant 0 : index
    %4 = vector.load %arg3[%c0_2, %c0_3, %c0_4] : memref<1x1x32xf32, #tpu.memory_space<vmem>>, vector<1x1x32xf32>
    %5 = vector.shape_cast %4 : vector<1x1x32xf32> to vector<1x32xf32>
    %cst = arith.constant dense<0.000000e+00> : vector<16xf32>
    %6 = vector.multi_reduction <add>, %3, %cst [1] : vector<16x32xf32> to vector<16xf32>
    %7 = vector.shape_cast %6 : vector<16xf32> to vector<16x1xf32>
    %cst_5 = arith.constant 3.200000e+01 : f32
    %8 = vector.broadcast %cst_5 : f32 to vector<16x1xf32>
    %9 = arith.divf %7, %8 : vector<16x1xf32>
    %10 = vector.broadcast %9 : vector<16x1xf32> to vector<16x32xf32>
    %11 = arith.subf %3, %10 : vector<16x32xf32>
    %12 = arith.mulf %11, %11 : vector<16x32xf32>
    %cst_6 = arith.constant dense<0.000000e+00> : vector<16xf32>
    %13 = vector.multi_reduction <add>, %12, %cst_6 [1] : vector<16x32xf32> to vector<16xf32>
    %14 = vector.shape_cast %13 : vector<16xf32> to vector<16x1xf32>
    %cst_7 = arith.constant 3.200000e+01 : f32
    %15 = vector.broadcast %cst_7 : f32 to vector<16x1xf32>
    %16 = arith.divf %14, %15 : vector<16x1xf32>
    %cst_8 = arith.constant 9.99999974E-6 : f32
    %17 = vector.broadcast %cst_8 : f32 to vector<16x1xf32>
    %18 = arith.addf %16, %17 : vector<16x1xf32>
    %19 = math.rsqrt %18 : vector<16x1xf32>
    %20 = vector.broadcast %19 : vector<16x1xf32> to vector<16x32xf32>
    %21 = arith.mulf %11, %20 : vector<16x32xf32>
    %22 = vector.broadcast %5 : vector<1x32xf32> to vector<16x32xf32>
    %23 = arith.mulf %21, %22 : vector<16x32xf32>
    %24 = arith.truncf %23 : vector<16x32xf32> to vector<16x32xbf16>
    %25 = tpu.iota {dimensions = array<i32: 0>} : vector<16x16xi32>
    %26 = tpu.iota {dimensions = array<i32: 1>} : vector<16x16xi32>
    %27 = arith.cmpi sle, %26, %25 : vector<16x16xi32>
    %cst_9 = arith.constant 0.000000e+00 : f32
    %28 = vector.broadcast %cst_9 : f32 to vector<16x32xf32>
    %c0_10 = arith.constant 0 : index
    %c0_11 = arith.constant 0 : index
    %c0_12 = arith.constant 0 : index
    %c0_13 = arith.constant 0 : index
    %29 = vector.load %arg4[%c0_10, %c0_11, %c0_12, %c0_13] : memref<1x4x32x8xbf16, #tpu.memory_space<vmem>>, vector<1x1x32x8xbf16>
    %30 = vector.shape_cast %29 : vector<1x1x32x8xbf16> to vector<32x8xbf16>
    %cst_14 = arith.constant dense<0.000000e+00> : vector<16x8xf32>
    %31 = tpu.matmul %24, %30, %cst_14 {dimension_numbers = #tpu.dot_dimension_numbers<[1], [0], [0], [1], [0, 0, 1, 1], [], []>} : vector<16x32xbf16>, vector<32x8xbf16>, vector<16x8xf32> -> vector<16x8xf32>
    %c0_15 = arith.constant 0 : index
    %c0_16 = arith.constant 0 : index
    %c0_17 = arith.constant 0 : index
    %c0_18 = arith.constant 0 : index
    %32 = vector.load %arg5[%c0_15, %c0_16, %c0_17, %c0_18] : memref<1x4x32x8xbf16, #tpu.memory_space<vmem>>, vector<1x1x32x8xbf16>
    %33 = vector.shape_cast %32 : vector<1x1x32x8xbf16> to vector<32x8xbf16>
    %cst_19 = arith.constant dense<0.000000e+00> : vector<16x8xf32>
    %34 = tpu.matmul %24, %33, %cst_19 {dimension_numbers = #tpu.dot_dimension_numbers<[1], [0], [0], [1], [0, 0, 1, 1], [], []>} : vector<16x32xbf16>, vector<32x8xbf16>, vector<16x8xf32> -> vector<16x8xf32>
    %c0_20 = arith.constant 0 : index
    %c0_21 = arith.constant 0 : index
    %c0_22 = arith.constant 0 : index
    %c0_23 = arith.constant 0 : index
    %35 = vector.load %arg6[%c0_20, %c0_21, %c0_22, %c0_23] : memref<1x4x32x8xbf16, #tpu.memory_space<vmem>>, vector<1x1x32x8xbf16>
    %36 = vector.shape_cast %35 : vector<1x1x32x8xbf16> to vector<32x8xbf16>
    %cst_24 = arith.constant dense<0.000000e+00> : vector<16x8xf32>
    %37 = tpu.matmul %24, %36, %cst_24 {dimension_numbers = #tpu.dot_dimension_numbers<[1], [0], [0], [1], [0, 0, 1, 1], [], []>} : vector<16x32xbf16>, vector<32x8xbf16>, vector<16x8xf32> -> vector<16x8xf32>
    %38 = arith.truncf %31 : vector<16x8xf32> to vector<16x8xbf16>
    %39 = arith.truncf %34 : vector<16x8xf32> to vector<16x8xbf16>
    %cst_25 = arith.constant dense<0.000000e+00> : vector<16x16xf32>
    %40 = tpu.matmul %38, %39, %cst_25 {dimension_numbers = #tpu.dot_dimension_numbers<[1], [1], [0], [0], [0, 0, 1, 0], [], []>} : vector<16x8xbf16>, vector<16x8xbf16>, vector<16x16xf32> -> vector<16x16xf32>
    %cst_26 = arith.constant 0.353553385 : f32
    %41 = vector.broadcast %cst_26 : f32 to vector<16x16xf32>
    %42 = arith.mulf %40, %41 : vector<16x16xf32>
    %cst_27 = arith.constant -1.000000e+30 : f32
    %43 = vector.broadcast %cst_27 : f32 to vector<16x16xf32>
    %44 = arith.select %27, %42, %43 : vector<16x16xi1>, vector<16x16xf32>
    %cst_28 = arith.constant dense<0xFF800000> : vector<16xf32>
    %45 = vector.multi_reduction <maximumf>, %44, %cst_28 [1] : vector<16x16xf32> to vector<16xf32>
    %46 = vector.shape_cast %45 : vector<16xf32> to vector<16x1xf32>
    %47 = vector.broadcast %46 : vector<16x1xf32> to vector<16x16xf32>
    %48 = arith.subf %44, %47 : vector<16x16xf32>
    %49 = math.exp %48 : vector<16x16xf32>
    %cst_29 = arith.constant dense<0.000000e+00> : vector<16xf32>
    %50 = vector.multi_reduction <add>, %49, %cst_29 [1] : vector<16x16xf32> to vector<16xf32>
    %51 = vector.shape_cast %50 : vector<16xf32> to vector<16x1xf32>
    %52 = tpu.reciprocal %51 {approx = true} : vector<16x1xf32> -> vector<16x1xf32>
    %53 = vector.broadcast %52 : vector<16x1xf32> to vector<16x16xf32>
    %54 = arith.mulf %49, %53 : vector<16x16xf32>
    %55 = arith.truncf %54 : vector<16x16xf32> to vector<16x16xbf16>
    %56 = arith.truncf %37 : vector<16x8xf32> to vector<16x8xbf16>
    %cst_30 = arith.constant dense<0.000000e+00> : vector<16x8xf32>
    %57 = tpu.matmul %55, %56, %cst_30 {dimension_numbers = #tpu.dot_dimension_numbers<[1], [0], [0], [1], [0, 0, 1, 1], [], []>} : vector<16x16xbf16>, vector<16x8xbf16>, vector<16x8xf32> -> vector<16x8xf32>
    %58 = arith.truncf %57 : vector<16x8xf32> to vector<16x8xbf16>
    %c0_31 = arith.constant 0 : index
    %c0_32 = arith.constant 0 : index
    %c0_33 = arith.constant 0 : index
    %c0_34 = arith.constant 0 : index
    %59 = vector.load %arg7[%c0_31, %c0_32, %c0_33, %c0_34] : memref<1x4x8x32xbf16, #tpu.memory_space<vmem>>, vector<1x1x8x32xbf16>
    %60 = vector.shape_cast %59 : vector<1x1x8x32xbf16> to vector<8x32xbf16>
    %cst_35 = arith.constant dense<0.000000e+00> : vector<16x32xf32>
    %61 = tpu.matmul %58, %60, %cst_35 {dimension_numbers = #tpu.dot_dimension_numbers<[1], [0], [0], [1], [0, 0, 1, 1], [], []>} : vector<16x8xbf16>, vector<8x32xbf16>, vector<16x32xf32> -> vector<16x32xf32>
    %62 = arith.addf %28, %61 : vector<16x32xf32>
    %c0_36 = arith.constant 0 : index
    %c1 = arith.constant 1 : index
    %c0_37 = arith.constant 0 : index
    %c0_38 = arith.constant 0 : index
    %63 = vector.load %arg4[%c0_36, %c1, %c0_37, %c0_38] : memref<1x4x32x8xbf16, #tpu.memory_space<vmem>>, vector<1x1x32x8xbf16>
    %64 = vector.shape_cast %63 : vector<1x1x32x8xbf16> to vector<32x8xbf16>
    %cst_39 = arith.constant dense<0.000000e+00> : vector<16x8xf32>
    %65 = tpu.matmul %24, %64, %cst_39 {dimension_numbers = #tpu.dot_dimension_numbers<[1], [0], [0], [1], [0, 0, 1, 1], [], []>} : vector<16x32xbf16>, vector<32x8xbf16>, vector<16x8xf32> -> vector<16x8xf32>
    %c0_40 = arith.constant 0 : index
    %c1_41 = arith.constant 1 : index
    %c0_42 = arith.constant 0 : index
    %c0_43 = arith.constant 0 : index
    %66 = vector.load %arg5[%c0_40, %c1_41, %c0_42, %c0_43] : memref<1x4x32x8xbf16, #tpu.memory_space<vmem>>, vector<1x1x32x8xbf16>
    %67 = vector.shape_cast %66 : vector<1x1x32x8xbf16> to vector<32x8xbf16>
    %cst_44 = arith.constant dense<0.000000e+00> : vector<16x8xf32>
    %68 = tpu.matmul %24, %67, %cst_44 {dimension_numbers = #tpu.dot_dimension_numbers<[1], [0], [0], [1], [0, 0, 1, 1], [], []>} : vector<16x32xbf16>, vector<32x8xbf16>, vector<16x8xf32> -> vector<16x8xf32>
    %c0_45 = arith.constant 0 : index
    %c1_46 = arith.constant 1 : index
    %c0_47 = arith.constant 0 : index
    %c0_48 = arith.constant 0 : index
    %69 = vector.load %arg6[%c0_45, %c1_46, %c0_47, %c0_48] : memref<1x4x32x8xbf16, #tpu.memory_space<vmem>>, vector<1x1x32x8xbf16>
    %70 = vector.shape_cast %69 : vector<1x1x32x8xbf16> to vector<32x8xbf16>
    %cst_49 = arith.constant dense<0.000000e+00> : vector<16x8xf32>
    %71 = tpu.matmul %24, %70, %cst_49 {dimension_numbers = #tpu.dot_dimension_numbers<[1], [0], [0], [1], [0, 0, 1, 1], [], []>} : vector<16x32xbf16>, vector<32x8xbf16>, vector<16x8xf32> -> vector<16x8xf32>
    %72 = arith.truncf %65 : vector<16x8xf32> to vector<16x8xbf16>
    %73 = arith.truncf %68 : vector<16x8xf32> to vector<16x8xbf16>
    %cst_50 = arith.constant dense<0.000000e+00> : vector<16x16xf32>
    %74 = tpu.matmul %72, %73, %cst_50 {dimension_numbers = #tpu.dot_dimension_numbers<[1], [1], [0], [0], [0, 0, 1, 0], [], []>} : vector<16x8xbf16>, vector<16x8xbf16>, vector<16x16xf32> -> vector<16x16xf32>
    %cst_51 = arith.constant 0.353553385 : f32
    %75 = vector.broadcast %cst_51 : f32 to vector<16x16xf32>
    %76 = arith.mulf %74, %75 : vector<16x16xf32>
    %cst_52 = arith.constant -1.000000e+30 : f32
    %77 = vector.broadcast %cst_52 : f32 to vector<16x16xf32>
    %78 = arith.select %27, %76, %77 : vector<16x16xi1>, vector<16x16xf32>
    %cst_53 = arith.constant dense<0xFF800000> : vector<16xf32>
    %79 = vector.multi_reduction <maximumf>, %78, %cst_53 [1] : vector<16x16xf32> to vector<16xf32>
    %80 = vector.shape_cast %79 : vector<16xf32> to vector<16x1xf32>
    %81 = vector.broadcast %80 : vector<16x1xf32> to vector<16x16xf32>
    %82 = arith.subf %78, %81 : vector<16x16xf32>
    %83 = math.exp %82 : vector<16x16xf32>
    %cst_54 = arith.constant dense<0.000000e+00> : vector<16xf32>
    %84 = vector.multi_reduction <add>, %83, %cst_54 [1] : vector<16x16xf32> to vector<16xf32>
    %85 = vector.shape_cast %84 : vector<16xf32> to vector<16x1xf32>
    %86 = tpu.reciprocal %85 {approx = true} : vector<16x1xf32> -> vector<16x1xf32>
    %87 = vector.broadcast %86 : vector<16x1xf32> to vector<16x16xf32>
    %88 = arith.mulf %83, %87 : vector<16x16xf32>
    %89 = arith.truncf %88 : vector<16x16xf32> to vector<16x16xbf16>
    %90 = arith.truncf %71 : vector<16x8xf32> to vector<16x8xbf16>
    %cst_55 = arith.constant dense<0.000000e+00> : vector<16x8xf32>
    %91 = tpu.matmul %89, %90, %cst_55 {dimension_numbers = #tpu.dot_dimension_numbers<[1], [0], [0], [1], [0, 0, 1, 1], [], []>} : vector<16x16xbf16>, vector<16x8xbf16>, vector<16x8xf32> -> vector<16x8xf32>
    %92 = arith.truncf %91 : vector<16x8xf32> to vector<16x8xbf16>
    %c0_56 = arith.constant 0 : index
    %c1_57 = arith.constant 1 : index
    %c0_58 = arith.constant 0 : index
    %c0_59 = arith.constant 0 : index
    %93 = vector.load %arg7[%c0_56, %c1_57, %c0_58, %c0_59] : memref<1x4x8x32xbf16, #tpu.memory_space<vmem>>, vector<1x1x8x32xbf16>
    %94 = vector.shape_cast %93 : vector<1x1x8x32xbf16> to vector<8x32xbf16>
    %cst_60 = arith.constant dense<0.000000e+00> : vector<16x32xf32>
    %95 = tpu.matmul %92, %94, %cst_60 {dimension_numbers = #tpu.dot_dimension_numbers<[1], [0], [0], [1], [0, 0, 1, 1], [], []>} : vector<16x8xbf16>, vector<8x32xbf16>, vector<16x32xf32> -> vector<16x32xf32>
    %96 = arith.addf %62, %95 : vector<16x32xf32>
    %c0_61 = arith.constant 0 : index
    %c2 = arith.constant 2 : index
    %c0_62 = arith.constant 0 : index
    %c0_63 = arith.constant 0 : index
    %97 = vector.load %arg4[%c0_61, %c2, %c0_62, %c0_63] : memref<1x4x32x8xbf16, #tpu.memory_space<vmem>>, vector<1x1x32x8xbf16>
    %98 = vector.shape_cast %97 : vector<1x1x32x8xbf16> to vector<32x8xbf16>
    %cst_64 = arith.constant dense<0.000000e+00> : vector<16x8xf32>
    %99 = tpu.matmul %24, %98, %cst_64 {dimension_numbers = #tpu.dot_dimension_numbers<[1], [0], [0], [1], [0, 0, 1, 1], [], []>} : vector<16x32xbf16>, vector<32x8xbf16>, vector<16x8xf32> -> vector<16x8xf32>
    %c0_65 = arith.constant 0 : index
    %c2_66 = arith.constant 2 : index
    %c0_67 = arith.constant 0 : index
    %c0_68 = arith.constant 0 : index
    %100 = vector.load %arg5[%c0_65, %c2_66, %c0_67, %c0_68] : memref<1x4x32x8xbf16, #tpu.memory_space<vmem>>, vector<1x1x32x8xbf16>
    %101 = vector.shape_cast %100 : vector<1x1x32x8xbf16> to vector<32x8xbf16>
    %cst_69 = arith.constant dense<0.000000e+00> : vector<16x8xf32>
    %102 = tpu.matmul %24, %101, %cst_69 {dimension_numbers = #tpu.dot_dimension_numbers<[1], [0], [0], [1], [0, 0, 1, 1], [], []>} : vector<16x32xbf16>, vector<32x8xbf16>, vector<16x8xf32> -> vector<16x8xf32>
    %c0_70 = arith.constant 0 : index
    %c2_71 = arith.constant 2 : index
    %c0_72 = arith.constant 0 : index
    %c0_73 = arith.constant 0 : index
    %103 = vector.load %arg6[%c0_70, %c2_71, %c0_72, %c0_73] : memref<1x4x32x8xbf16, #tpu.memory_space<vmem>>, vector<1x1x32x8xbf16>
    %104 = vector.shape_cast %103 : vector<1x1x32x8xbf16> to vector<32x8xbf16>
    %cst_74 = arith.constant dense<0.000000e+00> : vector<16x8xf32>
    %105 = tpu.matmul %24, %104, %cst_74 {dimension_numbers = #tpu.dot_dimension_numbers<[1], [0], [0], [1], [0, 0, 1, 1], [], []>} : vector<16x32xbf16>, vector<32x8xbf16>, vector<16x8xf32> -> vector<16x8xf32>
    %106 = arith.truncf %99 : vector<16x8xf32> to vector<16x8xbf16>
    %107 = arith.truncf %102 : vector<16x8xf32> to vector<16x8xbf16>
    %cst_75 = arith.constant dense<0.000000e+00> : vector<16x16xf32>
    %108 = tpu.matmul %106, %107, %cst_75 {dimension_numbers = #tpu.dot_dimension_numbers<[1], [1], [0], [0], [0, 0, 1, 0], [], []>} : vector<16x8xbf16>, vector<16x8xbf16>, vector<16x16xf32> -> vector<16x16xf32>
    %cst_76 = arith.constant 0.353553385 : f32
    %109 = vector.broadcast %cst_76 : f32 to vector<16x16xf32>
    %110 = arith.mulf %108, %109 : vector<16x16xf32>
    %cst_77 = arith.constant -1.000000e+30 : f32
    %111 = vector.broadcast %cst_77 : f32 to vector<16x16xf32>
    %112 = arith.select %27, %110, %111 : vector<16x16xi1>, vector<16x16xf32>
    %cst_78 = arith.constant dense<0xFF800000> : vector<16xf32>
    %113 = vector.multi_reduction <maximumf>, %112, %cst_78 [1] : vector<16x16xf32> to vector<16xf32>
    %114 = vector.shape_cast %113 : vector<16xf32> to vector<16x1xf32>
    %115 = vector.broadcast %114 : vector<16x1xf32> to vector<16x16xf32>
    %116 = arith.subf %112, %115 : vector<16x16xf32>
    %117 = math.exp %116 : vector<16x16xf32>
    %cst_79 = arith.constant dense<0.000000e+00> : vector<16xf32>
    %118 = vector.multi_reduction <add>, %117, %cst_79 [1] : vector<16x16xf32> to vector<16xf32>
    %119 = vector.shape_cast %118 : vector<16xf32> to vector<16x1xf32>
    %120 = tpu.reciprocal %119 {approx = true} : vector<16x1xf32> -> vector<16x1xf32>
    %121 = vector.broadcast %120 : vector<16x1xf32> to vector<16x16xf32>
    %122 = arith.mulf %117, %121 : vector<16x16xf32>
    %123 = arith.truncf %122 : vector<16x16xf32> to vector<16x16xbf16>
    %124 = arith.truncf %105 : vector<16x8xf32> to vector<16x8xbf16>
    %cst_80 = arith.constant dense<0.000000e+00> : vector<16x8xf32>
    %125 = tpu.matmul %123, %124, %cst_80 {dimension_numbers = #tpu.dot_dimension_numbers<[1], [0], [0], [1], [0, 0, 1, 1], [], []>} : vector<16x16xbf16>, vector<16x8xbf16>, vector<16x8xf32> -> vector<16x8xf32>
    %126 = arith.truncf %125 : vector<16x8xf32> to vector<16x8xbf16>
    %c0_81 = arith.constant 0 : index
    %c2_82 = arith.constant 2 : index
    %c0_83 = arith.constant 0 : index
    %c0_84 = arith.constant 0 : index
    %127 = vector.load %arg7[%c0_81, %c2_82, %c0_83, %c0_84] : memref<1x4x8x32xbf16, #tpu.memory_space<vmem>>, vector<1x1x8x32xbf16>
    %128 = vector.shape_cast %127 : vector<1x1x8x32xbf16> to vector<8x32xbf16>
    %cst_85 = arith.constant dense<0.000000e+00> : vector<16x32xf32>
    %129 = tpu.matmul %126, %128, %cst_85 {dimension_numbers = #tpu.dot_dimension_numbers<[1], [0], [0], [1], [0, 0, 1, 1], [], []>} : vector<16x8xbf16>, vector<8x32xbf16>, vector<16x32xf32> -> vector<16x32xf32>
    %130 = arith.addf %96, %129 : vector<16x32xf32>
    %c0_86 = arith.constant 0 : index
    %c3 = arith.constant 3 : index
    %c0_87 = arith.constant 0 : index
    %c0_88 = arith.constant 0 : index
    %131 = vector.load %arg4[%c0_86, %c3, %c0_87, %c0_88] : memref<1x4x32x8xbf16, #tpu.memory_space<vmem>>, vector<1x1x32x8xbf16>
    %132 = vector.shape_cast %131 : vector<1x1x32x8xbf16> to vector<32x8xbf16>
    %cst_89 = arith.constant dense<0.000000e+00> : vector<16x8xf32>
    %133 = tpu.matmul %24, %132, %cst_89 {dimension_numbers = #tpu.dot_dimension_numbers<[1], [0], [0], [1], [0, 0, 1, 1], [], []>} : vector<16x32xbf16>, vector<32x8xbf16>, vector<16x8xf32> -> vector<16x8xf32>
    %c0_90 = arith.constant 0 : index
    %c3_91 = arith.constant 3 : index
    %c0_92 = arith.constant 0 : index
    %c0_93 = arith.constant 0 : index
    %134 = vector.load %arg5[%c0_90, %c3_91, %c0_92, %c0_93] : memref<1x4x32x8xbf16, #tpu.memory_space<vmem>>, vector<1x1x32x8xbf16>
    %135 = vector.shape_cast %134 : vector<1x1x32x8xbf16> to vector<32x8xbf16>
    %cst_94 = arith.constant dense<0.000000e+00> : vector<16x8xf32>
    %136 = tpu.matmul %24, %135, %cst_94 {dimension_numbers = #tpu.dot_dimension_numbers<[1], [0], [0], [1], [0, 0, 1, 1], [], []>} : vector<16x32xbf16>, vector<32x8xbf16>, vector<16x8xf32> -> vector<16x8xf32>
    %c0_95 = arith.constant 0 : index
    %c3_96 = arith.constant 3 : index
    %c0_97 = arith.constant 0 : index
    %c0_98 = arith.constant 0 : index
    %137 = vector.load %arg6[%c0_95, %c3_96, %c0_97, %c0_98] : memref<1x4x32x8xbf16, #tpu.memory_space<vmem>>, vector<1x1x32x8xbf16>
    %138 = vector.shape_cast %137 : vector<1x1x32x8xbf16> to vector<32x8xbf16>
    %cst_99 = arith.constant dense<0.000000e+00> : vector<16x8xf32>
    %139 = tpu.matmul %24, %138, %cst_99 {dimension_numbers = #tpu.dot_dimension_numbers<[1], [0], [0], [1], [0, 0, 1, 1], [], []>} : vector<16x32xbf16>, vector<32x8xbf16>, vector<16x8xf32> -> vector<16x8xf32>
    %140 = arith.truncf %133 : vector<16x8xf32> to vector<16x8xbf16>
    %141 = arith.truncf %136 : vector<16x8xf32> to vector<16x8xbf16>
    %cst_100 = arith.constant dense<0.000000e+00> : vector<16x16xf32>
    %142 = tpu.matmul %140, %141, %cst_100 {dimension_numbers = #tpu.dot_dimension_numbers<[1], [1], [0], [0], [0, 0, 1, 0], [], []>} : vector<16x8xbf16>, vector<16x8xbf16>, vector<16x16xf32> -> vector<16x16xf32>
    %cst_101 = arith.constant 0.353553385 : f32
    %143 = vector.broadcast %cst_101 : f32 to vector<16x16xf32>
    %144 = arith.mulf %142, %143 : vector<16x16xf32>
    %cst_102 = arith.constant -1.000000e+30 : f32
    %145 = vector.broadcast %cst_102 : f32 to vector<16x16xf32>
    %146 = arith.select %27, %144, %145 : vector<16x16xi1>, vector<16x16xf32>
    %cst_103 = arith.constant dense<0xFF800000> : vector<16xf32>
    %147 = vector.multi_reduction <maximumf>, %146, %cst_103 [1] : vector<16x16xf32> to vector<16xf32>
    %148 = vector.shape_cast %147 : vector<16xf32> to vector<16x1xf32>
    %149 = vector.broadcast %148 : vector<16x1xf32> to vector<16x16xf32>
    %150 = arith.subf %146, %149 : vector<16x16xf32>
    %151 = math.exp %150 : vector<16x16xf32>
    %cst_104 = arith.constant dense<0.000000e+00> : vector<16xf32>
    %152 = vector.multi_reduction <add>, %151, %cst_104 [1] : vector<16x16xf32> to vector<16xf32>
    %153 = vector.shape_cast %152 : vector<16xf32> to vector<16x1xf32>
    %154 = tpu.reciprocal %153 {approx = true} : vector<16x1xf32> -> vector<16x1xf32>
    %155 = vector.broadcast %154 : vector<16x1xf32> to vector<16x16xf32>
    %156 = arith.mulf %151, %155 : vector<16x16xf32>
    %157 = arith.truncf %156 : vector<16x16xf32> to vector<16x16xbf16>
    %158 = arith.truncf %139 : vector<16x8xf32> to vector<16x8xbf16>
    %cst_105 = arith.constant dense<0.000000e+00> : vector<16x8xf32>
    %159 = tpu.matmul %157, %158, %cst_105 {dimension_numbers = #tpu.dot_dimension_numbers<[1], [0], [0], [1], [0, 0, 1, 1], [], []>} : vector<16x16xbf16>, vector<16x8xbf16>, vector<16x8xf32> -> vector<16x8xf32>
    %160 = arith.truncf %159 : vector<16x8xf32> to vector<16x8xbf16>
    %c0_106 = arith.constant 0 : index
    %c3_107 = arith.constant 3 : index
    %c0_108 = arith.constant 0 : index
    %c0_109 = arith.constant 0 : index
    %161 = vector.load %arg7[%c0_106, %c3_107, %c0_108, %c0_109] : memref<1x4x8x32xbf16, #tpu.memory_space<vmem>>, vector<1x1x8x32xbf16>
    %162 = vector.shape_cast %161 : vector<1x1x8x32xbf16> to vector<8x32xbf16>
    %cst_110 = arith.constant dense<0.000000e+00> : vector<16x32xf32>
    %163 = tpu.matmul %160, %162, %cst_110 {dimension_numbers = #tpu.dot_dimension_numbers<[1], [0], [0], [1], [0, 0, 1, 1], [], []>} : vector<16x8xbf16>, vector<8x32xbf16>, vector<16x32xf32> -> vector<16x32xf32>
    %164 = arith.addf %130, %163 : vector<16x32xf32>
    %165 = arith.addf %3, %164 : vector<16x32xf32>
    %c0_111 = arith.constant 0 : index
    %c0_112 = arith.constant 0 : index
    %c0_113 = arith.constant 0 : index
    %166 = vector.load %arg8[%c0_111, %c0_112, %c0_113] : memref<1x1x32xf32, #tpu.memory_space<vmem>>, vector<1x1x32xf32>
    %167 = vector.shape_cast %166 : vector<1x1x32xf32> to vector<1x32xf32>
    %cst_114 = arith.constant dense<0.000000e+00> : vector<16xf32>
    %168 = vector.multi_reduction <add>, %165, %cst_114 [1] : vector<16x32xf32> to vector<16xf32>
    %169 = vector.shape_cast %168 : vector<16xf32> to vector<16x1xf32>
    %cst_115 = arith.constant 3.200000e+01 : f32
    %170 = vector.broadcast %cst_115 : f32 to vector<16x1xf32>
    %171 = arith.divf %169, %170 : vector<16x1xf32>
    %172 = vector.broadcast %171 : vector<16x1xf32> to vector<16x32xf32>
    %173 = arith.subf %165, %172 : vector<16x32xf32>
    %174 = arith.mulf %173, %173 : vector<16x32xf32>
    %cst_116 = arith.constant dense<0.000000e+00> : vector<16xf32>
    %175 = vector.multi_reduction <add>, %174, %cst_116 [1] : vector<16x32xf32> to vector<16xf32>
    %176 = vector.shape_cast %175 : vector<16xf32> to vector<16x1xf32>
    %cst_117 = arith.constant 3.200000e+01 : f32
    %177 = vector.broadcast %cst_117 : f32 to vector<16x1xf32>
    %178 = arith.divf %176, %177 : vector<16x1xf32>
    %cst_118 = arith.constant 9.99999974E-6 : f32
    %179 = vector.broadcast %cst_118 : f32 to vector<16x1xf32>
    %180 = arith.addf %178, %179 : vector<16x1xf32>
    %181 = math.rsqrt %180 : vector<16x1xf32>
    %182 = vector.broadcast %181 : vector<16x1xf32> to vector<16x32xf32>
    %183 = arith.mulf %173, %182 : vector<16x32xf32>
    %184 = vector.broadcast %167 : vector<1x32xf32> to vector<16x32xf32>
    %185 = arith.mulf %183, %184 : vector<16x32xf32>
    %186 = arith.truncf %185 : vector<16x32xf32> to vector<16x32xbf16>
    %c0_119 = arith.constant 0 : index
    %c0_120 = arith.constant 0 : index
    %c0_121 = arith.constant 0 : index
    %187 = vector.load %arg9[%c0_119, %c0_120, %c0_121] : memref<1x32x128xbf16, #tpu.memory_space<vmem>>, vector<1x32x128xbf16>
    %188 = vector.shape_cast %187 : vector<1x32x128xbf16> to vector<32x128xbf16>
    %cst_122 = arith.constant dense<0.000000e+00> : vector<16x128xf32>
    %189 = tpu.matmul %186, %188, %cst_122 {dimension_numbers = #tpu.dot_dimension_numbers<[1], [0], [0], [1], [0, 0, 1, 1], [], []>} : vector<16x32xbf16>, vector<32x128xbf16>, vector<16x128xf32> -> vector<16x128xf32>
    %cst_123 = arith.constant 5.000000e-01 : f32
    %190 = vector.broadcast %cst_123 : f32 to vector<16x128xf32>
    %191 = arith.mulf %190, %189 : vector<16x128xf32>
    %cst_124 = arith.constant 0.707106769 : f32
    %192 = vector.broadcast %cst_124 : f32 to vector<16x128xf32>
    %193 = arith.mulf %189, %192 : vector<16x128xf32>
    %cst_125 = arith.constant 0.000000e+00 : f32
    %194 = vector.broadcast %cst_125 : f32 to vector<16x128xf32>
    %195 = arith.cmpf oge, %193, %194 : vector<16x128xf32>
    %cst_126 = arith.constant 1.000000e+00 : f32
    %cst_127 = arith.constant -1.000000e+00 : f32
    %196 = vector.broadcast %cst_126 : f32 to vector<16x128xf32>
    %197 = vector.broadcast %cst_127 : f32 to vector<16x128xf32>
    %198 = arith.select %195, %196, %197 : vector<16x128xi1>, vector<16x128xf32>
    %199 = math.absf %193 : vector<16x128xf32>
    %cst_128 = arith.constant 0.327591091 : f32
    %200 = vector.broadcast %cst_128 : f32 to vector<16x128xf32>
    %201 = arith.mulf %200, %199 : vector<16x128xf32>
    %cst_129 = arith.constant 1.000000e+00 : f32
    %202 = vector.broadcast %cst_129 : f32 to vector<16x128xf32>
    %203 = arith.addf %202, %201 : vector<16x128xf32>
    %cst_130 = arith.constant 1.000000e+00 : f32
    %204 = vector.broadcast %cst_130 : f32 to vector<16x128xf32>
    %205 = arith.divf %204, %203 : vector<16x128xf32>
    %cst_131 = arith.constant 1.06140542 : f32
    %206 = vector.broadcast %cst_131 : f32 to vector<16x128xf32>
    %207 = arith.mulf %206, %205 : vector<16x128xf32>
    %cst_132 = arith.constant -1.45315206 : f32
    %208 = vector.broadcast %cst_132 : f32 to vector<16x128xf32>
    %209 = arith.addf %207, %208 : vector<16x128xf32>
    %210 = arith.mulf %209, %205 : vector<16x128xf32>
    %cst_133 = arith.constant 1.42141378 : f32
    %211 = vector.broadcast %cst_133 : f32 to vector<16x128xf32>
    %212 = arith.addf %210, %211 : vector<16x128xf32>
    %213 = arith.mulf %212, %205 : vector<16x128xf32>
    %cst_134 = arith.constant -0.284496725 : f32
    %214 = vector.broadcast %cst_134 : f32 to vector<16x128xf32>
    %215 = arith.addf %213, %214 : vector<16x128xf32>
    %216 = arith.mulf %215, %205 : vector<16x128xf32>
    %cst_135 = arith.constant 0.254829586 : f32
    %217 = vector.broadcast %cst_135 : f32 to vector<16x128xf32>
    %218 = arith.addf %216, %217 : vector<16x128xf32>
    %219 = arith.mulf %218, %205 : vector<16x128xf32>
    %cst_136 = arith.constant 0.000000e+00 : f32
    %220 = vector.broadcast %cst_136 : f32 to vector<16x128xf32>
    %221 = arith.subf %220, %199 : vector<16x128xf32>
    %222 = arith.mulf %221, %199 : vector<16x128xf32>
    %223 = math.exp %222 : vector<16x128xf32>
    %224 = arith.mulf %219, %223 : vector<16x128xf32>
    %cst_137 = arith.constant 1.000000e+00 : f32
    %225 = vector.broadcast %cst_137 : f32 to vector<16x128xf32>
    %226 = arith.subf %225, %224 : vector<16x128xf32>
    %227 = arith.mulf %198, %226 : vector<16x128xf32>
    %cst_138 = arith.constant 1.000000e+00 : f32
    %228 = vector.broadcast %cst_138 : f32 to vector<16x128xf32>
    %229 = arith.addf %228, %227 : vector<16x128xf32>
    %230 = arith.mulf %191, %229 : vector<16x128xf32>
    %231 = arith.truncf %230 : vector<16x128xf32> to vector<16x128xbf16>
    %c0_139 = arith.constant 0 : index
    %c0_140 = arith.constant 0 : index
    %c0_141 = arith.constant 0 : index
    %232 = vector.load %arg10[%c0_139, %c0_140, %c0_141] : memref<1x128x32xbf16, #tpu.memory_space<vmem>>, vector<1x128x32xbf16>
    %233 = vector.shape_cast %232 : vector<1x128x32xbf16> to vector<128x32xbf16>
    %cst_142 = arith.constant dense<0.000000e+00> : vector<16x32xf32>
    %234 = tpu.matmul %231, %233, %cst_142 {dimension_numbers = #tpu.dot_dimension_numbers<[1], [0], [0], [1], [0, 0, 1, 1], [], []>} : vector<16x128xbf16>, vector<128x32xbf16>, vector<16x32xf32> -> vector<16x32xf32>
    %235 = arith.addf %165, %234 : vector<16x32xf32>
    %c0_143 = arith.constant 0 : index
    %c0_144 = arith.constant 0 : index
    %236 = vector.load %arg12[%c0_143, %c0_144] : memref<16x32xf32, #tpu.memory_space<vmem>>, vector<16x32xf32>
    tpu.vector_store %arg12[%c0_143, %c0_144], %235 {strides = array<i32>} : memref<16x32xf32, #tpu.memory_space<vmem>>, vector<16x32xf32>,
    %c1_i32 = arith.constant 1 : i32
    %237 = arith.cmpi eq, %arg1, %c1_i32 : i32
    %238 = arith.extui %237 : i1 to i32
    %c0_i32_145 = arith.constant 0 : i32
    %239 = arith.cmpi ne, %238, %c0_i32_145 : i32
    scf.if %239 {
      %c0_146 = arith.constant 0 : index
      %c0_147 = arith.constant 0 : index
      %c0_148 = arith.constant 0 : index
      %240 = vector.load %arg11[%c0_146, %c0_147, %c0_148] : memref<1x16x32xf32, #tpu.memory_space<vmem>>, vector<1x16x32xf32>
      %241 = vector.shape_cast %240 : vector<1x16x32xf32> to vector<16x32xf32>
      %242 = vector.shape_cast %235 : vector<16x32xf32> to vector<1x16x32xf32>
      tpu.vector_store %arg11[%c0_146, %c0_147, %c0_148], %242 {strides = array<i32>} : memref<1x16x32xf32, #tpu.memory_space<vmem>>, vector<1x16x32xf32>,
    } else {
    }
    return
  }
  func.func @transform_0(%arg0: i32, %arg1: i32) -> (i32, i32, i32) {
    %c0_i32 = arith.constant 0 : i32
    %c0_i32_0 = arith.constant 0 : i32
    %c0_i32_1 = arith.constant 0 : i32
    return %arg0, %c0_i32, %c0_i32_0 : i32, i32, i32
  }
  func.func @transform_1(%arg0: i32, %arg1: i32) -> (i32, i32, i32) {
    %c0_i32 = arith.constant 0 : i32
    %c0_i32_0 = arith.constant 0 : i32
    %c0_i32_1 = arith.constant 0 : i32
    return %arg1, %c0_i32, %c0_i32_0 : i32, i32, i32
  }
  func.func @transform_2(%arg0: i32, %arg1: i32) -> (i32, i32, i32, i32) {
    %c0_i32 = arith.constant 0 : i32
    %c0_i32_0 = arith.constant 0 : i32
    %c0_i32_1 = arith.constant 0 : i32
    %c0_i32_2 = arith.constant 0 : i32
    return %arg1, %c0_i32, %c0_i32_0, %c0_i32_1 : i32, i32, i32, i32
  }
  func.func @transform_3(%arg0: i32, %arg1: i32) -> (i32, i32, i32, i32) {
    %c0_i32 = arith.constant 0 : i32
    %c0_i32_0 = arith.constant 0 : i32
    %c0_i32_1 = arith.constant 0 : i32
    %c0_i32_2 = arith.constant 0 : i32
    return %arg1, %c0_i32, %c0_i32_0, %c0_i32_1 : i32, i32, i32, i32
  }
  func.func @transform_4(%arg0: i32, %arg1: i32) -> (i32, i32, i32, i32) {
    %c0_i32 = arith.constant 0 : i32
    %c0_i32_0 = arith.constant 0 : i32
    %c0_i32_1 = arith.constant 0 : i32
    %c0_i32_2 = arith.constant 0 : i32
    return %arg1, %c0_i32, %c0_i32_0, %c0_i32_1 : i32, i32, i32, i32
  }
  func.func @transform_5(%arg0: i32, %arg1: i32) -> (i32, i32, i32, i32) {
    %c0_i32 = arith.constant 0 : i32
    %c0_i32_0 = arith.constant 0 : i32
    %c0_i32_1 = arith.constant 0 : i32
    %c0_i32_2 = arith.constant 0 : i32
    return %arg1, %c0_i32, %c0_i32_0, %c0_i32_1 : i32, i32, i32, i32
  }
  func.func @transform_6(%arg0: i32, %arg1: i32) -> (i32, i32, i32) {
    %c0_i32 = arith.constant 0 : i32
    %c0_i32_0 = arith.constant 0 : i32
    %c0_i32_1 = arith.constant 0 : i32
    return %arg1, %c0_i32, %c0_i32_0 : i32, i32, i32
  }
  func.func @transform_7(%arg0: i32, %arg1: i32) -> (i32, i32, i32) {
    %c0_i32 = arith.constant 0 : i32
    %c0_i32_0 = arith.constant 0 : i32
    %c0_i32_1 = arith.constant 0 : i32
    return %arg1, %c0_i32, %c0_i32_0 : i32, i32, i32
  }
  func.func @transform_8(%arg0: i32, %arg1: i32) -> (i32, i32, i32) {
    %c0_i32 = arith.constant 0 : i32
    %c0_i32_0 = arith.constant 0 : i32
    %c0_i32_1 = arith.constant 0 : i32
    return %arg1, %c0_i32, %c0_i32_0 : i32, i32, i32
  }
  func.func @transform_9(%arg0: i32, %arg1: i32) -> (i32, i32, i32) {
    %c0_i32 = arith.constant 0 : i32
    %c0_i32_0 = arith.constant 0 : i32
    %c0_i32_1 = arith.constant 0 : i32
    return %arg0, %c0_i32, %c0_i32_0 : i32, i32, i32
  }
}

module attributes {stable_mosaic.version = 11 : i64} {
  func.func @_cross_block_kernel(%arg0: i32, %arg1: memref<1x8x32xf32, #tpu.memory_space<vmem>>, %arg2: memref<1x16x32xf32, #tpu.memory_space<vmem>>, %arg3: memref<8x32xf32, #tpu.memory_space<vmem>>, %arg4: memref<1x32xf32, #tpu.memory_space<vmem>>, %arg5: memref<1x32xf32, #tpu.memory_space<vmem>>, %arg6: memref<1x32xf32, #tpu.memory_space<vmem>>, %arg7: memref<1x32xf32, #tpu.memory_space<vmem>>, %arg8: memref<4x32x8xbf16, #tpu.memory_space<vmem>>, %arg9: memref<4x1x8xf32, #tpu.memory_space<vmem>>, %arg10: memref<4x32x8xbf16, #tpu.memory_space<vmem>>, %arg11: memref<4x1x8xf32, #tpu.memory_space<vmem>>, %arg12: memref<4x32x8xbf16, #tpu.memory_space<vmem>>, %arg13: memref<4x1x8xf32, #tpu.memory_space<vmem>>, %arg14: memref<4x8x32xbf16, #tpu.memory_space<vmem>>, %arg15: memref<1x32xf32, #tpu.memory_space<vmem>>, %arg16: memref<1x32xf32, #tpu.memory_space<vmem>>, %arg17: memref<1x32xf32, #tpu.memory_space<vmem>>, %arg18: memref<32x128xbf16, #tpu.memory_space<vmem>>, %arg19: memref<1x128xf32, #tpu.memory_space<vmem>>, %arg20: memref<128x32xbf16, #tpu.memory_space<vmem>>, %arg21: memref<1x32xf32, #tpu.memory_space<vmem>>, %arg22: memref<1x8x32xf32, #tpu.memory_space<vmem>>) attributes {dimension_semantics = [#tpu.dimension_semantics<parallel>], iteration_bounds = array<i64: 2>, scalar_prefetch = 0 : i64, scratch_operands = 0 : i64, tpu.core_type = #tpu.core_type<tc>, window_params = [{pipeline_mode = #tpu.pipeline_mode<synchronous>, transform_indices = @transform_0, window_bounds = array<i64: 1, 8, 32>}, {transform_indices = @transform_1, window_bounds = array<i64: 1, 16, 32>}, {pipeline_mode = #tpu.pipeline_mode<synchronous>, transform_indices = @transform_2, window_bounds = array<i64: 8, 32>}, {pipeline_mode = #tpu.pipeline_mode<synchronous>, transform_indices = @transform_3, window_bounds = array<i64: 1, 32>}, {pipeline_mode = #tpu.pipeline_mode<synchronous>, transform_indices = @transform_4, window_bounds = array<i64: 1, 32>}, {pipeline_mode = #tpu.pipeline_mode<synchronous>, transform_indices = @transform_5, window_bounds = array<i64: 1, 32>}, {pipeline_mode = #tpu.pipeline_mode<synchronous>, transform_indices = @transform_6, window_bounds = array<i64: 1, 32>}, {pipeline_mode = #tpu.pipeline_mode<synchronous>, transform_indices = @transform_7, window_bounds = array<i64: 4, 32, 8>}, {pipeline_mode = #tpu.pipeline_mode<synchronous>, transform_indices = @transform_8, window_bounds = array<i64: 4, 1, 8>}, {pipeline_mode = #tpu.pipeline_mode<synchronous>, transform_indices = @transform_9, window_bounds = array<i64: 4, 32, 8>}, {pipeline_mode = #tpu.pipeline_mode<synchronous>, transform_indices = @transform_10, window_bounds = array<i64: 4, 1, 8>}, {pipeline_mode = #tpu.pipeline_mode<synchronous>, transform_indices = @transform_11, window_bounds = array<i64: 4, 32, 8>}, {pipeline_mode = #tpu.pipeline_mode<synchronous>, transform_indices = @transform_12, window_bounds = array<i64: 4, 1, 8>}, {pipeline_mode = #tpu.pipeline_mode<synchronous>, transform_indices = @transform_13, window_bounds = array<i64: 4, 8, 32>}, {pipeline_mode = #tpu.pipeline_mode<synchronous>, transform_indices = @transform_14, window_bounds = array<i64: 1, 32>}, {pipeline_mode = #tpu.pipeline_mode<synchronous>, transform_indices = @transform_15, window_bounds = array<i64: 1, 32>}, {pipeline_mode = #tpu.pipeline_mode<synchronous>, transform_indices = @transform_16, window_bounds = array<i64: 1, 32>}, {pipeline_mode = #tpu.pipeline_mode<synchronous>, transform_indices = @transform_17, window_bounds = array<i64: 32, 128>}, {pipeline_mode = #tpu.pipeline_mode<synchronous>, transform_indices = @transform_18, window_bounds = array<i64: 1, 128>}, {pipeline_mode = #tpu.pipeline_mode<synchronous>, transform_indices = @transform_19, window_bounds = array<i64: 128, 32>}, {pipeline_mode = #tpu.pipeline_mode<synchronous>, transform_indices = @transform_20, window_bounds = array<i64: 1, 32>}, {transform_indices = @transform_21, window_bounds = array<i64: 1, 8, 32>}]} {
    %c0 = arith.constant 0 : index
    %c0_0 = arith.constant 0 : index
    %c0_1 = arith.constant 0 : index
    %0 = vector.load %arg1[%c0, %c0_0, %c0_1] : memref<1x8x32xf32, #tpu.memory_space<vmem>>, vector<1x8x32xf32>
    %1 = vector.shape_cast %0 : vector<1x8x32xf32> to vector<8x32xf32>
    %c0_2 = arith.constant 0 : index
    %c0_3 = arith.constant 0 : index
    %c0_4 = arith.constant 0 : index
    %2 = vector.load %arg2[%c0_2, %c0_3, %c0_4] : memref<1x16x32xf32, #tpu.memory_space<vmem>>, vector<1x16x32xf32>
    %3 = vector.shape_cast %2 : vector<1x16x32xf32> to vector<16x32xf32>
    %c0_5 = arith.constant 0 : index
    %c0_6 = arith.constant 0 : index
    %4 = vector.load %arg4[%c0_5, %c0_6] : memref<1x32xf32, #tpu.memory_space<vmem>>, vector<1x32xf32>
    %c0_7 = arith.constant 0 : index
    %c0_8 = arith.constant 0 : index
    %5 = vector.load %arg5[%c0_7, %c0_8] : memref<1x32xf32, #tpu.memory_space<vmem>>, vector<1x32xf32>
    %cst = arith.constant dense<0.000000e+00> : vector<8xf32>
    %6 = vector.multi_reduction <add>, %1, %cst [1] : vector<8x32xf32> to vector<8xf32>
    %7 = vector.shape_cast %6 : vector<8xf32> to vector<8x1xf32>
    %cst_9 = arith.constant 3.200000e+01 : f32
    %8 = vector.broadcast %cst_9 : f32 to vector<8x1xf32>
    %9 = arith.divf %7, %8 : vector<8x1xf32>
    %10 = vector.broadcast %9 : vector<8x1xf32> to vector<8x32xf32>
    %11 = arith.subf %1, %10 : vector<8x32xf32>
    %12 = arith.mulf %11, %11 : vector<8x32xf32>
    %cst_10 = arith.constant dense<0.000000e+00> : vector<8xf32>
    %13 = vector.multi_reduction <add>, %12, %cst_10 [1] : vector<8x32xf32> to vector<8xf32>
    %14 = vector.shape_cast %13 : vector<8xf32> to vector<8x1xf32>
    %cst_11 = arith.constant 3.200000e+01 : f32
    %15 = vector.broadcast %cst_11 : f32 to vector<8x1xf32>
    %16 = arith.divf %14, %15 : vector<8x1xf32>
    %cst_12 = arith.constant 9.99999974E-6 : f32
    %17 = vector.broadcast %cst_12 : f32 to vector<8x1xf32>
    %18 = arith.addf %16, %17 : vector<8x1xf32>
    %19 = math.rsqrt %18 : vector<8x1xf32>
    %20 = vector.broadcast %19 : vector<8x1xf32> to vector<8x32xf32>
    %21 = arith.mulf %11, %20 : vector<8x32xf32>
    %22 = vector.broadcast %4 : vector<1x32xf32> to vector<8x32xf32>
    %23 = arith.mulf %21, %22 : vector<8x32xf32>
    %24 = vector.broadcast %5 : vector<1x32xf32> to vector<8x32xf32>
    %25 = arith.addf %23, %24 : vector<8x32xf32>
    %26 = arith.truncf %25 : vector<8x32xf32> to vector<8x32xbf16>
    %c0_13 = arith.constant 0 : index
    %c0_14 = arith.constant 0 : index
    %27 = vector.load %arg6[%c0_13, %c0_14] : memref<1x32xf32, #tpu.memory_space<vmem>>, vector<1x32xf32>
    %c0_15 = arith.constant 0 : index
    %c0_16 = arith.constant 0 : index
    %28 = vector.load %arg7[%c0_15, %c0_16] : memref<1x32xf32, #tpu.memory_space<vmem>>, vector<1x32xf32>
    %cst_17 = arith.constant dense<0.000000e+00> : vector<16xf32>
    %29 = vector.multi_reduction <add>, %3, %cst_17 [1] : vector<16x32xf32> to vector<16xf32>
    %30 = vector.shape_cast %29 : vector<16xf32> to vector<16x1xf32>
    %cst_18 = arith.constant 3.200000e+01 : f32
    %31 = vector.broadcast %cst_18 : f32 to vector<16x1xf32>
    %32 = arith.divf %30, %31 : vector<16x1xf32>
    %33 = vector.broadcast %32 : vector<16x1xf32> to vector<16x32xf32>
    %34 = arith.subf %3, %33 : vector<16x32xf32>
    %35 = arith.mulf %34, %34 : vector<16x32xf32>
    %cst_19 = arith.constant dense<0.000000e+00> : vector<16xf32>
    %36 = vector.multi_reduction <add>, %35, %cst_19 [1] : vector<16x32xf32> to vector<16xf32>
    %37 = vector.shape_cast %36 : vector<16xf32> to vector<16x1xf32>
    %cst_20 = arith.constant 3.200000e+01 : f32
    %38 = vector.broadcast %cst_20 : f32 to vector<16x1xf32>
    %39 = arith.divf %37, %38 : vector<16x1xf32>
    %cst_21 = arith.constant 9.99999974E-6 : f32
    %40 = vector.broadcast %cst_21 : f32 to vector<16x1xf32>
    %41 = arith.addf %39, %40 : vector<16x1xf32>
    %42 = math.rsqrt %41 : vector<16x1xf32>
    %43 = vector.broadcast %42 : vector<16x1xf32> to vector<16x32xf32>
    %44 = arith.mulf %34, %43 : vector<16x32xf32>
    %45 = vector.broadcast %27 : vector<1x32xf32> to vector<16x32xf32>
    %46 = arith.mulf %44, %45 : vector<16x32xf32>
    %47 = vector.broadcast %28 : vector<1x32xf32> to vector<16x32xf32>
    %48 = arith.addf %46, %47 : vector<16x32xf32>
    %49 = arith.truncf %48 : vector<16x32xf32> to vector<16x32xbf16>
    %cst_22 = arith.constant 0.000000e+00 : f32
    %50 = vector.broadcast %cst_22 : f32 to vector<8x32xf32>
    %c0_23 = arith.constant 0 : index
    %c0_24 = arith.constant 0 : index
    %c0_25 = arith.constant 0 : index
    %51 = vector.load %arg8[%c0_23, %c0_24, %c0_25] : memref<4x32x8xbf16, #tpu.memory_space<vmem>>, vector<1x32x8xbf16>
    %52 = vector.shape_cast %51 : vector<1x32x8xbf16> to vector<32x8xbf16>
    %cst_26 = arith.constant dense<0.000000e+00> : vector<8x8xf32>
    %53 = tpu.matmul %26, %52, %cst_26 {dimension_numbers = #tpu.dot_dimension_numbers<[1], [0], [0], [1], [0, 0, 1, 1], [], []>} : vector<8x32xbf16>, vector<32x8xbf16>, vector<8x8xf32> -> vector<8x8xf32>
    %c0_27 = arith.constant 0 : index
    %c0_28 = arith.constant 0 : index
    %c0_29 = arith.constant 0 : index
    %54 = vector.load %arg10[%c0_27, %c0_28, %c0_29] : memref<4x32x8xbf16, #tpu.memory_space<vmem>>, vector<1x32x8xbf16>
    %55 = vector.shape_cast %54 : vector<1x32x8xbf16> to vector<32x8xbf16>
    %cst_30 = arith.constant dense<0.000000e+00> : vector<16x8xf32>
    %56 = tpu.matmul %49, %55, %cst_30 {dimension_numbers = #tpu.dot_dimension_numbers<[1], [0], [0], [1], [0, 0, 1, 1], [], []>} : vector<16x32xbf16>, vector<32x8xbf16>, vector<16x8xf32> -> vector<16x8xf32>
    %c0_31 = arith.constant 0 : index
    %c0_32 = arith.constant 0 : index
    %c0_33 = arith.constant 0 : index
    %57 = vector.load %arg12[%c0_31, %c0_32, %c0_33] : memref<4x32x8xbf16, #tpu.memory_space<vmem>>, vector<1x32x8xbf16>
    %58 = vector.shape_cast %57 : vector<1x32x8xbf16> to vector<32x8xbf16>
    %cst_34 = arith.constant dense<0.000000e+00> : vector<16x8xf32>
    %59 = tpu.matmul %49, %58, %cst_34 {dimension_numbers = #tpu.dot_dimension_numbers<[1], [0], [0], [1], [0, 0, 1, 1], [], []>} : vector<16x32xbf16>, vector<32x8xbf16>, vector<16x8xf32> -> vector<16x8xf32>
    %c0_35 = arith.constant 0 : index
    %c0_36 = arith.constant 0 : index
    %c0_37 = arith.constant 0 : index
    %60 = vector.load %arg9[%c0_35, %c0_36, %c0_37] : memref<4x1x8xf32, #tpu.memory_space<vmem>>, vector<1x1x8xf32>
    %61 = vector.shape_cast %60 : vector<1x1x8xf32> to vector<1x8xf32>
    %62 = vector.broadcast %61 : vector<1x8xf32> to vector<8x8xf32>
    %63 = arith.addf %53, %62 : vector<8x8xf32>
    %c0_38 = arith.constant 0 : index
    %c0_39 = arith.constant 0 : index
    %c0_40 = arith.constant 0 : index
    %64 = vector.load %arg11[%c0_38, %c0_39, %c0_40] : memref<4x1x8xf32, #tpu.memory_space<vmem>>, vector<1x1x8xf32>
    %65 = vector.shape_cast %64 : vector<1x1x8xf32> to vector<1x8xf32>
    %66 = vector.broadcast %65 : vector<1x8xf32> to vector<16x8xf32>
    %67 = arith.addf %56, %66 : vector<16x8xf32>
    %c0_41 = arith.constant 0 : index
    %c0_42 = arith.constant 0 : index
    %c0_43 = arith.constant 0 : index
    %68 = vector.load %arg13[%c0_41, %c0_42, %c0_43] : memref<4x1x8xf32, #tpu.memory_space<vmem>>, vector<1x1x8xf32>
    %69 = vector.shape_cast %68 : vector<1x1x8xf32> to vector<1x8xf32>
    %70 = vector.broadcast %69 : vector<1x8xf32> to vector<16x8xf32>
    %71 = arith.addf %59, %70 : vector<16x8xf32>
    %72 = arith.truncf %63 : vector<8x8xf32> to vector<8x8xbf16>
    %73 = arith.truncf %67 : vector<16x8xf32> to vector<16x8xbf16>
    %cst_44 = arith.constant dense<0.000000e+00> : vector<8x16xf32>
    %74 = tpu.matmul %72, %73, %cst_44 {dimension_numbers = #tpu.dot_dimension_numbers<[1], [1], [0], [0], [0, 0, 1, 0], [], []>} : vector<8x8xbf16>, vector<16x8xbf16>, vector<8x16xf32> -> vector<8x16xf32>
    %cst_45 = arith.constant 0.353553385 : f32
    %75 = vector.broadcast %cst_45 : f32 to vector<8x16xf32>
    %76 = arith.mulf %74, %75 : vector<8x16xf32>
    %cst_46 = arith.constant dense<0xFF800000> : vector<8xf32>
    %77 = vector.multi_reduction <maximumf>, %76, %cst_46 [1] : vector<8x16xf32> to vector<8xf32>
    %78 = vector.shape_cast %77 : vector<8xf32> to vector<8x1xf32>
    %79 = vector.broadcast %78 : vector<8x1xf32> to vector<8x16xf32>
    %80 = arith.subf %76, %79 : vector<8x16xf32>
    %81 = math.exp %80 : vector<8x16xf32>
    %cst_47 = arith.constant dense<0.000000e+00> : vector<8xf32>
    %82 = vector.multi_reduction <add>, %81, %cst_47 [1] : vector<8x16xf32> to vector<8xf32>
    %83 = vector.shape_cast %82 : vector<8xf32> to vector<8x1xf32>
    %84 = tpu.reciprocal %83 {approx = true} : vector<8x1xf32> -> vector<8x1xf32>
    %85 = vector.broadcast %84 : vector<8x1xf32> to vector<8x16xf32>
    %86 = arith.mulf %81, %85 : vector<8x16xf32>
    %87 = arith.truncf %86 : vector<8x16xf32> to vector<8x16xbf16>
    %88 = arith.truncf %71 : vector<16x8xf32> to vector<16x8xbf16>
    %cst_48 = arith.constant dense<0.000000e+00> : vector<8x8xf32>
    %89 = tpu.matmul %87, %88, %cst_48 {dimension_numbers = #tpu.dot_dimension_numbers<[1], [0], [0], [1], [0, 0, 1, 1], [], []>} : vector<8x16xbf16>, vector<16x8xbf16>, vector<8x8xf32> -> vector<8x8xf32>
    %90 = arith.truncf %89 : vector<8x8xf32> to vector<8x8xbf16>
    %c0_49 = arith.constant 0 : index
    %c0_50 = arith.constant 0 : index
    %c0_51 = arith.constant 0 : index
    %91 = vector.load %arg14[%c0_49, %c0_50, %c0_51] : memref<4x8x32xbf16, #tpu.memory_space<vmem>>, vector<1x8x32xbf16>
    %92 = vector.shape_cast %91 : vector<1x8x32xbf16> to vector<8x32xbf16>
    %cst_52 = arith.constant dense<0.000000e+00> : vector<8x32xf32>
    %93 = tpu.matmul %90, %92, %cst_52 {dimension_numbers = #tpu.dot_dimension_numbers<[1], [0], [0], [1], [0, 0, 1, 1], [], []>} : vector<8x8xbf16>, vector<8x32xbf16>, vector<8x32xf32> -> vector<8x32xf32>
    %94 = arith.addf %50, %93 : vector<8x32xf32>
    %c1 = arith.constant 1 : index
    %c0_53 = arith.constant 0 : index
    %c0_54 = arith.constant 0 : index
    %95 = vector.load %arg8[%c1, %c0_53, %c0_54] : memref<4x32x8xbf16, #tpu.memory_space<vmem>>, vector<1x32x8xbf16>
    %96 = vector.shape_cast %95 : vector<1x32x8xbf16> to vector<32x8xbf16>
    %cst_55 = arith.constant dense<0.000000e+00> : vector<8x8xf32>
    %97 = tpu.matmul %26, %96, %cst_55 {dimension_numbers = #tpu.dot_dimension_numbers<[1], [0], [0], [1], [0, 0, 1, 1], [], []>} : vector<8x32xbf16>, vector<32x8xbf16>, vector<8x8xf32> -> vector<8x8xf32>
    %c1_56 = arith.constant 1 : index
    %c0_57 = arith.constant 0 : index
    %c0_58 = arith.constant 0 : index
    %98 = vector.load %arg10[%c1_56, %c0_57, %c0_58] : memref<4x32x8xbf16, #tpu.memory_space<vmem>>, vector<1x32x8xbf16>
    %99 = vector.shape_cast %98 : vector<1x32x8xbf16> to vector<32x8xbf16>
    %cst_59 = arith.constant dense<0.000000e+00> : vector<16x8xf32>
    %100 = tpu.matmul %49, %99, %cst_59 {dimension_numbers = #tpu.dot_dimension_numbers<[1], [0], [0], [1], [0, 0, 1, 1], [], []>} : vector<16x32xbf16>, vector<32x8xbf16>, vector<16x8xf32> -> vector<16x8xf32>
    %c1_60 = arith.constant 1 : index
    %c0_61 = arith.constant 0 : index
    %c0_62 = arith.constant 0 : index
    %101 = vector.load %arg12[%c1_60, %c0_61, %c0_62] : memref<4x32x8xbf16, #tpu.memory_space<vmem>>, vector<1x32x8xbf16>
    %102 = vector.shape_cast %101 : vector<1x32x8xbf16> to vector<32x8xbf16>
    %cst_63 = arith.constant dense<0.000000e+00> : vector<16x8xf32>
    %103 = tpu.matmul %49, %102, %cst_63 {dimension_numbers = #tpu.dot_dimension_numbers<[1], [0], [0], [1], [0, 0, 1, 1], [], []>} : vector<16x32xbf16>, vector<32x8xbf16>, vector<16x8xf32> -> vector<16x8xf32>
    %c1_64 = arith.constant 1 : index
    %c0_65 = arith.constant 0 : index
    %c0_66 = arith.constant 0 : index
    %104 = vector.load %arg9[%c1_64, %c0_65, %c0_66] : memref<4x1x8xf32, #tpu.memory_space<vmem>>, vector<1x1x8xf32>
    %105 = vector.shape_cast %104 : vector<1x1x8xf32> to vector<1x8xf32>
    %106 = vector.broadcast %105 : vector<1x8xf32> to vector<8x8xf32>
    %107 = arith.addf %97, %106 : vector<8x8xf32>
    %c1_67 = arith.constant 1 : index
    %c0_68 = arith.constant 0 : index
    %c0_69 = arith.constant 0 : index
    %108 = vector.load %arg11[%c1_67, %c0_68, %c0_69] : memref<4x1x8xf32, #tpu.memory_space<vmem>>, vector<1x1x8xf32>
    %109 = vector.shape_cast %108 : vector<1x1x8xf32> to vector<1x8xf32>
    %110 = vector.broadcast %109 : vector<1x8xf32> to vector<16x8xf32>
    %111 = arith.addf %100, %110 : vector<16x8xf32>
    %c1_70 = arith.constant 1 : index
    %c0_71 = arith.constant 0 : index
    %c0_72 = arith.constant 0 : index
    %112 = vector.load %arg13[%c1_70, %c0_71, %c0_72] : memref<4x1x8xf32, #tpu.memory_space<vmem>>, vector<1x1x8xf32>
    %113 = vector.shape_cast %112 : vector<1x1x8xf32> to vector<1x8xf32>
    %114 = vector.broadcast %113 : vector<1x8xf32> to vector<16x8xf32>
    %115 = arith.addf %103, %114 : vector<16x8xf32>
    %116 = arith.truncf %107 : vector<8x8xf32> to vector<8x8xbf16>
    %117 = arith.truncf %111 : vector<16x8xf32> to vector<16x8xbf16>
    %cst_73 = arith.constant dense<0.000000e+00> : vector<8x16xf32>
    %118 = tpu.matmul %116, %117, %cst_73 {dimension_numbers = #tpu.dot_dimension_numbers<[1], [1], [0], [0], [0, 0, 1, 0], [], []>} : vector<8x8xbf16>, vector<16x8xbf16>, vector<8x16xf32> -> vector<8x16xf32>
    %cst_74 = arith.constant 0.353553385 : f32
    %119 = vector.broadcast %cst_74 : f32 to vector<8x16xf32>
    %120 = arith.mulf %118, %119 : vector<8x16xf32>
    %cst_75 = arith.constant dense<0xFF800000> : vector<8xf32>
    %121 = vector.multi_reduction <maximumf>, %120, %cst_75 [1] : vector<8x16xf32> to vector<8xf32>
    %122 = vector.shape_cast %121 : vector<8xf32> to vector<8x1xf32>
    %123 = vector.broadcast %122 : vector<8x1xf32> to vector<8x16xf32>
    %124 = arith.subf %120, %123 : vector<8x16xf32>
    %125 = math.exp %124 : vector<8x16xf32>
    %cst_76 = arith.constant dense<0.000000e+00> : vector<8xf32>
    %126 = vector.multi_reduction <add>, %125, %cst_76 [1] : vector<8x16xf32> to vector<8xf32>
    %127 = vector.shape_cast %126 : vector<8xf32> to vector<8x1xf32>
    %128 = tpu.reciprocal %127 {approx = true} : vector<8x1xf32> -> vector<8x1xf32>
    %129 = vector.broadcast %128 : vector<8x1xf32> to vector<8x16xf32>
    %130 = arith.mulf %125, %129 : vector<8x16xf32>
    %131 = arith.truncf %130 : vector<8x16xf32> to vector<8x16xbf16>
    %132 = arith.truncf %115 : vector<16x8xf32> to vector<16x8xbf16>
    %cst_77 = arith.constant dense<0.000000e+00> : vector<8x8xf32>
    %133 = tpu.matmul %131, %132, %cst_77 {dimension_numbers = #tpu.dot_dimension_numbers<[1], [0], [0], [1], [0, 0, 1, 1], [], []>} : vector<8x16xbf16>, vector<16x8xbf16>, vector<8x8xf32> -> vector<8x8xf32>
    %134 = arith.truncf %133 : vector<8x8xf32> to vector<8x8xbf16>
    %c1_78 = arith.constant 1 : index
    %c0_79 = arith.constant 0 : index
    %c0_80 = arith.constant 0 : index
    %135 = vector.load %arg14[%c1_78, %c0_79, %c0_80] : memref<4x8x32xbf16, #tpu.memory_space<vmem>>, vector<1x8x32xbf16>
    %136 = vector.shape_cast %135 : vector<1x8x32xbf16> to vector<8x32xbf16>
    %cst_81 = arith.constant dense<0.000000e+00> : vector<8x32xf32>
    %137 = tpu.matmul %134, %136, %cst_81 {dimension_numbers = #tpu.dot_dimension_numbers<[1], [0], [0], [1], [0, 0, 1, 1], [], []>} : vector<8x8xbf16>, vector<8x32xbf16>, vector<8x32xf32> -> vector<8x32xf32>
    %138 = arith.addf %94, %137 : vector<8x32xf32>
    %c2 = arith.constant 2 : index
    %c0_82 = arith.constant 0 : index
    %c0_83 = arith.constant 0 : index
    %139 = vector.load %arg8[%c2, %c0_82, %c0_83] : memref<4x32x8xbf16, #tpu.memory_space<vmem>>, vector<1x32x8xbf16>
    %140 = vector.shape_cast %139 : vector<1x32x8xbf16> to vector<32x8xbf16>
    %cst_84 = arith.constant dense<0.000000e+00> : vector<8x8xf32>
    %141 = tpu.matmul %26, %140, %cst_84 {dimension_numbers = #tpu.dot_dimension_numbers<[1], [0], [0], [1], [0, 0, 1, 1], [], []>} : vector<8x32xbf16>, vector<32x8xbf16>, vector<8x8xf32> -> vector<8x8xf32>
    %c2_85 = arith.constant 2 : index
    %c0_86 = arith.constant 0 : index
    %c0_87 = arith.constant 0 : index
    %142 = vector.load %arg10[%c2_85, %c0_86, %c0_87] : memref<4x32x8xbf16, #tpu.memory_space<vmem>>, vector<1x32x8xbf16>
    %143 = vector.shape_cast %142 : vector<1x32x8xbf16> to vector<32x8xbf16>
    %cst_88 = arith.constant dense<0.000000e+00> : vector<16x8xf32>
    %144 = tpu.matmul %49, %143, %cst_88 {dimension_numbers = #tpu.dot_dimension_numbers<[1], [0], [0], [1], [0, 0, 1, 1], [], []>} : vector<16x32xbf16>, vector<32x8xbf16>, vector<16x8xf32> -> vector<16x8xf32>
    %c2_89 = arith.constant 2 : index
    %c0_90 = arith.constant 0 : index
    %c0_91 = arith.constant 0 : index
    %145 = vector.load %arg12[%c2_89, %c0_90, %c0_91] : memref<4x32x8xbf16, #tpu.memory_space<vmem>>, vector<1x32x8xbf16>
    %146 = vector.shape_cast %145 : vector<1x32x8xbf16> to vector<32x8xbf16>
    %cst_92 = arith.constant dense<0.000000e+00> : vector<16x8xf32>
    %147 = tpu.matmul %49, %146, %cst_92 {dimension_numbers = #tpu.dot_dimension_numbers<[1], [0], [0], [1], [0, 0, 1, 1], [], []>} : vector<16x32xbf16>, vector<32x8xbf16>, vector<16x8xf32> -> vector<16x8xf32>
    %c2_93 = arith.constant 2 : index
    %c0_94 = arith.constant 0 : index
    %c0_95 = arith.constant 0 : index
    %148 = vector.load %arg9[%c2_93, %c0_94, %c0_95] : memref<4x1x8xf32, #tpu.memory_space<vmem>>, vector<1x1x8xf32>
    %149 = vector.shape_cast %148 : vector<1x1x8xf32> to vector<1x8xf32>
    %150 = vector.broadcast %149 : vector<1x8xf32> to vector<8x8xf32>
    %151 = arith.addf %141, %150 : vector<8x8xf32>
    %c2_96 = arith.constant 2 : index
    %c0_97 = arith.constant 0 : index
    %c0_98 = arith.constant 0 : index
    %152 = vector.load %arg11[%c2_96, %c0_97, %c0_98] : memref<4x1x8xf32, #tpu.memory_space<vmem>>, vector<1x1x8xf32>
    %153 = vector.shape_cast %152 : vector<1x1x8xf32> to vector<1x8xf32>
    %154 = vector.broadcast %153 : vector<1x8xf32> to vector<16x8xf32>
    %155 = arith.addf %144, %154 : vector<16x8xf32>
    %c2_99 = arith.constant 2 : index
    %c0_100 = arith.constant 0 : index
    %c0_101 = arith.constant 0 : index
    %156 = vector.load %arg13[%c2_99, %c0_100, %c0_101] : memref<4x1x8xf32, #tpu.memory_space<vmem>>, vector<1x1x8xf32>
    %157 = vector.shape_cast %156 : vector<1x1x8xf32> to vector<1x8xf32>
    %158 = vector.broadcast %157 : vector<1x8xf32> to vector<16x8xf32>
    %159 = arith.addf %147, %158 : vector<16x8xf32>
    %160 = arith.truncf %151 : vector<8x8xf32> to vector<8x8xbf16>
    %161 = arith.truncf %155 : vector<16x8xf32> to vector<16x8xbf16>
    %cst_102 = arith.constant dense<0.000000e+00> : vector<8x16xf32>
    %162 = tpu.matmul %160, %161, %cst_102 {dimension_numbers = #tpu.dot_dimension_numbers<[1], [1], [0], [0], [0, 0, 1, 0], [], []>} : vector<8x8xbf16>, vector<16x8xbf16>, vector<8x16xf32> -> vector<8x16xf32>
    %cst_103 = arith.constant 0.353553385 : f32
    %163 = vector.broadcast %cst_103 : f32 to vector<8x16xf32>
    %164 = arith.mulf %162, %163 : vector<8x16xf32>
    %cst_104 = arith.constant dense<0xFF800000> : vector<8xf32>
    %165 = vector.multi_reduction <maximumf>, %164, %cst_104 [1] : vector<8x16xf32> to vector<8xf32>
    %166 = vector.shape_cast %165 : vector<8xf32> to vector<8x1xf32>
    %167 = vector.broadcast %166 : vector<8x1xf32> to vector<8x16xf32>
    %168 = arith.subf %164, %167 : vector<8x16xf32>
    %169 = math.exp %168 : vector<8x16xf32>
    %cst_105 = arith.constant dense<0.000000e+00> : vector<8xf32>
    %170 = vector.multi_reduction <add>, %169, %cst_105 [1] : vector<8x16xf32> to vector<8xf32>
    %171 = vector.shape_cast %170 : vector<8xf32> to vector<8x1xf32>
    %172 = tpu.reciprocal %171 {approx = true} : vector<8x1xf32> -> vector<8x1xf32>
    %173 = vector.broadcast %172 : vector<8x1xf32> to vector<8x16xf32>
    %174 = arith.mulf %169, %173 : vector<8x16xf32>
    %175 = arith.truncf %174 : vector<8x16xf32> to vector<8x16xbf16>
    %176 = arith.truncf %159 : vector<16x8xf32> to vector<16x8xbf16>
    %cst_106 = arith.constant dense<0.000000e+00> : vector<8x8xf32>
    %177 = tpu.matmul %175, %176, %cst_106 {dimension_numbers = #tpu.dot_dimension_numbers<[1], [0], [0], [1], [0, 0, 1, 1], [], []>} : vector<8x16xbf16>, vector<16x8xbf16>, vector<8x8xf32> -> vector<8x8xf32>
    %178 = arith.truncf %177 : vector<8x8xf32> to vector<8x8xbf16>
    %c2_107 = arith.constant 2 : index
    %c0_108 = arith.constant 0 : index
    %c0_109 = arith.constant 0 : index
    %179 = vector.load %arg14[%c2_107, %c0_108, %c0_109] : memref<4x8x32xbf16, #tpu.memory_space<vmem>>, vector<1x8x32xbf16>
    %180 = vector.shape_cast %179 : vector<1x8x32xbf16> to vector<8x32xbf16>
    %cst_110 = arith.constant dense<0.000000e+00> : vector<8x32xf32>
    %181 = tpu.matmul %178, %180, %cst_110 {dimension_numbers = #tpu.dot_dimension_numbers<[1], [0], [0], [1], [0, 0, 1, 1], [], []>} : vector<8x8xbf16>, vector<8x32xbf16>, vector<8x32xf32> -> vector<8x32xf32>
    %182 = arith.addf %138, %181 : vector<8x32xf32>
    %c3 = arith.constant 3 : index
    %c0_111 = arith.constant 0 : index
    %c0_112 = arith.constant 0 : index
    %183 = vector.load %arg8[%c3, %c0_111, %c0_112] : memref<4x32x8xbf16, #tpu.memory_space<vmem>>, vector<1x32x8xbf16>
    %184 = vector.shape_cast %183 : vector<1x32x8xbf16> to vector<32x8xbf16>
    %cst_113 = arith.constant dense<0.000000e+00> : vector<8x8xf32>
    %185 = tpu.matmul %26, %184, %cst_113 {dimension_numbers = #tpu.dot_dimension_numbers<[1], [0], [0], [1], [0, 0, 1, 1], [], []>} : vector<8x32xbf16>, vector<32x8xbf16>, vector<8x8xf32> -> vector<8x8xf32>
    %c3_114 = arith.constant 3 : index
    %c0_115 = arith.constant 0 : index
    %c0_116 = arith.constant 0 : index
    %186 = vector.load %arg10[%c3_114, %c0_115, %c0_116] : memref<4x32x8xbf16, #tpu.memory_space<vmem>>, vector<1x32x8xbf16>
    %187 = vector.shape_cast %186 : vector<1x32x8xbf16> to vector<32x8xbf16>
    %cst_117 = arith.constant dense<0.000000e+00> : vector<16x8xf32>
    %188 = tpu.matmul %49, %187, %cst_117 {dimension_numbers = #tpu.dot_dimension_numbers<[1], [0], [0], [1], [0, 0, 1, 1], [], []>} : vector<16x32xbf16>, vector<32x8xbf16>, vector<16x8xf32> -> vector<16x8xf32>
    %c3_118 = arith.constant 3 : index
    %c0_119 = arith.constant 0 : index
    %c0_120 = arith.constant 0 : index
    %189 = vector.load %arg12[%c3_118, %c0_119, %c0_120] : memref<4x32x8xbf16, #tpu.memory_space<vmem>>, vector<1x32x8xbf16>
    %190 = vector.shape_cast %189 : vector<1x32x8xbf16> to vector<32x8xbf16>
    %cst_121 = arith.constant dense<0.000000e+00> : vector<16x8xf32>
    %191 = tpu.matmul %49, %190, %cst_121 {dimension_numbers = #tpu.dot_dimension_numbers<[1], [0], [0], [1], [0, 0, 1, 1], [], []>} : vector<16x32xbf16>, vector<32x8xbf16>, vector<16x8xf32> -> vector<16x8xf32>
    %c3_122 = arith.constant 3 : index
    %c0_123 = arith.constant 0 : index
    %c0_124 = arith.constant 0 : index
    %192 = vector.load %arg9[%c3_122, %c0_123, %c0_124] : memref<4x1x8xf32, #tpu.memory_space<vmem>>, vector<1x1x8xf32>
    %193 = vector.shape_cast %192 : vector<1x1x8xf32> to vector<1x8xf32>
    %194 = vector.broadcast %193 : vector<1x8xf32> to vector<8x8xf32>
    %195 = arith.addf %185, %194 : vector<8x8xf32>
    %c3_125 = arith.constant 3 : index
    %c0_126 = arith.constant 0 : index
    %c0_127 = arith.constant 0 : index
    %196 = vector.load %arg11[%c3_125, %c0_126, %c0_127] : memref<4x1x8xf32, #tpu.memory_space<vmem>>, vector<1x1x8xf32>
    %197 = vector.shape_cast %196 : vector<1x1x8xf32> to vector<1x8xf32>
    %198 = vector.broadcast %197 : vector<1x8xf32> to vector<16x8xf32>
    %199 = arith.addf %188, %198 : vector<16x8xf32>
    %c3_128 = arith.constant 3 : index
    %c0_129 = arith.constant 0 : index
    %c0_130 = arith.constant 0 : index
    %200 = vector.load %arg13[%c3_128, %c0_129, %c0_130] : memref<4x1x8xf32, #tpu.memory_space<vmem>>, vector<1x1x8xf32>
    %201 = vector.shape_cast %200 : vector<1x1x8xf32> to vector<1x8xf32>
    %202 = vector.broadcast %201 : vector<1x8xf32> to vector<16x8xf32>
    %203 = arith.addf %191, %202 : vector<16x8xf32>
    %204 = arith.truncf %195 : vector<8x8xf32> to vector<8x8xbf16>
    %205 = arith.truncf %199 : vector<16x8xf32> to vector<16x8xbf16>
    %cst_131 = arith.constant dense<0.000000e+00> : vector<8x16xf32>
    %206 = tpu.matmul %204, %205, %cst_131 {dimension_numbers = #tpu.dot_dimension_numbers<[1], [1], [0], [0], [0, 0, 1, 0], [], []>} : vector<8x8xbf16>, vector<16x8xbf16>, vector<8x16xf32> -> vector<8x16xf32>
    %cst_132 = arith.constant 0.353553385 : f32
    %207 = vector.broadcast %cst_132 : f32 to vector<8x16xf32>
    %208 = arith.mulf %206, %207 : vector<8x16xf32>
    %cst_133 = arith.constant dense<0xFF800000> : vector<8xf32>
    %209 = vector.multi_reduction <maximumf>, %208, %cst_133 [1] : vector<8x16xf32> to vector<8xf32>
    %210 = vector.shape_cast %209 : vector<8xf32> to vector<8x1xf32>
    %211 = vector.broadcast %210 : vector<8x1xf32> to vector<8x16xf32>
    %212 = arith.subf %208, %211 : vector<8x16xf32>
    %213 = math.exp %212 : vector<8x16xf32>
    %cst_134 = arith.constant dense<0.000000e+00> : vector<8xf32>
    %214 = vector.multi_reduction <add>, %213, %cst_134 [1] : vector<8x16xf32> to vector<8xf32>
    %215 = vector.shape_cast %214 : vector<8xf32> to vector<8x1xf32>
    %216 = tpu.reciprocal %215 {approx = true} : vector<8x1xf32> -> vector<8x1xf32>
    %217 = vector.broadcast %216 : vector<8x1xf32> to vector<8x16xf32>
    %218 = arith.mulf %213, %217 : vector<8x16xf32>
    %219 = arith.truncf %218 : vector<8x16xf32> to vector<8x16xbf16>
    %220 = arith.truncf %203 : vector<16x8xf32> to vector<16x8xbf16>
    %cst_135 = arith.constant dense<0.000000e+00> : vector<8x8xf32>
    %221 = tpu.matmul %219, %220, %cst_135 {dimension_numbers = #tpu.dot_dimension_numbers<[1], [0], [0], [1], [0, 0, 1, 1], [], []>} : vector<8x16xbf16>, vector<16x8xbf16>, vector<8x8xf32> -> vector<8x8xf32>
    %222 = arith.truncf %221 : vector<8x8xf32> to vector<8x8xbf16>
    %c3_136 = arith.constant 3 : index
    %c0_137 = arith.constant 0 : index
    %c0_138 = arith.constant 0 : index
    %223 = vector.load %arg14[%c3_136, %c0_137, %c0_138] : memref<4x8x32xbf16, #tpu.memory_space<vmem>>, vector<1x8x32xbf16>
    %224 = vector.shape_cast %223 : vector<1x8x32xbf16> to vector<8x32xbf16>
    %cst_139 = arith.constant dense<0.000000e+00> : vector<8x32xf32>
    %225 = tpu.matmul %222, %224, %cst_139 {dimension_numbers = #tpu.dot_dimension_numbers<[1], [0], [0], [1], [0, 0, 1, 1], [], []>} : vector<8x8xbf16>, vector<8x32xbf16>, vector<8x32xf32> -> vector<8x32xf32>
    %226 = arith.addf %182, %225 : vector<8x32xf32>
    %227 = arith.addf %1, %226 : vector<8x32xf32>
    %c0_140 = arith.constant 0 : index
    %c0_141 = arith.constant 0 : index
    %228 = vector.load %arg15[%c0_140, %c0_141] : memref<1x32xf32, #tpu.memory_space<vmem>>, vector<1x32xf32>
    %229 = vector.broadcast %228 : vector<1x32xf32> to vector<8x32xf32>
    %230 = arith.addf %227, %229 : vector<8x32xf32>
    %c0_142 = arith.constant 0 : index
    %c0_143 = arith.constant 0 : index
    %231 = vector.load %arg16[%c0_142, %c0_143] : memref<1x32xf32, #tpu.memory_space<vmem>>, vector<1x32xf32>
    %c0_144 = arith.constant 0 : index
    %c0_145 = arith.constant 0 : index
    %232 = vector.load %arg17[%c0_144, %c0_145] : memref<1x32xf32, #tpu.memory_space<vmem>>, vector<1x32xf32>
    %cst_146 = arith.constant dense<0.000000e+00> : vector<8xf32>
    %233 = vector.multi_reduction <add>, %230, %cst_146 [1] : vector<8x32xf32> to vector<8xf32>
    %234 = vector.shape_cast %233 : vector<8xf32> to vector<8x1xf32>
    %cst_147 = arith.constant 3.200000e+01 : f32
    %235 = vector.broadcast %cst_147 : f32 to vector<8x1xf32>
    %236 = arith.divf %234, %235 : vector<8x1xf32>
    %237 = vector.broadcast %236 : vector<8x1xf32> to vector<8x32xf32>
    %238 = arith.subf %230, %237 : vector<8x32xf32>
    %239 = arith.mulf %238, %238 : vector<8x32xf32>
    %cst_148 = arith.constant dense<0.000000e+00> : vector<8xf32>
    %240 = vector.multi_reduction <add>, %239, %cst_148 [1] : vector<8x32xf32> to vector<8xf32>
    %241 = vector.shape_cast %240 : vector<8xf32> to vector<8x1xf32>
    %cst_149 = arith.constant 3.200000e+01 : f32
    %242 = vector.broadcast %cst_149 : f32 to vector<8x1xf32>
    %243 = arith.divf %241, %242 : vector<8x1xf32>
    %cst_150 = arith.constant 9.99999974E-6 : f32
    %244 = vector.broadcast %cst_150 : f32 to vector<8x1xf32>
    %245 = arith.addf %243, %244 : vector<8x1xf32>
    %246 = math.rsqrt %245 : vector<8x1xf32>
    %247 = vector.broadcast %246 : vector<8x1xf32> to vector<8x32xf32>
    %248 = arith.mulf %238, %247 : vector<8x32xf32>
    %249 = vector.broadcast %231 : vector<1x32xf32> to vector<8x32xf32>
    %250 = arith.mulf %248, %249 : vector<8x32xf32>
    %251 = vector.broadcast %232 : vector<1x32xf32> to vector<8x32xf32>
    %252 = arith.addf %250, %251 : vector<8x32xf32>
    %253 = arith.truncf %252 : vector<8x32xf32> to vector<8x32xbf16>
    %c0_151 = arith.constant 0 : index
    %c0_152 = arith.constant 0 : index
    %254 = vector.load %arg18[%c0_151, %c0_152] : memref<32x128xbf16, #tpu.memory_space<vmem>>, vector<32x128xbf16>
    %cst_153 = arith.constant dense<0.000000e+00> : vector<8x128xf32>
    %255 = tpu.matmul %253, %254, %cst_153 {dimension_numbers = #tpu.dot_dimension_numbers<[1], [0], [0], [1], [0, 0, 1, 1], [], []>} : vector<8x32xbf16>, vector<32x128xbf16>, vector<8x128xf32> -> vector<8x128xf32>
    %c0_154 = arith.constant 0 : index
    %c0_155 = arith.constant 0 : index
    %256 = vector.load %arg19[%c0_154, %c0_155] : memref<1x128xf32, #tpu.memory_space<vmem>>, vector<1x128xf32>
    %257 = vector.broadcast %256 : vector<1x128xf32> to vector<8x128xf32>
    %258 = arith.addf %255, %257 : vector<8x128xf32>
    %cst_156 = arith.constant 5.000000e-01 : f32
    %259 = vector.broadcast %cst_156 : f32 to vector<8x128xf32>
    %260 = arith.mulf %259, %258 : vector<8x128xf32>
    %cst_157 = arith.constant 0.707106769 : f32
    %261 = vector.broadcast %cst_157 : f32 to vector<8x128xf32>
    %262 = arith.mulf %258, %261 : vector<8x128xf32>
    %cst_158 = arith.constant 0.000000e+00 : f32
    %263 = vector.broadcast %cst_158 : f32 to vector<8x128xf32>
    %264 = arith.cmpf oge, %262, %263 : vector<8x128xf32>
    %cst_159 = arith.constant 1.000000e+00 : f32
    %cst_160 = arith.constant -1.000000e+00 : f32
    %265 = vector.broadcast %cst_159 : f32 to vector<8x128xf32>
    %266 = vector.broadcast %cst_160 : f32 to vector<8x128xf32>
    %267 = arith.select %264, %265, %266 : vector<8x128xi1>, vector<8x128xf32>
    %268 = math.absf %262 : vector<8x128xf32>
    %cst_161 = arith.constant 0.327591091 : f32
    %269 = vector.broadcast %cst_161 : f32 to vector<8x128xf32>
    %270 = arith.mulf %269, %268 : vector<8x128xf32>
    %cst_162 = arith.constant 1.000000e+00 : f32
    %271 = vector.broadcast %cst_162 : f32 to vector<8x128xf32>
    %272 = arith.addf %271, %270 : vector<8x128xf32>
    %cst_163 = arith.constant 1.000000e+00 : f32
    %273 = vector.broadcast %cst_163 : f32 to vector<8x128xf32>
    %274 = arith.divf %273, %272 : vector<8x128xf32>
    %cst_164 = arith.constant 1.06140542 : f32
    %275 = vector.broadcast %cst_164 : f32 to vector<8x128xf32>
    %276 = arith.mulf %275, %274 : vector<8x128xf32>
    %cst_165 = arith.constant -1.45315206 : f32
    %277 = vector.broadcast %cst_165 : f32 to vector<8x128xf32>
    %278 = arith.addf %276, %277 : vector<8x128xf32>
    %279 = arith.mulf %278, %274 : vector<8x128xf32>
    %cst_166 = arith.constant 1.42141378 : f32
    %280 = vector.broadcast %cst_166 : f32 to vector<8x128xf32>
    %281 = arith.addf %279, %280 : vector<8x128xf32>
    %282 = arith.mulf %281, %274 : vector<8x128xf32>
    %cst_167 = arith.constant -0.284496725 : f32
    %283 = vector.broadcast %cst_167 : f32 to vector<8x128xf32>
    %284 = arith.addf %282, %283 : vector<8x128xf32>
    %285 = arith.mulf %284, %274 : vector<8x128xf32>
    %cst_168 = arith.constant 0.254829586 : f32
    %286 = vector.broadcast %cst_168 : f32 to vector<8x128xf32>
    %287 = arith.addf %285, %286 : vector<8x128xf32>
    %288 = arith.mulf %287, %274 : vector<8x128xf32>
    %cst_169 = arith.constant 0.000000e+00 : f32
    %289 = vector.broadcast %cst_169 : f32 to vector<8x128xf32>
    %290 = arith.subf %289, %268 : vector<8x128xf32>
    %291 = arith.mulf %290, %268 : vector<8x128xf32>
    %292 = math.exp %291 : vector<8x128xf32>
    %293 = arith.mulf %288, %292 : vector<8x128xf32>
    %cst_170 = arith.constant 1.000000e+00 : f32
    %294 = vector.broadcast %cst_170 : f32 to vector<8x128xf32>
    %295 = arith.subf %294, %293 : vector<8x128xf32>
    %296 = arith.mulf %267, %295 : vector<8x128xf32>
    %cst_171 = arith.constant 1.000000e+00 : f32
    %297 = vector.broadcast %cst_171 : f32 to vector<8x128xf32>
    %298 = arith.addf %297, %296 : vector<8x128xf32>
    %299 = arith.mulf %260, %298 : vector<8x128xf32>
    %300 = arith.truncf %299 : vector<8x128xf32> to vector<8x128xbf16>
    %c0_172 = arith.constant 0 : index
    %c0_173 = arith.constant 0 : index
    %301 = vector.load %arg20[%c0_172, %c0_173] : memref<128x32xbf16, #tpu.memory_space<vmem>>, vector<128x32xbf16>
    %cst_174 = arith.constant dense<0.000000e+00> : vector<8x32xf32>
    %302 = tpu.matmul %300, %301, %cst_174 {dimension_numbers = #tpu.dot_dimension_numbers<[1], [0], [0], [1], [0, 0, 1, 1], [], []>} : vector<8x128xbf16>, vector<128x32xbf16>, vector<8x32xf32> -> vector<8x32xf32>
    %303 = arith.addf %230, %302 : vector<8x32xf32>
    %c0_175 = arith.constant 0 : index
    %c0_176 = arith.constant 0 : index
    %304 = vector.load %arg21[%c0_175, %c0_176] : memref<1x32xf32, #tpu.memory_space<vmem>>, vector<1x32xf32>
    %305 = vector.broadcast %304 : vector<1x32xf32> to vector<8x32xf32>
    %306 = arith.addf %303, %305 : vector<8x32xf32>
    %c0_177 = arith.constant 0 : index
    %c0_178 = arith.constant 0 : index
    %307 = vector.load %arg3[%c0_177, %c0_178] : memref<8x32xf32, #tpu.memory_space<vmem>>, vector<8x32xf32>
    %308 = arith.addf %306, %307 : vector<8x32xf32>
    %c0_179 = arith.constant 0 : index
    %c0_180 = arith.constant 0 : index
    %c0_181 = arith.constant 0 : index
    %309 = vector.load %arg22[%c0_179, %c0_180, %c0_181] : memref<1x8x32xf32, #tpu.memory_space<vmem>>, vector<1x8x32xf32>
    %310 = vector.shape_cast %309 : vector<1x8x32xf32> to vector<8x32xf32>
    %311 = vector.shape_cast %308 : vector<8x32xf32> to vector<1x8x32xf32>
    tpu.vector_store %arg22[%c0_179, %c0_180, %c0_181], %311 {strides = array<i32>} : memref<1x8x32xf32, #tpu.memory_space<vmem>>, vector<1x8x32xf32>,
    return
  }
  func.func @transform_0(%arg0: i32) -> (i32, i32, i32) {
    %c0_i32 = arith.constant 0 : i32
    %c0_i32_0 = arith.constant 0 : i32
    %c0_i32_1 = arith.constant 0 : i32
    %c0_i32_2 = arith.constant 0 : i32
    return %c0_i32, %c0_i32_0, %c0_i32_1 : i32, i32, i32
  }
  func.func @transform_1(%arg0: i32) -> (i32, i32, i32) {
    %c0_i32 = arith.constant 0 : i32
    %c0_i32_0 = arith.constant 0 : i32
    %c0_i32_1 = arith.constant 0 : i32
    return %arg0, %c0_i32, %c0_i32_0 : i32, i32, i32
  }
  func.func @transform_2(%arg0: i32) -> (i32, i32) {
    %c0_i32 = arith.constant 0 : i32
    %c0_i32_0 = arith.constant 0 : i32
    %c0_i32_1 = arith.constant 0 : i32
    return %c0_i32, %c0_i32_0 : i32, i32
  }
  func.func @transform_3(%arg0: i32) -> (i32, i32) {
    %c0_i32 = arith.constant 0 : i32
    %c0_i32_0 = arith.constant 0 : i32
    %c0_i32_1 = arith.constant 0 : i32
    return %c0_i32, %c0_i32_0 : i32, i32
  }
  func.func @transform_4(%arg0: i32) -> (i32, i32) {
    %c0_i32 = arith.constant 0 : i32
    %c0_i32_0 = arith.constant 0 : i32
    %c0_i32_1 = arith.constant 0 : i32
    return %c0_i32, %c0_i32_0 : i32, i32
  }
  func.func @transform_5(%arg0: i32) -> (i32, i32) {
    %c0_i32 = arith.constant 0 : i32
    %c0_i32_0 = arith.constant 0 : i32
    %c0_i32_1 = arith.constant 0 : i32
    return %c0_i32, %c0_i32_0 : i32, i32
  }
  func.func @transform_6(%arg0: i32) -> (i32, i32) {
    %c0_i32 = arith.constant 0 : i32
    %c0_i32_0 = arith.constant 0 : i32
    %c0_i32_1 = arith.constant 0 : i32
    return %c0_i32, %c0_i32_0 : i32, i32
  }
  func.func @transform_7(%arg0: i32) -> (i32, i32, i32) {
    %c0_i32 = arith.constant 0 : i32
    %c0_i32_0 = arith.constant 0 : i32
    %c0_i32_1 = arith.constant 0 : i32
    %c0_i32_2 = arith.constant 0 : i32
    return %c0_i32, %c0_i32_0, %c0_i32_1 : i32, i32, i32
  }
  func.func @transform_8(%arg0: i32) -> (i32, i32, i32) {
    %c0_i32 = arith.constant 0 : i32
    %c0_i32_0 = arith.constant 0 : i32
    %c0_i32_1 = arith.constant 0 : i32
    %c0_i32_2 = arith.constant 0 : i32
    return %c0_i32, %c0_i32_0, %c0_i32_1 : i32, i32, i32
  }
  func.func @transform_9(%arg0: i32) -> (i32, i32, i32) {
    %c0_i32 = arith.constant 0 : i32
    %c0_i32_0 = arith.constant 0 : i32
    %c0_i32_1 = arith.constant 0 : i32
    %c0_i32_2 = arith.constant 0 : i32
    return %c0_i32, %c0_i32_0, %c0_i32_1 : i32, i32, i32
  }
  func.func @transform_10(%arg0: i32) -> (i32, i32, i32) {
    %c0_i32 = arith.constant 0 : i32
    %c0_i32_0 = arith.constant 0 : i32
    %c0_i32_1 = arith.constant 0 : i32
    %c0_i32_2 = arith.constant 0 : i32
    return %c0_i32, %c0_i32_0, %c0_i32_1 : i32, i32, i32
  }
  func.func @transform_11(%arg0: i32) -> (i32, i32, i32) {
    %c0_i32 = arith.constant 0 : i32
    %c0_i32_0 = arith.constant 0 : i32
    %c0_i32_1 = arith.constant 0 : i32
    %c0_i32_2 = arith.constant 0 : i32
    return %c0_i32, %c0_i32_0, %c0_i32_1 : i32, i32, i32
  }
  func.func @transform_12(%arg0: i32) -> (i32, i32, i32) {
    %c0_i32 = arith.constant 0 : i32
    %c0_i32_0 = arith.constant 0 : i32
    %c0_i32_1 = arith.constant 0 : i32
    %c0_i32_2 = arith.constant 0 : i32
    return %c0_i32, %c0_i32_0, %c0_i32_1 : i32, i32, i32
  }
  func.func @transform_13(%arg0: i32) -> (i32, i32, i32) {
    %c0_i32 = arith.constant 0 : i32
    %c0_i32_0 = arith.constant 0 : i32
    %c0_i32_1 = arith.constant 0 : i32
    %c0_i32_2 = arith.constant 0 : i32
    return %c0_i32, %c0_i32_0, %c0_i32_1 : i32, i32, i32
  }
  func.func @transform_14(%arg0: i32) -> (i32, i32) {
    %c0_i32 = arith.constant 0 : i32
    %c0_i32_0 = arith.constant 0 : i32
    %c0_i32_1 = arith.constant 0 : i32
    return %c0_i32, %c0_i32_0 : i32, i32
  }
  func.func @transform_15(%arg0: i32) -> (i32, i32) {
    %c0_i32 = arith.constant 0 : i32
    %c0_i32_0 = arith.constant 0 : i32
    %c0_i32_1 = arith.constant 0 : i32
    return %c0_i32, %c0_i32_0 : i32, i32
  }
  func.func @transform_16(%arg0: i32) -> (i32, i32) {
    %c0_i32 = arith.constant 0 : i32
    %c0_i32_0 = arith.constant 0 : i32
    %c0_i32_1 = arith.constant 0 : i32
    return %c0_i32, %c0_i32_0 : i32, i32
  }
  func.func @transform_17(%arg0: i32) -> (i32, i32) {
    %c0_i32 = arith.constant 0 : i32
    %c0_i32_0 = arith.constant 0 : i32
    %c0_i32_1 = arith.constant 0 : i32
    return %c0_i32, %c0_i32_0 : i32, i32
  }
  func.func @transform_18(%arg0: i32) -> (i32, i32) {
    %c0_i32 = arith.constant 0 : i32
    %c0_i32_0 = arith.constant 0 : i32
    %c0_i32_1 = arith.constant 0 : i32
    return %c0_i32, %c0_i32_0 : i32, i32
  }
  func.func @transform_19(%arg0: i32) -> (i32, i32) {
    %c0_i32 = arith.constant 0 : i32
    %c0_i32_0 = arith.constant 0 : i32
    %c0_i32_1 = arith.constant 0 : i32
    return %c0_i32, %c0_i32_0 : i32, i32
  }
  func.func @transform_20(%arg0: i32) -> (i32, i32) {
    %c0_i32 = arith.constant 0 : i32
    %c0_i32_0 = arith.constant 0 : i32
    %c0_i32_1 = arith.constant 0 : i32
    return %c0_i32, %c0_i32_0 : i32, i32
  }
  func.func @transform_21(%arg0: i32) -> (i32, i32, i32) {
    %c0_i32 = arith.constant 0 : i32
    %c0_i32_0 = arith.constant 0 : i32
    %c0_i32_1 = arith.constant 0 : i32
    return %arg0, %c0_i32, %c0_i32_0 : i32, i32, i32
  }
}

module attributes {stable_mosaic.version = 11 : i64} {
  func.func @_gpt_stack_kernel(%arg0: i32, %arg1: i32, %arg2: memref<1x8x32xf32, #tpu.memory_space<vmem>>, %arg3: memref<1x1x32xf32, #tpu.memory_space<vmem>>, %arg4: memref<1x4x32x8xbf16, #tpu.memory_space<vmem>>, %arg5: memref<1x4x32x8xbf16, #tpu.memory_space<vmem>>, %arg6: memref<1x4x32x8xbf16, #tpu.memory_space<vmem>>, %arg7: memref<1x4x8x32xbf16, #tpu.memory_space<vmem>>, %arg8: memref<1x1x32xf32, #tpu.memory_space<vmem>>, %arg9: memref<1x32x128xbf16, #tpu.memory_space<vmem>>, %arg10: memref<1x128x32xbf16, #tpu.memory_space<vmem>>, %arg11: memref<1x8x32xf32, #tpu.memory_space<vmem>>, %arg12: memref<8x32xf32, #tpu.memory_space<vmem>>) attributes {dimension_semantics = [#tpu.dimension_semantics<parallel>, #tpu.dimension_semantics<arbitrary>], iteration_bounds = array<i64: 2, 1>, scalar_prefetch = 0 : i64, scratch_operands = 1 : i64, tpu.core_type = #tpu.core_type<tc>, window_params = [{transform_indices = @transform_0, window_bounds = array<i64: 1, 8, 32>}, {transform_indices = @transform_1, window_bounds = array<i64: 1, 1, 32>}, {transform_indices = @transform_2, window_bounds = array<i64: 1, 4, 32, 8>}, {transform_indices = @transform_3, window_bounds = array<i64: 1, 4, 32, 8>}, {transform_indices = @transform_4, window_bounds = array<i64: 1, 4, 32, 8>}, {transform_indices = @transform_5, window_bounds = array<i64: 1, 4, 8, 32>}, {transform_indices = @transform_6, window_bounds = array<i64: 1, 1, 32>}, {transform_indices = @transform_7, window_bounds = array<i64: 1, 32, 128>}, {transform_indices = @transform_8, window_bounds = array<i64: 1, 128, 32>}, {transform_indices = @transform_9, window_bounds = array<i64: 1, 8, 32>}]} {
    %c0_i32 = arith.constant 0 : i32
    %0 = arith.cmpi eq, %arg1, %c0_i32 : i32
    %1 = arith.extui %0 : i1 to i32
    %c0_i32_0 = arith.constant 0 : i32
    %2 = arith.cmpi ne, %1, %c0_i32_0 : i32
    scf.if %2 {
      %c0_147 = arith.constant 0 : index
      %c0_148 = arith.constant 0 : index
      %c0_149 = arith.constant 0 : index
      %240 = vector.load %arg2[%c0_147, %c0_148, %c0_149] : memref<1x8x32xf32, #tpu.memory_space<vmem>>, vector<1x8x32xf32>
      %241 = vector.shape_cast %240 : vector<1x8x32xf32> to vector<8x32xf32>
      %c0_150 = arith.constant 0 : index
      %c0_151 = arith.constant 0 : index
      %242 = vector.load %arg12[%c0_150, %c0_151] : memref<8x32xf32, #tpu.memory_space<vmem>>, vector<8x32xf32>
      tpu.vector_store %arg12[%c0_150, %c0_151], %241 {strides = array<i32>} : memref<8x32xf32, #tpu.memory_space<vmem>>, vector<8x32xf32>,
    } else {
    }
    %c0 = arith.constant 0 : index
    %c0_1 = arith.constant 0 : index
    %3 = vector.load %arg12[%c0, %c0_1] : memref<8x32xf32, #tpu.memory_space<vmem>>, vector<8x32xf32>
    %c0_2 = arith.constant 0 : index
    %c0_3 = arith.constant 0 : index
    %c0_4 = arith.constant 0 : index
    %4 = vector.load %arg3[%c0_2, %c0_3, %c0_4] : memref<1x1x32xf32, #tpu.memory_space<vmem>>, vector<1x1x32xf32>
    %5 = vector.shape_cast %4 : vector<1x1x32xf32> to vector<1x32xf32>
    %cst = arith.constant dense<0.000000e+00> : vector<8xf32>
    %6 = vector.multi_reduction <add>, %3, %cst [1] : vector<8x32xf32> to vector<8xf32>
    %7 = vector.shape_cast %6 : vector<8xf32> to vector<8x1xf32>
    %cst_5 = arith.constant 3.200000e+01 : f32
    %8 = vector.broadcast %cst_5 : f32 to vector<8x1xf32>
    %9 = arith.divf %7, %8 : vector<8x1xf32>
    %10 = vector.broadcast %9 : vector<8x1xf32> to vector<8x32xf32>
    %11 = arith.subf %3, %10 : vector<8x32xf32>
    %12 = arith.mulf %11, %11 : vector<8x32xf32>
    %cst_6 = arith.constant dense<0.000000e+00> : vector<8xf32>
    %13 = vector.multi_reduction <add>, %12, %cst_6 [1] : vector<8x32xf32> to vector<8xf32>
    %14 = vector.shape_cast %13 : vector<8xf32> to vector<8x1xf32>
    %cst_7 = arith.constant 3.200000e+01 : f32
    %15 = vector.broadcast %cst_7 : f32 to vector<8x1xf32>
    %16 = arith.divf %14, %15 : vector<8x1xf32>
    %cst_8 = arith.constant 9.99999974E-6 : f32
    %17 = vector.broadcast %cst_8 : f32 to vector<8x1xf32>
    %18 = arith.addf %16, %17 : vector<8x1xf32>
    %19 = math.rsqrt %18 : vector<8x1xf32>
    %20 = vector.broadcast %19 : vector<8x1xf32> to vector<8x32xf32>
    %21 = arith.mulf %11, %20 : vector<8x32xf32>
    %22 = vector.broadcast %5 : vector<1x32xf32> to vector<8x32xf32>
    %23 = arith.mulf %21, %22 : vector<8x32xf32>
    %24 = arith.truncf %23 : vector<8x32xf32> to vector<8x32xbf16>
    %25 = tpu.iota {dimensions = array<i32: 0>} : vector<8x8xi32>
    %26 = tpu.iota {dimensions = array<i32: 1>} : vector<8x8xi32>
    %27 = arith.cmpi sle, %26, %25 : vector<8x8xi32>
    %cst_9 = arith.constant 0.000000e+00 : f32
    %28 = vector.broadcast %cst_9 : f32 to vector<8x32xf32>
    %c0_10 = arith.constant 0 : index
    %c0_11 = arith.constant 0 : index
    %c0_12 = arith.constant 0 : index
    %c0_13 = arith.constant 0 : index
    %29 = vector.load %arg4[%c0_10, %c0_11, %c0_12, %c0_13] : memref<1x4x32x8xbf16, #tpu.memory_space<vmem>>, vector<1x1x32x8xbf16>
    %30 = vector.shape_cast %29 : vector<1x1x32x8xbf16> to vector<32x8xbf16>
    %cst_14 = arith.constant dense<0.000000e+00> : vector<8x8xf32>
    %31 = tpu.matmul %24, %30, %cst_14 {dimension_numbers = #tpu.dot_dimension_numbers<[1], [0], [0], [1], [0, 0, 1, 1], [], []>} : vector<8x32xbf16>, vector<32x8xbf16>, vector<8x8xf32> -> vector<8x8xf32>
    %c0_15 = arith.constant 0 : index
    %c0_16 = arith.constant 0 : index
    %c0_17 = arith.constant 0 : index
    %c0_18 = arith.constant 0 : index
    %32 = vector.load %arg5[%c0_15, %c0_16, %c0_17, %c0_18] : memref<1x4x32x8xbf16, #tpu.memory_space<vmem>>, vector<1x1x32x8xbf16>
    %33 = vector.shape_cast %32 : vector<1x1x32x8xbf16> to vector<32x8xbf16>
    %cst_19 = arith.constant dense<0.000000e+00> : vector<8x8xf32>
    %34 = tpu.matmul %24, %33, %cst_19 {dimension_numbers = #tpu.dot_dimension_numbers<[1], [0], [0], [1], [0, 0, 1, 1], [], []>} : vector<8x32xbf16>, vector<32x8xbf16>, vector<8x8xf32> -> vector<8x8xf32>
    %c0_20 = arith.constant 0 : index
    %c0_21 = arith.constant 0 : index
    %c0_22 = arith.constant 0 : index
    %c0_23 = arith.constant 0 : index
    %35 = vector.load %arg6[%c0_20, %c0_21, %c0_22, %c0_23] : memref<1x4x32x8xbf16, #tpu.memory_space<vmem>>, vector<1x1x32x8xbf16>
    %36 = vector.shape_cast %35 : vector<1x1x32x8xbf16> to vector<32x8xbf16>
    %cst_24 = arith.constant dense<0.000000e+00> : vector<8x8xf32>
    %37 = tpu.matmul %24, %36, %cst_24 {dimension_numbers = #tpu.dot_dimension_numbers<[1], [0], [0], [1], [0, 0, 1, 1], [], []>} : vector<8x32xbf16>, vector<32x8xbf16>, vector<8x8xf32> -> vector<8x8xf32>
    %38 = arith.truncf %31 : vector<8x8xf32> to vector<8x8xbf16>
    %39 = arith.truncf %34 : vector<8x8xf32> to vector<8x8xbf16>
    %cst_25 = arith.constant dense<0.000000e+00> : vector<8x8xf32>
    %40 = tpu.matmul %38, %39, %cst_25 {dimension_numbers = #tpu.dot_dimension_numbers<[1], [1], [0], [0], [0, 0, 1, 0], [], []>} : vector<8x8xbf16>, vector<8x8xbf16>, vector<8x8xf32> -> vector<8x8xf32>
    %cst_26 = arith.constant 0.353553385 : f32
    %41 = vector.broadcast %cst_26 : f32 to vector<8x8xf32>
    %42 = arith.mulf %40, %41 : vector<8x8xf32>
    %cst_27 = arith.constant -1.000000e+30 : f32
    %43 = vector.broadcast %cst_27 : f32 to vector<8x8xf32>
    %44 = arith.select %27, %42, %43 : vector<8x8xi1>, vector<8x8xf32>
    %cst_28 = arith.constant dense<0xFF800000> : vector<8xf32>
    %45 = vector.multi_reduction <maximumf>, %44, %cst_28 [1] : vector<8x8xf32> to vector<8xf32>
    %46 = vector.shape_cast %45 : vector<8xf32> to vector<8x1xf32>
    %47 = vector.broadcast %46 : vector<8x1xf32> to vector<8x8xf32>
    %48 = arith.subf %44, %47 : vector<8x8xf32>
    %49 = math.exp %48 : vector<8x8xf32>
    %cst_29 = arith.constant dense<0.000000e+00> : vector<8xf32>
    %50 = vector.multi_reduction <add>, %49, %cst_29 [1] : vector<8x8xf32> to vector<8xf32>
    %51 = vector.shape_cast %50 : vector<8xf32> to vector<8x1xf32>
    %52 = tpu.reciprocal %51 {approx = true} : vector<8x1xf32> -> vector<8x1xf32>
    %53 = vector.broadcast %52 : vector<8x1xf32> to vector<8x8xf32>
    %54 = arith.mulf %49, %53 : vector<8x8xf32>
    %55 = arith.truncf %54 : vector<8x8xf32> to vector<8x8xbf16>
    %56 = arith.truncf %37 : vector<8x8xf32> to vector<8x8xbf16>
    %cst_30 = arith.constant dense<0.000000e+00> : vector<8x8xf32>
    %57 = tpu.matmul %55, %56, %cst_30 {dimension_numbers = #tpu.dot_dimension_numbers<[1], [0], [0], [1], [0, 0, 1, 1], [], []>} : vector<8x8xbf16>, vector<8x8xbf16>, vector<8x8xf32> -> vector<8x8xf32>
    %58 = arith.truncf %57 : vector<8x8xf32> to vector<8x8xbf16>
    %c0_31 = arith.constant 0 : index
    %c0_32 = arith.constant 0 : index
    %c0_33 = arith.constant 0 : index
    %c0_34 = arith.constant 0 : index
    %59 = vector.load %arg7[%c0_31, %c0_32, %c0_33, %c0_34] : memref<1x4x8x32xbf16, #tpu.memory_space<vmem>>, vector<1x1x8x32xbf16>
    %60 = vector.shape_cast %59 : vector<1x1x8x32xbf16> to vector<8x32xbf16>
    %cst_35 = arith.constant dense<0.000000e+00> : vector<8x32xf32>
    %61 = tpu.matmul %58, %60, %cst_35 {dimension_numbers = #tpu.dot_dimension_numbers<[1], [0], [0], [1], [0, 0, 1, 1], [], []>} : vector<8x8xbf16>, vector<8x32xbf16>, vector<8x32xf32> -> vector<8x32xf32>
    %62 = arith.addf %28, %61 : vector<8x32xf32>
    %c0_36 = arith.constant 0 : index
    %c1 = arith.constant 1 : index
    %c0_37 = arith.constant 0 : index
    %c0_38 = arith.constant 0 : index
    %63 = vector.load %arg4[%c0_36, %c1, %c0_37, %c0_38] : memref<1x4x32x8xbf16, #tpu.memory_space<vmem>>, vector<1x1x32x8xbf16>
    %64 = vector.shape_cast %63 : vector<1x1x32x8xbf16> to vector<32x8xbf16>
    %cst_39 = arith.constant dense<0.000000e+00> : vector<8x8xf32>
    %65 = tpu.matmul %24, %64, %cst_39 {dimension_numbers = #tpu.dot_dimension_numbers<[1], [0], [0], [1], [0, 0, 1, 1], [], []>} : vector<8x32xbf16>, vector<32x8xbf16>, vector<8x8xf32> -> vector<8x8xf32>
    %c0_40 = arith.constant 0 : index
    %c1_41 = arith.constant 1 : index
    %c0_42 = arith.constant 0 : index
    %c0_43 = arith.constant 0 : index
    %66 = vector.load %arg5[%c0_40, %c1_41, %c0_42, %c0_43] : memref<1x4x32x8xbf16, #tpu.memory_space<vmem>>, vector<1x1x32x8xbf16>
    %67 = vector.shape_cast %66 : vector<1x1x32x8xbf16> to vector<32x8xbf16>
    %cst_44 = arith.constant dense<0.000000e+00> : vector<8x8xf32>
    %68 = tpu.matmul %24, %67, %cst_44 {dimension_numbers = #tpu.dot_dimension_numbers<[1], [0], [0], [1], [0, 0, 1, 1], [], []>} : vector<8x32xbf16>, vector<32x8xbf16>, vector<8x8xf32> -> vector<8x8xf32>
    %c0_45 = arith.constant 0 : index
    %c1_46 = arith.constant 1 : index
    %c0_47 = arith.constant 0 : index
    %c0_48 = arith.constant 0 : index
    %69 = vector.load %arg6[%c0_45, %c1_46, %c0_47, %c0_48] : memref<1x4x32x8xbf16, #tpu.memory_space<vmem>>, vector<1x1x32x8xbf16>
    %70 = vector.shape_cast %69 : vector<1x1x32x8xbf16> to vector<32x8xbf16>
    %cst_49 = arith.constant dense<0.000000e+00> : vector<8x8xf32>
    %71 = tpu.matmul %24, %70, %cst_49 {dimension_numbers = #tpu.dot_dimension_numbers<[1], [0], [0], [1], [0, 0, 1, 1], [], []>} : vector<8x32xbf16>, vector<32x8xbf16>, vector<8x8xf32> -> vector<8x8xf32>
    %72 = arith.truncf %65 : vector<8x8xf32> to vector<8x8xbf16>
    %73 = arith.truncf %68 : vector<8x8xf32> to vector<8x8xbf16>
    %cst_50 = arith.constant dense<0.000000e+00> : vector<8x8xf32>
    %74 = tpu.matmul %72, %73, %cst_50 {dimension_numbers = #tpu.dot_dimension_numbers<[1], [1], [0], [0], [0, 0, 1, 0], [], []>} : vector<8x8xbf16>, vector<8x8xbf16>, vector<8x8xf32> -> vector<8x8xf32>
    %cst_51 = arith.constant 0.353553385 : f32
    %75 = vector.broadcast %cst_51 : f32 to vector<8x8xf32>
    %76 = arith.mulf %74, %75 : vector<8x8xf32>
    %cst_52 = arith.constant -1.000000e+30 : f32
    %77 = vector.broadcast %cst_52 : f32 to vector<8x8xf32>
    %78 = arith.select %27, %76, %77 : vector<8x8xi1>, vector<8x8xf32>
    %cst_53 = arith.constant dense<0xFF800000> : vector<8xf32>
    %79 = vector.multi_reduction <maximumf>, %78, %cst_53 [1] : vector<8x8xf32> to vector<8xf32>
    %80 = vector.shape_cast %79 : vector<8xf32> to vector<8x1xf32>
    %81 = vector.broadcast %80 : vector<8x1xf32> to vector<8x8xf32>
    %82 = arith.subf %78, %81 : vector<8x8xf32>
    %83 = math.exp %82 : vector<8x8xf32>
    %cst_54 = arith.constant dense<0.000000e+00> : vector<8xf32>
    %84 = vector.multi_reduction <add>, %83, %cst_54 [1] : vector<8x8xf32> to vector<8xf32>
    %85 = vector.shape_cast %84 : vector<8xf32> to vector<8x1xf32>
    %86 = tpu.reciprocal %85 {approx = true} : vector<8x1xf32> -> vector<8x1xf32>
    %87 = vector.broadcast %86 : vector<8x1xf32> to vector<8x8xf32>
    %88 = arith.mulf %83, %87 : vector<8x8xf32>
    %89 = arith.truncf %88 : vector<8x8xf32> to vector<8x8xbf16>
    %90 = arith.truncf %71 : vector<8x8xf32> to vector<8x8xbf16>
    %cst_55 = arith.constant dense<0.000000e+00> : vector<8x8xf32>
    %91 = tpu.matmul %89, %90, %cst_55 {dimension_numbers = #tpu.dot_dimension_numbers<[1], [0], [0], [1], [0, 0, 1, 1], [], []>} : vector<8x8xbf16>, vector<8x8xbf16>, vector<8x8xf32> -> vector<8x8xf32>
    %92 = arith.truncf %91 : vector<8x8xf32> to vector<8x8xbf16>
    %c0_56 = arith.constant 0 : index
    %c1_57 = arith.constant 1 : index
    %c0_58 = arith.constant 0 : index
    %c0_59 = arith.constant 0 : index
    %93 = vector.load %arg7[%c0_56, %c1_57, %c0_58, %c0_59] : memref<1x4x8x32xbf16, #tpu.memory_space<vmem>>, vector<1x1x8x32xbf16>
    %94 = vector.shape_cast %93 : vector<1x1x8x32xbf16> to vector<8x32xbf16>
    %cst_60 = arith.constant dense<0.000000e+00> : vector<8x32xf32>
    %95 = tpu.matmul %92, %94, %cst_60 {dimension_numbers = #tpu.dot_dimension_numbers<[1], [0], [0], [1], [0, 0, 1, 1], [], []>} : vector<8x8xbf16>, vector<8x32xbf16>, vector<8x32xf32> -> vector<8x32xf32>
    %96 = arith.addf %62, %95 : vector<8x32xf32>
    %c0_61 = arith.constant 0 : index
    %c2 = arith.constant 2 : index
    %c0_62 = arith.constant 0 : index
    %c0_63 = arith.constant 0 : index
    %97 = vector.load %arg4[%c0_61, %c2, %c0_62, %c0_63] : memref<1x4x32x8xbf16, #tpu.memory_space<vmem>>, vector<1x1x32x8xbf16>
    %98 = vector.shape_cast %97 : vector<1x1x32x8xbf16> to vector<32x8xbf16>
    %cst_64 = arith.constant dense<0.000000e+00> : vector<8x8xf32>
    %99 = tpu.matmul %24, %98, %cst_64 {dimension_numbers = #tpu.dot_dimension_numbers<[1], [0], [0], [1], [0, 0, 1, 1], [], []>} : vector<8x32xbf16>, vector<32x8xbf16>, vector<8x8xf32> -> vector<8x8xf32>
    %c0_65 = arith.constant 0 : index
    %c2_66 = arith.constant 2 : index
    %c0_67 = arith.constant 0 : index
    %c0_68 = arith.constant 0 : index
    %100 = vector.load %arg5[%c0_65, %c2_66, %c0_67, %c0_68] : memref<1x4x32x8xbf16, #tpu.memory_space<vmem>>, vector<1x1x32x8xbf16>
    %101 = vector.shape_cast %100 : vector<1x1x32x8xbf16> to vector<32x8xbf16>
    %cst_69 = arith.constant dense<0.000000e+00> : vector<8x8xf32>
    %102 = tpu.matmul %24, %101, %cst_69 {dimension_numbers = #tpu.dot_dimension_numbers<[1], [0], [0], [1], [0, 0, 1, 1], [], []>} : vector<8x32xbf16>, vector<32x8xbf16>, vector<8x8xf32> -> vector<8x8xf32>
    %c0_70 = arith.constant 0 : index
    %c2_71 = arith.constant 2 : index
    %c0_72 = arith.constant 0 : index
    %c0_73 = arith.constant 0 : index
    %103 = vector.load %arg6[%c0_70, %c2_71, %c0_72, %c0_73] : memref<1x4x32x8xbf16, #tpu.memory_space<vmem>>, vector<1x1x32x8xbf16>
    %104 = vector.shape_cast %103 : vector<1x1x32x8xbf16> to vector<32x8xbf16>
    %cst_74 = arith.constant dense<0.000000e+00> : vector<8x8xf32>
    %105 = tpu.matmul %24, %104, %cst_74 {dimension_numbers = #tpu.dot_dimension_numbers<[1], [0], [0], [1], [0, 0, 1, 1], [], []>} : vector<8x32xbf16>, vector<32x8xbf16>, vector<8x8xf32> -> vector<8x8xf32>
    %106 = arith.truncf %99 : vector<8x8xf32> to vector<8x8xbf16>
    %107 = arith.truncf %102 : vector<8x8xf32> to vector<8x8xbf16>
    %cst_75 = arith.constant dense<0.000000e+00> : vector<8x8xf32>
    %108 = tpu.matmul %106, %107, %cst_75 {dimension_numbers = #tpu.dot_dimension_numbers<[1], [1], [0], [0], [0, 0, 1, 0], [], []>} : vector<8x8xbf16>, vector<8x8xbf16>, vector<8x8xf32> -> vector<8x8xf32>
    %cst_76 = arith.constant 0.353553385 : f32
    %109 = vector.broadcast %cst_76 : f32 to vector<8x8xf32>
    %110 = arith.mulf %108, %109 : vector<8x8xf32>
    %cst_77 = arith.constant -1.000000e+30 : f32
    %111 = vector.broadcast %cst_77 : f32 to vector<8x8xf32>
    %112 = arith.select %27, %110, %111 : vector<8x8xi1>, vector<8x8xf32>
    %cst_78 = arith.constant dense<0xFF800000> : vector<8xf32>
    %113 = vector.multi_reduction <maximumf>, %112, %cst_78 [1] : vector<8x8xf32> to vector<8xf32>
    %114 = vector.shape_cast %113 : vector<8xf32> to vector<8x1xf32>
    %115 = vector.broadcast %114 : vector<8x1xf32> to vector<8x8xf32>
    %116 = arith.subf %112, %115 : vector<8x8xf32>
    %117 = math.exp %116 : vector<8x8xf32>
    %cst_79 = arith.constant dense<0.000000e+00> : vector<8xf32>
    %118 = vector.multi_reduction <add>, %117, %cst_79 [1] : vector<8x8xf32> to vector<8xf32>
    %119 = vector.shape_cast %118 : vector<8xf32> to vector<8x1xf32>
    %120 = tpu.reciprocal %119 {approx = true} : vector<8x1xf32> -> vector<8x1xf32>
    %121 = vector.broadcast %120 : vector<8x1xf32> to vector<8x8xf32>
    %122 = arith.mulf %117, %121 : vector<8x8xf32>
    %123 = arith.truncf %122 : vector<8x8xf32> to vector<8x8xbf16>
    %124 = arith.truncf %105 : vector<8x8xf32> to vector<8x8xbf16>
    %cst_80 = arith.constant dense<0.000000e+00> : vector<8x8xf32>
    %125 = tpu.matmul %123, %124, %cst_80 {dimension_numbers = #tpu.dot_dimension_numbers<[1], [0], [0], [1], [0, 0, 1, 1], [], []>} : vector<8x8xbf16>, vector<8x8xbf16>, vector<8x8xf32> -> vector<8x8xf32>
    %126 = arith.truncf %125 : vector<8x8xf32> to vector<8x8xbf16>
    %c0_81 = arith.constant 0 : index
    %c2_82 = arith.constant 2 : index
    %c0_83 = arith.constant 0 : index
    %c0_84 = arith.constant 0 : index
    %127 = vector.load %arg7[%c0_81, %c2_82, %c0_83, %c0_84] : memref<1x4x8x32xbf16, #tpu.memory_space<vmem>>, vector<1x1x8x32xbf16>
    %128 = vector.shape_cast %127 : vector<1x1x8x32xbf16> to vector<8x32xbf16>
    %cst_85 = arith.constant dense<0.000000e+00> : vector<8x32xf32>
    %129 = tpu.matmul %126, %128, %cst_85 {dimension_numbers = #tpu.dot_dimension_numbers<[1], [0], [0], [1], [0, 0, 1, 1], [], []>} : vector<8x8xbf16>, vector<8x32xbf16>, vector<8x32xf32> -> vector<8x32xf32>
    %130 = arith.addf %96, %129 : vector<8x32xf32>
    %c0_86 = arith.constant 0 : index
    %c3 = arith.constant 3 : index
    %c0_87 = arith.constant 0 : index
    %c0_88 = arith.constant 0 : index
    %131 = vector.load %arg4[%c0_86, %c3, %c0_87, %c0_88] : memref<1x4x32x8xbf16, #tpu.memory_space<vmem>>, vector<1x1x32x8xbf16>
    %132 = vector.shape_cast %131 : vector<1x1x32x8xbf16> to vector<32x8xbf16>
    %cst_89 = arith.constant dense<0.000000e+00> : vector<8x8xf32>
    %133 = tpu.matmul %24, %132, %cst_89 {dimension_numbers = #tpu.dot_dimension_numbers<[1], [0], [0], [1], [0, 0, 1, 1], [], []>} : vector<8x32xbf16>, vector<32x8xbf16>, vector<8x8xf32> -> vector<8x8xf32>
    %c0_90 = arith.constant 0 : index
    %c3_91 = arith.constant 3 : index
    %c0_92 = arith.constant 0 : index
    %c0_93 = arith.constant 0 : index
    %134 = vector.load %arg5[%c0_90, %c3_91, %c0_92, %c0_93] : memref<1x4x32x8xbf16, #tpu.memory_space<vmem>>, vector<1x1x32x8xbf16>
    %135 = vector.shape_cast %134 : vector<1x1x32x8xbf16> to vector<32x8xbf16>
    %cst_94 = arith.constant dense<0.000000e+00> : vector<8x8xf32>
    %136 = tpu.matmul %24, %135, %cst_94 {dimension_numbers = #tpu.dot_dimension_numbers<[1], [0], [0], [1], [0, 0, 1, 1], [], []>} : vector<8x32xbf16>, vector<32x8xbf16>, vector<8x8xf32> -> vector<8x8xf32>
    %c0_95 = arith.constant 0 : index
    %c3_96 = arith.constant 3 : index
    %c0_97 = arith.constant 0 : index
    %c0_98 = arith.constant 0 : index
    %137 = vector.load %arg6[%c0_95, %c3_96, %c0_97, %c0_98] : memref<1x4x32x8xbf16, #tpu.memory_space<vmem>>, vector<1x1x32x8xbf16>
    %138 = vector.shape_cast %137 : vector<1x1x32x8xbf16> to vector<32x8xbf16>
    %cst_99 = arith.constant dense<0.000000e+00> : vector<8x8xf32>
    %139 = tpu.matmul %24, %138, %cst_99 {dimension_numbers = #tpu.dot_dimension_numbers<[1], [0], [0], [1], [0, 0, 1, 1], [], []>} : vector<8x32xbf16>, vector<32x8xbf16>, vector<8x8xf32> -> vector<8x8xf32>
    %140 = arith.truncf %133 : vector<8x8xf32> to vector<8x8xbf16>
    %141 = arith.truncf %136 : vector<8x8xf32> to vector<8x8xbf16>
    %cst_100 = arith.constant dense<0.000000e+00> : vector<8x8xf32>
    %142 = tpu.matmul %140, %141, %cst_100 {dimension_numbers = #tpu.dot_dimension_numbers<[1], [1], [0], [0], [0, 0, 1, 0], [], []>} : vector<8x8xbf16>, vector<8x8xbf16>, vector<8x8xf32> -> vector<8x8xf32>
    %cst_101 = arith.constant 0.353553385 : f32
    %143 = vector.broadcast %cst_101 : f32 to vector<8x8xf32>
    %144 = arith.mulf %142, %143 : vector<8x8xf32>
    %cst_102 = arith.constant -1.000000e+30 : f32
    %145 = vector.broadcast %cst_102 : f32 to vector<8x8xf32>
    %146 = arith.select %27, %144, %145 : vector<8x8xi1>, vector<8x8xf32>
    %cst_103 = arith.constant dense<0xFF800000> : vector<8xf32>
    %147 = vector.multi_reduction <maximumf>, %146, %cst_103 [1] : vector<8x8xf32> to vector<8xf32>
    %148 = vector.shape_cast %147 : vector<8xf32> to vector<8x1xf32>
    %149 = vector.broadcast %148 : vector<8x1xf32> to vector<8x8xf32>
    %150 = arith.subf %146, %149 : vector<8x8xf32>
    %151 = math.exp %150 : vector<8x8xf32>
    %cst_104 = arith.constant dense<0.000000e+00> : vector<8xf32>
    %152 = vector.multi_reduction <add>, %151, %cst_104 [1] : vector<8x8xf32> to vector<8xf32>
    %153 = vector.shape_cast %152 : vector<8xf32> to vector<8x1xf32>
    %154 = tpu.reciprocal %153 {approx = true} : vector<8x1xf32> -> vector<8x1xf32>
    %155 = vector.broadcast %154 : vector<8x1xf32> to vector<8x8xf32>
    %156 = arith.mulf %151, %155 : vector<8x8xf32>
    %157 = arith.truncf %156 : vector<8x8xf32> to vector<8x8xbf16>
    %158 = arith.truncf %139 : vector<8x8xf32> to vector<8x8xbf16>
    %cst_105 = arith.constant dense<0.000000e+00> : vector<8x8xf32>
    %159 = tpu.matmul %157, %158, %cst_105 {dimension_numbers = #tpu.dot_dimension_numbers<[1], [0], [0], [1], [0, 0, 1, 1], [], []>} : vector<8x8xbf16>, vector<8x8xbf16>, vector<8x8xf32> -> vector<8x8xf32>
    %160 = arith.truncf %159 : vector<8x8xf32> to vector<8x8xbf16>
    %c0_106 = arith.constant 0 : index
    %c3_107 = arith.constant 3 : index
    %c0_108 = arith.constant 0 : index
    %c0_109 = arith.constant 0 : index
    %161 = vector.load %arg7[%c0_106, %c3_107, %c0_108, %c0_109] : memref<1x4x8x32xbf16, #tpu.memory_space<vmem>>, vector<1x1x8x32xbf16>
    %162 = vector.shape_cast %161 : vector<1x1x8x32xbf16> to vector<8x32xbf16>
    %cst_110 = arith.constant dense<0.000000e+00> : vector<8x32xf32>
    %163 = tpu.matmul %160, %162, %cst_110 {dimension_numbers = #tpu.dot_dimension_numbers<[1], [0], [0], [1], [0, 0, 1, 1], [], []>} : vector<8x8xbf16>, vector<8x32xbf16>, vector<8x32xf32> -> vector<8x32xf32>
    %164 = arith.addf %130, %163 : vector<8x32xf32>
    %165 = arith.addf %3, %164 : vector<8x32xf32>
    %c0_111 = arith.constant 0 : index
    %c0_112 = arith.constant 0 : index
    %c0_113 = arith.constant 0 : index
    %166 = vector.load %arg8[%c0_111, %c0_112, %c0_113] : memref<1x1x32xf32, #tpu.memory_space<vmem>>, vector<1x1x32xf32>
    %167 = vector.shape_cast %166 : vector<1x1x32xf32> to vector<1x32xf32>
    %cst_114 = arith.constant dense<0.000000e+00> : vector<8xf32>
    %168 = vector.multi_reduction <add>, %165, %cst_114 [1] : vector<8x32xf32> to vector<8xf32>
    %169 = vector.shape_cast %168 : vector<8xf32> to vector<8x1xf32>
    %cst_115 = arith.constant 3.200000e+01 : f32
    %170 = vector.broadcast %cst_115 : f32 to vector<8x1xf32>
    %171 = arith.divf %169, %170 : vector<8x1xf32>
    %172 = vector.broadcast %171 : vector<8x1xf32> to vector<8x32xf32>
    %173 = arith.subf %165, %172 : vector<8x32xf32>
    %174 = arith.mulf %173, %173 : vector<8x32xf32>
    %cst_116 = arith.constant dense<0.000000e+00> : vector<8xf32>
    %175 = vector.multi_reduction <add>, %174, %cst_116 [1] : vector<8x32xf32> to vector<8xf32>
    %176 = vector.shape_cast %175 : vector<8xf32> to vector<8x1xf32>
    %cst_117 = arith.constant 3.200000e+01 : f32
    %177 = vector.broadcast %cst_117 : f32 to vector<8x1xf32>
    %178 = arith.divf %176, %177 : vector<8x1xf32>
    %cst_118 = arith.constant 9.99999974E-6 : f32
    %179 = vector.broadcast %cst_118 : f32 to vector<8x1xf32>
    %180 = arith.addf %178, %179 : vector<8x1xf32>
    %181 = math.rsqrt %180 : vector<8x1xf32>
    %182 = vector.broadcast %181 : vector<8x1xf32> to vector<8x32xf32>
    %183 = arith.mulf %173, %182 : vector<8x32xf32>
    %184 = vector.broadcast %167 : vector<1x32xf32> to vector<8x32xf32>
    %185 = arith.mulf %183, %184 : vector<8x32xf32>
    %186 = arith.truncf %185 : vector<8x32xf32> to vector<8x32xbf16>
    %c0_119 = arith.constant 0 : index
    %c0_120 = arith.constant 0 : index
    %c0_121 = arith.constant 0 : index
    %187 = vector.load %arg9[%c0_119, %c0_120, %c0_121] : memref<1x32x128xbf16, #tpu.memory_space<vmem>>, vector<1x32x128xbf16>
    %188 = vector.shape_cast %187 : vector<1x32x128xbf16> to vector<32x128xbf16>
    %cst_122 = arith.constant dense<0.000000e+00> : vector<8x128xf32>
    %189 = tpu.matmul %186, %188, %cst_122 {dimension_numbers = #tpu.dot_dimension_numbers<[1], [0], [0], [1], [0, 0, 1, 1], [], []>} : vector<8x32xbf16>, vector<32x128xbf16>, vector<8x128xf32> -> vector<8x128xf32>
    %cst_123 = arith.constant 5.000000e-01 : f32
    %190 = vector.broadcast %cst_123 : f32 to vector<8x128xf32>
    %191 = arith.mulf %190, %189 : vector<8x128xf32>
    %cst_124 = arith.constant 0.707106769 : f32
    %192 = vector.broadcast %cst_124 : f32 to vector<8x128xf32>
    %193 = arith.mulf %189, %192 : vector<8x128xf32>
    %cst_125 = arith.constant 0.000000e+00 : f32
    %194 = vector.broadcast %cst_125 : f32 to vector<8x128xf32>
    %195 = arith.cmpf oge, %193, %194 : vector<8x128xf32>
    %cst_126 = arith.constant 1.000000e+00 : f32
    %cst_127 = arith.constant -1.000000e+00 : f32
    %196 = vector.broadcast %cst_126 : f32 to vector<8x128xf32>
    %197 = vector.broadcast %cst_127 : f32 to vector<8x128xf32>
    %198 = arith.select %195, %196, %197 : vector<8x128xi1>, vector<8x128xf32>
    %199 = math.absf %193 : vector<8x128xf32>
    %cst_128 = arith.constant 0.327591091 : f32
    %200 = vector.broadcast %cst_128 : f32 to vector<8x128xf32>
    %201 = arith.mulf %200, %199 : vector<8x128xf32>
    %cst_129 = arith.constant 1.000000e+00 : f32
    %202 = vector.broadcast %cst_129 : f32 to vector<8x128xf32>
    %203 = arith.addf %202, %201 : vector<8x128xf32>
    %cst_130 = arith.constant 1.000000e+00 : f32
    %204 = vector.broadcast %cst_130 : f32 to vector<8x128xf32>
    %205 = arith.divf %204, %203 : vector<8x128xf32>
    %cst_131 = arith.constant 1.06140542 : f32
    %206 = vector.broadcast %cst_131 : f32 to vector<8x128xf32>
    %207 = arith.mulf %206, %205 : vector<8x128xf32>
    %cst_132 = arith.constant -1.45315206 : f32
    %208 = vector.broadcast %cst_132 : f32 to vector<8x128xf32>
    %209 = arith.addf %207, %208 : vector<8x128xf32>
    %210 = arith.mulf %209, %205 : vector<8x128xf32>
    %cst_133 = arith.constant 1.42141378 : f32
    %211 = vector.broadcast %cst_133 : f32 to vector<8x128xf32>
    %212 = arith.addf %210, %211 : vector<8x128xf32>
    %213 = arith.mulf %212, %205 : vector<8x128xf32>
    %cst_134 = arith.constant -0.284496725 : f32
    %214 = vector.broadcast %cst_134 : f32 to vector<8x128xf32>
    %215 = arith.addf %213, %214 : vector<8x128xf32>
    %216 = arith.mulf %215, %205 : vector<8x128xf32>
    %cst_135 = arith.constant 0.254829586 : f32
    %217 = vector.broadcast %cst_135 : f32 to vector<8x128xf32>
    %218 = arith.addf %216, %217 : vector<8x128xf32>
    %219 = arith.mulf %218, %205 : vector<8x128xf32>
    %cst_136 = arith.constant 0.000000e+00 : f32
    %220 = vector.broadcast %cst_136 : f32 to vector<8x128xf32>
    %221 = arith.subf %220, %199 : vector<8x128xf32>
    %222 = arith.mulf %221, %199 : vector<8x128xf32>
    %223 = math.exp %222 : vector<8x128xf32>
    %224 = arith.mulf %219, %223 : vector<8x128xf32>
    %cst_137 = arith.constant 1.000000e+00 : f32
    %225 = vector.broadcast %cst_137 : f32 to vector<8x128xf32>
    %226 = arith.subf %225, %224 : vector<8x128xf32>
    %227 = arith.mulf %198, %226 : vector<8x128xf32>
    %cst_138 = arith.constant 1.000000e+00 : f32
    %228 = vector.broadcast %cst_138 : f32 to vector<8x128xf32>
    %229 = arith.addf %228, %227 : vector<8x128xf32>
    %230 = arith.mulf %191, %229 : vector<8x128xf32>
    %231 = arith.truncf %230 : vector<8x128xf32> to vector<8x128xbf16>
    %c0_139 = arith.constant 0 : index
    %c0_140 = arith.constant 0 : index
    %c0_141 = arith.constant 0 : index
    %232 = vector.load %arg10[%c0_139, %c0_140, %c0_141] : memref<1x128x32xbf16, #tpu.memory_space<vmem>>, vector<1x128x32xbf16>
    %233 = vector.shape_cast %232 : vector<1x128x32xbf16> to vector<128x32xbf16>
    %cst_142 = arith.constant dense<0.000000e+00> : vector<8x32xf32>
    %234 = tpu.matmul %231, %233, %cst_142 {dimension_numbers = #tpu.dot_dimension_numbers<[1], [0], [0], [1], [0, 0, 1, 1], [], []>} : vector<8x128xbf16>, vector<128x32xbf16>, vector<8x32xf32> -> vector<8x32xf32>
    %235 = arith.addf %165, %234 : vector<8x32xf32>
    %c0_143 = arith.constant 0 : index
    %c0_144 = arith.constant 0 : index
    %236 = vector.load %arg12[%c0_143, %c0_144] : memref<8x32xf32, #tpu.memory_space<vmem>>, vector<8x32xf32>
    tpu.vector_store %arg12[%c0_143, %c0_144], %235 {strides = array<i32>} : memref<8x32xf32, #tpu.memory_space<vmem>>, vector<8x32xf32>,
    %c0_i32_145 = arith.constant 0 : i32
    %237 = arith.cmpi eq, %arg1, %c0_i32_145 : i32
    %238 = arith.extui %237 : i1 to i32
    %c0_i32_146 = arith.constant 0 : i32
    %239 = arith.cmpi ne, %238, %c0_i32_146 : i32
    scf.if %239 {
      %c0_147 = arith.constant 0 : index
      %c0_148 = arith.constant 0 : index
      %c0_149 = arith.constant 0 : index
      %240 = vector.load %arg11[%c0_147, %c0_148, %c0_149] : memref<1x8x32xf32, #tpu.memory_space<vmem>>, vector<1x8x32xf32>
      %241 = vector.shape_cast %240 : vector<1x8x32xf32> to vector<8x32xf32>
      %242 = vector.shape_cast %235 : vector<8x32xf32> to vector<1x8x32xf32>
      tpu.vector_store %arg11[%c0_147, %c0_148, %c0_149], %242 {strides = array<i32>} : memref<1x8x32xf32, #tpu.memory_space<vmem>>, vector<1x8x32xf32>,
    } else {
    }
    return
  }
  func.func @transform_0(%arg0: i32, %arg1: i32) -> (i32, i32, i32) {
    %c0_i32 = arith.constant 0 : i32
    %c0_i32_0 = arith.constant 0 : i32
    %c0_i32_1 = arith.constant 0 : i32
    return %arg0, %c0_i32, %c0_i32_0 : i32, i32, i32
  }
  func.func @transform_1(%arg0: i32, %arg1: i32) -> (i32, i32, i32) {
    %c0_i32 = arith.constant 0 : i32
    %c0_i32_0 = arith.constant 0 : i32
    %c0_i32_1 = arith.constant 0 : i32
    return %arg1, %c0_i32, %c0_i32_0 : i32, i32, i32
  }
  func.func @transform_2(%arg0: i32, %arg1: i32) -> (i32, i32, i32, i32) {
    %c0_i32 = arith.constant 0 : i32
    %c0_i32_0 = arith.constant 0 : i32
    %c0_i32_1 = arith.constant 0 : i32
    %c0_i32_2 = arith.constant 0 : i32
    return %arg1, %c0_i32, %c0_i32_0, %c0_i32_1 : i32, i32, i32, i32
  }
  func.func @transform_3(%arg0: i32, %arg1: i32) -> (i32, i32, i32, i32) {
    %c0_i32 = arith.constant 0 : i32
    %c0_i32_0 = arith.constant 0 : i32
    %c0_i32_1 = arith.constant 0 : i32
    %c0_i32_2 = arith.constant 0 : i32
    return %arg1, %c0_i32, %c0_i32_0, %c0_i32_1 : i32, i32, i32, i32
  }
  func.func @transform_4(%arg0: i32, %arg1: i32) -> (i32, i32, i32, i32) {
    %c0_i32 = arith.constant 0 : i32
    %c0_i32_0 = arith.constant 0 : i32
    %c0_i32_1 = arith.constant 0 : i32
    %c0_i32_2 = arith.constant 0 : i32
    return %arg1, %c0_i32, %c0_i32_0, %c0_i32_1 : i32, i32, i32, i32
  }
  func.func @transform_5(%arg0: i32, %arg1: i32) -> (i32, i32, i32, i32) {
    %c0_i32 = arith.constant 0 : i32
    %c0_i32_0 = arith.constant 0 : i32
    %c0_i32_1 = arith.constant 0 : i32
    %c0_i32_2 = arith.constant 0 : i32
    return %arg1, %c0_i32, %c0_i32_0, %c0_i32_1 : i32, i32, i32, i32
  }
  func.func @transform_6(%arg0: i32, %arg1: i32) -> (i32, i32, i32) {
    %c0_i32 = arith.constant 0 : i32
    %c0_i32_0 = arith.constant 0 : i32
    %c0_i32_1 = arith.constant 0 : i32
    return %arg1, %c0_i32, %c0_i32_0 : i32, i32, i32
  }
  func.func @transform_7(%arg0: i32, %arg1: i32) -> (i32, i32, i32) {
    %c0_i32 = arith.constant 0 : i32
    %c0_i32_0 = arith.constant 0 : i32
    %c0_i32_1 = arith.constant 0 : i32
    return %arg1, %c0_i32, %c0_i32_0 : i32, i32, i32
  }
  func.func @transform_8(%arg0: i32, %arg1: i32) -> (i32, i32, i32) {
    %c0_i32 = arith.constant 0 : i32
    %c0_i32_0 = arith.constant 0 : i32
    %c0_i32_1 = arith.constant 0 : i32
    return %arg1, %c0_i32, %c0_i32_0 : i32, i32, i32
  }
  func.func @transform_9(%arg0: i32, %arg1: i32) -> (i32, i32, i32) {
    %c0_i32 = arith.constant 0 : i32
    %c0_i32_0 = arith.constant 0 : i32
    %c0_i32_1 = arith.constant 0 : i32
    return %arg0, %c0_i32, %c0_i32_0 : i32, i32, i32
  }
}

module attributes {stable_mosaic.version = 11 : i64} {
  func.func @_proj_vq_kernel(%arg0: i32, %arg1: memref<16x32xf32, #tpu.memory_space<vmem>>, %arg2: memref<32x16xbf16, #tpu.memory_space<vmem>>, %arg3: memref<1x16xf32, #tpu.memory_space<vmem>>, %arg4: memref<16x16xf32, #tpu.memory_space<vmem>>, %arg5: memref<16x16xf32, #tpu.memory_space<vmem>>, %arg6: memref<16x16xf32, #tpu.memory_space<vmem>>, %arg7: memref<16x1xi32, #tpu.memory_space<vmem>>) attributes {dimension_semantics = [#tpu.dimension_semantics<arbitrary>], iteration_bounds = array<i64: 1>, scalar_prefetch = 0 : i64, scratch_operands = 0 : i64, tpu.core_type = #tpu.core_type<tc>, window_params = [{pipeline_mode = #tpu.pipeline_mode<synchronous>, transform_indices = @transform_0, window_bounds = array<i64: 16, 32>}, {pipeline_mode = #tpu.pipeline_mode<synchronous>, transform_indices = @transform_1, window_bounds = array<i64: 32, 16>}, {pipeline_mode = #tpu.pipeline_mode<synchronous>, transform_indices = @transform_2, window_bounds = array<i64: 1, 16>}, {pipeline_mode = #tpu.pipeline_mode<synchronous>, transform_indices = @transform_3, window_bounds = array<i64: 16, 16>}, {pipeline_mode = #tpu.pipeline_mode<synchronous>, transform_indices = @transform_4, window_bounds = array<i64: 16, 16>}, {pipeline_mode = #tpu.pipeline_mode<synchronous>, transform_indices = @transform_5, window_bounds = array<i64: 16, 16>}, {pipeline_mode = #tpu.pipeline_mode<synchronous>, transform_indices = @transform_6, window_bounds = array<i64: 16, 1>}]} {
    %c0 = arith.constant 0 : index
    %c0_0 = arith.constant 0 : index
    %0 = vector.load %arg1[%c0, %c0_0] : memref<16x32xf32, #tpu.memory_space<vmem>>, vector<16x32xf32>
    %1 = arith.truncf %0 : vector<16x32xf32> to vector<16x32xbf16>
    %c0_1 = arith.constant 0 : index
    %c0_2 = arith.constant 0 : index
    %2 = vector.load %arg2[%c0_1, %c0_2] : memref<32x16xbf16, #tpu.memory_space<vmem>>, vector<32x16xbf16>
    %cst = arith.constant dense<0.000000e+00> : vector<16x16xf32>
    %3 = tpu.matmul %1, %2, %cst {dimension_numbers = #tpu.dot_dimension_numbers<[1], [0], [0], [1], [0, 0, 1, 1], [], []>} : vector<16x32xbf16>, vector<32x16xbf16>, vector<16x16xf32> -> vector<16x16xf32>
    %c0_3 = arith.constant 0 : index
    %c0_4 = arith.constant 0 : index
    %4 = vector.load %arg3[%c0_3, %c0_4] : memref<1x16xf32, #tpu.memory_space<vmem>>, vector<1x16xf32>
    %5 = vector.broadcast %4 : vector<1x16xf32> to vector<16x16xf32>
    %6 = arith.addf %3, %5 : vector<16x16xf32>
    %c0_5 = arith.constant 0 : index
    %c0_6 = arith.constant 0 : index
    %7 = vector.load %arg5[%c0_5, %c0_6] : memref<16x16xf32, #tpu.memory_space<vmem>>, vector<16x16xf32>
    tpu.vector_store %arg5[%c0_5, %c0_6], %6 {strides = array<i32>} : memref<16x16xf32, #tpu.memory_space<vmem>>, vector<16x16xf32>,
    %c0_7 = arith.constant 0 : index
    %c0_8 = arith.constant 0 : index
    %8 = vector.load %arg4[%c0_7, %c0_8] : memref<16x16xf32, #tpu.memory_space<vmem>>, vector<16x16xf32>
    %9 = arith.mulf %6, %6 : vector<16x16xf32>
    %cst_9 = arith.constant dense<0.000000e+00> : vector<16xf32>
    %10 = vector.multi_reduction <add>, %9, %cst_9 [1] : vector<16x16xf32> to vector<16xf32>
    %11 = vector.shape_cast %10 : vector<16xf32> to vector<16x1xf32>
    %cst_10 = arith.constant dense<0.000000e+00> : vector<16x16xf32>
    %12 = tpu.matmul %6, %8, %cst_10 {dimension_numbers = #tpu.dot_dimension_numbers<[1], [0], [0], [1], [0, 0, 1, 1], [], []>} : vector<16x16xf32>, vector<16x16xf32>, vector<16x16xf32> -> vector<16x16xf32>
    %cst_11 = arith.constant 2.000000e+00 : f32
    %13 = vector.broadcast %cst_11 : f32 to vector<16x16xf32>
    %14 = arith.mulf %13, %12 : vector<16x16xf32>
    %15 = vector.broadcast %11 : vector<16x1xf32> to vector<16x16xf32>
    %16 = arith.subf %15, %14 : vector<16x16xf32>
    %17 = arith.mulf %8, %8 : vector<16x16xf32>
    %cst_12 = arith.constant dense<0.000000e+00> : vector<16xf32>
    %18 = vector.multi_reduction <add>, %17, %cst_12 [0] : vector<16x16xf32> to vector<16xf32>
    %19 = vector.shape_cast %18 : vector<16xf32> to vector<1x16xf32>
    %20 = vector.broadcast %19 : vector<1x16xf32> to vector<16x16xf32>
    %21 = arith.addf %16, %20 : vector<16x16xf32>
    %22 = tpu.iota {dimensions = array<i32: 1>} : vector<16x16xi32>
    %cst_13 = arith.constant dense<0x7F800000> : vector<16xf32>
    %23 = vector.multi_reduction <minimumf>, %21, %cst_13 [1] : vector<16x16xf32> to vector<16xf32>
    %24 = vector.shape_cast %23 : vector<16xf32> to vector<16x1xf32>
    %25 = vector.broadcast %24 : vector<16x1xf32> to vector<16x16xf32>
    %26 = arith.cmpf oeq, %21, %25 : vector<16x16xf32>
    %27 = arith.sitofp %22 : vector<16x16xi32> to vector<16x16xf32>
    %cst_14 = arith.constant 1.600000e+01 : f32
    %28 = vector.broadcast %cst_14 : f32 to vector<16x16xf32>
    %29 = arith.select %26, %27, %28 : vector<16x16xi1>, vector<16x16xf32>
    %cst_15 = arith.constant dense<0x7F800000> : vector<16xf32>
    %30 = vector.multi_reduction <minimumf>, %29, %cst_15 [1] : vector<16x16xf32> to vector<16xf32>
    %31 = vector.shape_cast %30 : vector<16xf32> to vector<16x1xf32>
    %32 = arith.fptosi %31 : vector<16x1xf32> to vector<16x1xi32>
    %c0_16 = arith.constant 0 : index
    %c0_17 = arith.constant 0 : index
    %33 = vector.load %arg7[%c0_16, %c0_17] : memref<16x1xi32, #tpu.memory_space<vmem>>, vector<16x1xi32>
    tpu.vector_store %arg7[%c0_16, %c0_17], %32 {strides = array<i32>} : memref<16x1xi32, #tpu.memory_space<vmem>>, vector<16x1xi32>,
    %34 = vector.broadcast %32 : vector<16x1xi32> to vector<16x16xi32>
    %35 = arith.cmpi eq, %22, %34 : vector<16x16xi32>
    %36 = arith.extui %35 : vector<16x16xi1> to vector<16x16xi32>
    %37 = arith.sitofp %36 : vector<16x16xi32> to vector<16x16xf32>
    %cst_18 = arith.constant dense<0.000000e+00> : vector<16x16xf32>
    %38 = tpu.matmul %37, %8, %cst_18 {dimension_numbers = #tpu.dot_dimension_numbers<[1], [1], [0], [0], [0, 0, 1, 0], [], []>} : vector<16x16xf32>, vector<16x16xf32>, vector<16x16xf32> -> vector<16x16xf32>
    %c0_19 = arith.constant 0 : index
    %c0_20 = arith.constant 0 : index
    %39 = vector.load %arg6[%c0_19, %c0_20] : memref<16x16xf32, #tpu.memory_space<vmem>>, vector<16x16xf32>
    tpu.vector_store %arg6[%c0_19, %c0_20], %38 {strides = array<i32>} : memref<16x16xf32, #tpu.memory_space<vmem>>, vector<16x16xf32>,
    return
  }
  func.func @transform_0(%arg0: i32) -> (i32, i32) {
    %c0_i32 = arith.constant 0 : i32
    %c0_i32_0 = arith.constant 0 : i32
    %c0_i32_1 = arith.constant 0 : i32
    return %c0_i32, %c0_i32_0 : i32, i32
  }
  func.func @transform_1(%arg0: i32) -> (i32, i32) {
    %c0_i32 = arith.constant 0 : i32
    %c0_i32_0 = arith.constant 0 : i32
    %c0_i32_1 = arith.constant 0 : i32
    return %c0_i32, %c0_i32_0 : i32, i32
  }
  func.func @transform_2(%arg0: i32) -> (i32, i32) {
    %c0_i32 = arith.constant 0 : i32
    %c0_i32_0 = arith.constant 0 : i32
    %c0_i32_1 = arith.constant 0 : i32
    return %c0_i32, %c0_i32_0 : i32, i32
  }
  func.func @transform_3(%arg0: i32) -> (i32, i32) {
    %c0_i32 = arith.constant 0 : i32
    %c0_i32_0 = arith.constant 0 : i32
    %c0_i32_1 = arith.constant 0 : i32
    return %c0_i32, %c0_i32_0 : i32, i32
  }
  func.func @transform_4(%arg0: i32) -> (i32, i32) {
    %c0_i32 = arith.constant 0 : i32
    %c0_i32_0 = arith.constant 0 : i32
    %c0_i32_1 = arith.constant 0 : i32
    return %c0_i32, %c0_i32_0 : i32, i32
  }
  func.func @transform_5(%arg0: i32) -> (i32, i32) {
    %c0_i32 = arith.constant 0 : i32
    %c0_i32_0 = arith.constant 0 : i32
    %c0_i32_1 = arith.constant 0 : i32
    return %c0_i32, %c0_i32_0 : i32, i32
  }
  func.func @transform_6(%arg0: i32) -> (i32, i32) {
    %c0_i32 = arith.constant 0 : i32
    %c0_i32_0 = arith.constant 0 : i32
    %c0_i32_1 = arith.constant 0 : i32
    return %c0_i32, %c0_i32_0 : i32, i32
  }
}

</mosaic_0001>

<bundles_post_ra>
// kernel: _lambda_.7
= control target key start
LH: loop header
LB: loop body
LE: loop exit
PB: predicated region body
PF: predicated region fallthrough
CT: control target
= control target key end

     0   :  { %v387_v0 = vmov 0.0   ;;  %vm388_vm0 = vmmov 0   ;;  %vm47_vm1 = vcmask 261120   ;;  %vm92_vm2 = vcmask 130048   ;;  %s488_s1 = inlined_call_operand.vmem [shape: bf16[32,16], index: 1, kind: input, shape index: {}]   ;;  %s489_s0 = inlined_call_operand.vmem [shape: f32[16,32], index: 0, kind: input, shape index: {}]   ;;  %s490_s3 = inlined_call_operand.vmem [shape: f32[16,16], index: 3, kind: input, shape index: {}]   ;;  %s491_s2 = inlined_call_operand.vmem [shape: f32[1,16], index: 2, kind: input, shape index: {}]   ;;  %s492_s4 = inlined_call_operand.vmem [shape: f32[16,16], index: 4, kind: output, shape index: {0}]   ;;  %s493_s6 = inlined_call_operand.vmem [shape: s32[16,1], index: 6, kind: output, shape index: {2}]   ;;  %s494_s5 = inlined_call_operand.vmem [shape: f32[16,16], index: 5, kind: output, shape index: {1}]  }
   0x1   :  { %357 = vmatprep.subr.bf16.mxu0 %v387_v0  ;;  %v385_v1 = vld [vmem:[%s488_s1 + $0x8] sm:$0xff]   ;;  %361 = vmatprep.mubr.msk.bf16.mxu0 %vm388_vm0, %v387_v0  ;;  %v386_v2 = vld [vmem:[%s488_s1] sm:$0xff]   ;;  %v203_v42 = vlaneseq  ;;  %vm224_vm5 = vcmask 7168  }
   0x2   :  { %358 = vmatpush3.bf16.msra.mxu0 %v385_v1  ;;  %v21_v3 = vld [vmem:[%s489_s0] sm:$0xff]  ;;  %v22_v4 = vld [vmem:[%s489_s0 + $0x8] sm:$0xff] }
   0x3   :  { %359 = vmatprep.subr.bf16.mxu0 %v387_v0  ;;  %v23_v5 = vpack.c.bf16 %v22_v4, %v21_v3  ;;  %v96_v6 = vld [vmem:[%s490_s3 + $0x8] sm:$0xff]  ;;  %v95_v7 = vld [vmem:[%s490_s3] sm:$0xff]  ;;  %v204_v43 = vand.u32 127, %v203_v42 }
   0x4   :  { %365 = vmatprep.subr.mxu1 %v96_v6  ;;  %v334_v8 = vld [vmem:[%s491_s2] ss:$0 sm:$0xff]  ;;  %v191_v19 = vmul.f32 %v96_v6, %v96_v6  ;;  %v190_v20 = vmul.f32 %v95_v7, %v95_v7 }
   0x5   :  { %366 = vmatpush3.msra.mxu1 %v96_v6  ;;  %v213_v44 = vcvt.s32.f32 %v204_v43 }
   0x6   :  { %360 = vmatpush3.bf16.msra.mxu0 %v386_v2  ;;  %367 = vmatprep.subr.mxu1 %v95_v7  ;;  %v192_v21 = vsel %vm92_vm2, %v190_v20, 0.0  ;;  %v193_v22 = vsel %vm92_vm2, %v191_v19, 0.0 }
   0x7   :  { %368 = vmatpush3.msra.mxu1 %v95_v7  ;;  %v194_v23 = vadd.f32 %v193_v22, %v192_v21 }
   0x8   :  { %372 = vmatprep.subr.msk.mxu1 %vm92_vm2, %v96_v6 }
   0x9   :  { %362 = vmatmul.mubr.msk.bf16.vlgmr.msra.gmra.mxu0 %vm47_vm1, %v23_v5  ;;  %v195_v24 = vrot.slane %v194_v23, 4 }
   0xb   :  { %v196_v25 = vadd.f32 %v195_v24, %v194_v23 }
   0xd   :  { %v197_v26 = vrot.slane %v196_v25, 2 }
   0xf   :  { %v198_v27 = vadd.f32 %v197_v26, %v196_v25 }
  0x11   :  { %v199_v31 = vrot.slane %v198_v27, 1 }
  0x13   :  { %v200_v37 = vadd.f32 %v199_v31, %v198_v27 }
  0xc9   :  { %v85_v9 = vpop.f32.mrf.mxu0 }
  0xca   :  { %v86_v10 = vadd.f32 %v334_v8, %v85_v9 }
  0xcb   :  { %v363_v11 = vpop.f32.mrf.mxu0 }
  0xcc   :  { %93 = vst.msk [vmem:[%s492_s4] sm:$0xff] %vm92_vm2, %v86_v10  ;;  %369 = vmatprep.mubr.msk.f32.mxu1 %vm92_vm2, %v86_v10  ;;  %v97_v12 = vmul.f32 %v86_v10, %v86_v10 }
  0xcd   :  { %v88_v13 = vpop.f32.mrf.mxu0 }
  0xce   :  { %v89_v14 = vadd.f32 %v334_v8, %v88_v13  ;;  %v99_v15 = vsel %vm92_vm2, %v97_v12, 0.0 }
  0xcf   :  { %100 = vadd.xlane.f32.xlu0 %v99_v15  ;;  %v364_v16 = vpop.f32.mrf.mxu0 }
  0xd0   :  { %94 = vst.msk [vmem:[%s492_s4 + $0x8] sm:$0xff] %vm92_vm2, %v89_v14  ;;  %370 = vmatmul.mubr.msk.f32.vlgmr.msra.gmra.mxu1 %vm92_vm2, %v89_v14  ;;  %v98_v17 = vmul.f32 %v89_v14, %v89_v14 }
  0xd1   :  { %373 = vmatpush3.xpose.msk.msra.mxu1 %vm92_vm2, %v96_v6 }
  0xd2   :  { %v102_v18 = vsel %vm92_vm2, %v98_v17, 0.0  ;;  %374 = vmatprep.subr.msk.mxu1 %vm92_vm2, %v95_v7 }
  0xd3   :  { %103 = vadd.xlane.f32.xlu0 %v102_v18 }
  0xd5   :  { %375 = vmatpush3.xpose.msk.msra.mxu1 %vm92_vm2, %v95_v7 }
 0x158   :  { %v101_v28 = vpop.xlane.xlu0 %100 }
 0x15c   :  { %v104_v34 = vpop.xlane.xlu0 %103 }
 0x190   :  { %v371_v29 = vpop.f32.mrf.mxu1 }
 0x191   :  { %v187_v30 = vmul.f32 2.0, %v371_v29 }
 0x192   :  { %v177_v32 = vpop.f32.mrf.mxu1 }
 0x193   :  { %v186_v33 = vmul.f32 2.0, %v177_v32  ;;  %v189_v35 = vsub.f32 %v104_v34, %v187_v30 }
 0x195   :  { %v188_v36 = vsub.f32 %v101_v28, %v186_v33  ;;  %v202_v40 = vadd.f32 %v200_v37, %v189_v35 }
 0x197   :  { %v201_v38 = vadd.f32 %v200_v37, %v188_v36  ;;  %v208_v41 = vsel %vm92_vm2, %v202_v40, inf }
 0x199   :  { %v205_v39 = vsel %vm92_vm2, %v201_v38, inf }
 0x19a   :  { %206 = vmin.xlane.f32.xlu1 %v205_v39 }
 0x19e   :  { %209 = vmin.xlane.f32.xlu1 %v208_v41 }
 0x223   :  { %v207_v45 = vpop.xlane.xlu1 %206 }
 0x224   :  { %vm211_vm3 = vcmp.eq.f32.partialorder %v201_v38, %v207_v45 }
 0x225   :  { %v214_v46 = vsel %vm211_vm3, %v213_v44, 16.0 }
 0x226   :  { %v216_v47 = vsel %vm92_vm2, %v214_v46, inf }
 0x227   :  { %217 = vmin.xlane.f32.xlu0 %v216_v47  ;;  %v210_v48 = vpop.xlane.xlu1 %209 }
 0x228   :  { %vm212_vm4 = vcmp.eq.f32.partialorder %v202_v40, %v210_v48 }
 0x229   :  { %v215_v49 = vsel %vm212_vm4, %v213_v44, 16.0 }
 0x22a   :  { %v219_v50 = vsel %vm92_vm2, %v215_v49, inf }
 0x22b   :  { %220 = vmin.xlane.f32.xlu1 %v219_v50 }
 0x2b0   :  { %v218_v51 = vpop.xlane.xlu0 %217 }
 0x2b1   :  { %v379_v52 = vtrunc.f32 %v218_v51 }
 0x2b3   :  { %v380_v53 = vcvt.f32.s32 %v379_v52 }
 0x2b4   :  { %v221_v54 = vpop.xlane.xlu1 %220 }
 0x2b5   :  { %225 = vst.msk [vmem:[%s493_s6] sm:$0xff] %vm224_vm5, %v380_v53  ;;  %vm227_vm6 = vcmp.eq.s32.totalorder %v204_v43, %v380_v53  ;;  %v381_v55 = vtrunc.f32 %v221_v54 }
 0x2b6   :  { %v340_v56 = vsel %vm227_vm6, 1.0, %v387_v0 }
 0x2b7   :  { %v382_v57 = vcvt.f32.s32 %v381_v55  ;;  %376 = vmatprep.mubr.msk.f32.mxu1 %vm92_vm2, %v340_v56 }
 0x2b9   :  { %226 = vst.msk [vmem:[%s493_s6 + $0x8] sm:$0xff] %vm224_vm5, %v382_v57  ;;  %vm228_vm7 = vcmp.eq.s32.totalorder %v204_v43, %v382_v57 }
 0x2ba   :  { %v341_v58 = vsel %vm228_vm7, 1.0, %v387_v0 }
 0x2bb   :  { %377 = vmatmul.mubr.msk.f32.vlgmr.msra.gmra.mxu1 %vm92_vm2, %v341_v58 }
 0x37b   :  { %v378_v59 = vpop.f32.mrf.mxu1 }
 0x37c   :  { %321 = vst.msk [vmem:[%s494_s5 + $0x8] sm:$0xff] %vm92_vm2, %v378_v59 }
 0x37d   :  { %v311_v60 = vpop.f32.mrf.mxu1 }
 0x37e   :  { %320 = vst.msk [vmem:[%s494_s5] sm:$0xff] %vm92_vm2, %v311_v60 }

// kernel: _lambda_.4
= control target key start
LH: loop header
LB: loop body
LE: loop exit
PB: predicated region body
PF: predicated region fallthrough
CT: control target
= control target key end

     0   :  { %s2981_s30 = smov 0   ;;  %s2983_s10 = smov 0   ;;  %s3368_s0 = inlined_call_operand.vmem [shape: f32[2,16,32], index: 0, kind: input, shape index: {}]   ;;  %s3369_s1 = inlined_call_operand.vmem [shape: f32[2,1,32], index: 1, kind: input, shape index: {}]   ;;  %s3370_s2 = inlined_call_operand.vmem [shape: bf16[2,4,32,8], index: 2, kind: input, shape index: {}]   ;;  %s3371_s3 = inlined_call_operand.vmem [shape: bf16[2,4,32,8], index: 3, kind: input, shape index: {}]   ;;  %s3372_s4 = inlined_call_operand.vmem [shape: bf16[2,4,32,8], index: 4, kind: input, shape index: {}]   ;;  %s3373_s5 = inlined_call_operand.vmem [shape: bf16[2,4,8,32], index: 5, kind: input, shape index: {}]   ;;  %s3374_s6 = inlined_call_operand.vmem [shape: f32[2,1,32], index: 6, kind: input, shape index: {}]   ;;  %s3375_s7 = inlined_call_operand.vmem [shape: bf16[2,32,128], index: 7, kind: input, shape index: {}]   ;;  %s3376_s8 = inlined_call_operand.vmem [shape: bf16[2,128,32], index: 8, kind: input, shape index: {}]   ;;  %s3377_s9 = inlined_call_operand.vmem [shape: f32[2,16,32], index: 9, kind: output, shape index: {}]  }
   0x1   :  { %3379 = sst [smem:[#allocation6_spill]] %s3368_s0  ;;  %s2985_s11 = smov 0  }
   0x2   :  { %3380 = sst [smem:[#allocation7_spill]] %s3370_s2  ;;  %s2987_s12 = smov 0  }
   0x3   :  { %3381 = sst [smem:[#allocation8_spill]] %s3371_s3  ;;  %s2989_s13 = smov 0  }
   0x4   :  { %3382 = sst [smem:[#allocation9_spill]] %s3372_s4 }
   0x5 LB: > { %3383 = sst [smem:[#allocation3_spill]] %s2922_s12  ;;  %s28_s14 = sadd.s32 1, %s2918_s11  ;;  %s2926_s13 = sphi %s2989_s13, %s19_s13   ;;  %s2922_s12 = sphi %s2987_s12, %s3393_s12   ;;  %s2918_s11 = sphi %s2985_s11, %s3395_s11   ;;  %s2914_s10 = sphi %s2983_s10, %s3391_s10   ;;  %s2910_s30 = sphi %s2981_s30, %s3394_s30  }
   0x6   : > { %s31_s15 = sadd.s32 1, %s2922_s12  ;;  %p29_p0 = scmp.ge.s32.totalorder %s28_s14, 2 }
   0x7   : > { %p2364_p1 = scmp.ge.s32.totalorder %s2926_s13, 1  ;;  %p375_p2 = scmp.lt.s32.totalorder %s2926_s13, 5 }
   0x8   : > { %s3397_s14 = smov (%p29_p0, %s28_s14), 0  ;;  %s3399_s15 = smov (!%p29_p0, %s31_s15), %s2922_s12 }
   0x9   : > { %3384 = sst [smem:[#allocation4_spill]] %s3397_s14  ;;  %p376_p3 = pnand %p2364_p1, %p375_p2 }
   0xa   : > { %p33_p4 = scmp.ge.s32.totalorder %s3399_s15, 2  ;;  %p447_p5 = scmp.lt.s32.totalorder (!%p376_p3), %s2914_s10, 1 }
   0xb   : > { %379 = sbr.rel (%p376_p3) target bundleno = 4814 (0x12ce), region = 56  ;;  %p452_p6 = scmp.lt.s32.totalorder (!%p376_p3), %s2910_s30, 1 }
   0xc   : > { %s3401_s15 = smov (%p33_p4, %s3399_s15), 0  ;;  %s3386_s0 = sld [smem:[#allocation6_spill]] (!%p376_p3) }
   0xd   : > { %3385 = sst [smem:[#allocation5_spill]] %s3401_s15  ;;  %p2381_p7 = scmp.ne.s32.totalorder (!%p376_p3), %s2910_s30, 0 }
   0xe   : > { %s3387_s2 = sld [smem:[#allocation7_spill]] (!%p376_p3) }
   0xf   : > { %s3388_s3 = sld [smem:[#allocation8_spill]] (!%p376_p3) }
  0x10   : > { %s3403_s10 = smov (!%p447_p5, %s2914_s10), 1  ;;  %s3389_s4 = sld [smem:[#allocation9_spill]] }
  0x11   : > { %s3015_s16 = scalar_select %p452_p6, %s2910_s30, 1 }
  0x12   : > { %s2485_s17 = sshll.u32 %s3403_s10, 4 }
  0x13   : > { %s451_s20 = scalar_lea.vmem %s3386_s0, %s2485_s17  ;;  %s2486_s24 = sshll.u32 %s3015_s16, 6 }
  0x14   : > { %s2489_s25 = sshll.u32 %s3015_s16, 4  ;;  %s3029_s28 = scalar_lea.vmem %s3387_s2, %s2486_s24 }
  0x15   : > { %s3034_s14 = scalar_lea.vmem %s3388_s3, %s2486_s24  ;;  %s3044_s22 = scalar_lea.vmem %s3373_s5, %s2489_s25 }
  0x16   : > { %s3039_s18 = scalar_lea.vmem %s3389_s4, %s2486_s24  ;;  %s477_s26 = scalar_lea.vmem %s3374_s6, %s3015_s16 }
  0x17   : > { %s3053_s15 = scalar_lea.vmem %s3375_s7, %s2489_s25  ;;  %s3058_s12 = scalar_lea.vmem %s3376_s8, %s2486_s24 }
  0x18   : > { %s3063_s19 = scalar_lea.vmem %s3377_s9, %s2485_s17  ;;  %497 = sbr.rel (%p2381_p7) target bundleno = 31 (0x1f), region = 60 }
  0x1d   : > { %v498_v0 = vld [vmem:[%s451_s20] sm:$0xff]  ;;  %vm500_vm0 = vcmask 261120   ;;  %v499_v1 = vld [vmem:[%s451_s20 + $0x8] sm:$0xff] }
  0x1e   : > { %501 = vst.msk [vmem:[#allocation2] sm:$0xff] %vm500_vm0, %v498_v0  ;;  %502 = vst.msk [vmem:[#allocation2 + $0x8] sm:$0xff] %vm500_vm0, %v499_v1 }
  0x1f PF: > { %vm506_vm1 = vcmask 261120   ;;  %v2804_v16 = vld [vmem:[%s3029_s28 + $0x8] sm:$0xff]   ;;  %v2928_v17 = vmov 0.0   ;;  %v2805_v18 = vld [vmem:[%s3029_s28] sm:$0xff]   ;;  %vm2929_vm2 = vmmov 0   ;;  %s3390_s3 = scalar_lea.vmem %s3369_s1, %s3015_s16  ;;  %vm726_vm3 = vcmask 64512  }
  0x20   : > { %2565 = vmatprep.subr.bf16.mxu0 %v2928_v17  ;;  %2589 = vmatprep.subr.bf16.mxu1 %v2928_v17  ;;  %v2382_v28 = vld [vmem:[%s3390_s3] ss:$0 sm:$0xff]  ;;  %v2806_v32 = vld [vmem:[%s3034_s14 + $0x8] sm:$0xff]   ;;  %v2810_v50 = vld [vmem:[%s3029_s28 + $0x18] sm:$0xff]   ;;  %v543_v57 = vlaneseq  ;;  %vm778_vm5 = vcmask 130048   ;;  %vm1150_vm7 = vcmask 1043456  }
  0x21   : > { %2566 = vmatpush3.bf16.msra.mxu0 %v2804_v16  ;;  %2569 = vmatprep.mubr.msk.bf16.mxu0 %vm2929_vm2, %v2928_v17  ;;  %v2807_v34 = vld [vmem:[%s3034_s14] sm:$0xff]   ;;  %v2808_v35 = vld [vmem:[%s3039_s18 + $0x8] sm:$0xff]   ;;  %v2811_v54 = vld [vmem:[%s3029_s28 + $0x10] sm:$0xff]   ;;  %p2482_p8 = scmp.ne.s32.totalorder %s2910_s30, 1 }
  0x22   : > { %2567 = vmatprep.subr.bf16.mxu0 %v2928_v17  ;;  %2591 = vmatprep.mubr.msk.bf16.mxu1 %vm2929_vm2, %v2928_v17  ;;  %v2809_v36 = vld [vmem:[%s3039_s18] sm:$0xff]   ;;  %v2812_v55 = vld [vmem:[%s3039_s18 + $0x18] sm:$0xff]   ;;  %v2813_v56 = vld [vmem:[%s3039_s18 + $0x10] sm:$0xff]   ;;  %v3129_v58 = vshrl.u32 %v543_v57, 7  ;;  %v3131_v59 = vand.u32 127, %v543_v57 }
  0x24   : > { %vm548_vm4 = vcmp.le.s32.totalorder %v3131_v59, %v3129_v58  ;;  %v3136_v61 = vadd.s32 8, %v3129_v58 }
  0x25   : > { %v503_v2 = vld [vmem:[#allocation2] sm:$0xff]  ;;  %v504_v3 = vld [vmem:[#allocation2 + $0x8] sm:$0xff]  ;;  %2568 = vmatpush3.bf16.msra.mxu0 %v2805_v18 }
  0x26   : > { %v507_v4 = vsel %vm506_vm1, %v503_v2, 0.0  ;;  %v510_v5 = vsel %vm506_vm1, %v504_v3, 0.0  ;;  %2573 = vmatprep.subr.bf16.mxu0 %v2928_v17  ;;  %vm549_vm6 = vcmp.le.s32.totalorder %v3131_v59, %v3136_v61 }
  0x27   : > { %508 = vadd.xlane.f32.xlu0 %v507_v4 }
  0x2b   : > { %511 = vadd.xlane.f32.xlu0 %v510_v5 }
  0xb0   : > { %v509_v6 = vpop.xlane.xlu0 %508 }
  0xb1   : > { %v514_v7 = vmul.f32 0.03125, %v509_v6 }
  0xb3   : > { %v516_v8 = vsub.f32 %v503_v2, %v514_v7 }
  0xb4   : > { %v512_v9 = vpop.xlane.xlu0 %511 }
  0xb5   : > { %v515_v10 = vmul.f32 0.03125, %v512_v9  ;;  %v518_v11 = vmul.f32 %v516_v8, %v516_v8 }
  0xb7   : > { %v517_v12 = vsub.f32 %v504_v3, %v515_v10  ;;  %v520_v13 = vsel %vm506_vm1, %v518_v11, 0.0 }
  0xb8   : > { %521 = vadd.xlane.f32.xlu1 %v520_v13 }
  0xb9   : > { %v519_v14 = vmul.f32 %v517_v12, %v517_v12 }
  0xbb   : > { %v523_v15 = vsel %vm506_vm1, %v519_v14, 0.0 }
  0xbc   : > { %524 = vadd.xlane.f32.xlu1 %v523_v15 }
 0x141   : > { %v522_v19 = vpop.xlane.xlu1 %521 }
 0x142   : > { %v526_v20 = vmul.f32 0.03125, %v522_v19 }
 0x144   : > { %v528_v21 = vadd.f32 1e-05, %v526_v20 }
 0x145   : > { %v525_v22 = vpop.xlane.xlu1 %524 }
 0x146   : > { %2838 = vrsqrt.f32 %v528_v21  ;;  %v527_v23 = vmul.f32 0.03125, %v525_v22 }
 0x148   : > { %v529_v24 = vadd.f32 1e-05, %v527_v23 }
 0x14a   : > { %2840 = vrsqrt.f32 %v529_v24 }
 0x153   : > { %v2839_v25 = vpop.eup %2838 }
 0x154   : > { %v532_v26 = vmul.f32 %v2839_v25, %v516_v8 }
 0x156   : > { %v540_v30 = vmul.f32 %v2382_v28, %v532_v26 }
 0x157   : > { %v2841_v27 = vpop.eup %2840 }
 0x158   : > { %v533_v29 = vmul.f32 %v2841_v27, %v517_v12 }
 0x15a   : > { %v541_v31 = vmul.f32 %v2382_v28, %v533_v29 }
 0x15c   : > { %v3086_v33 = vpack.c.bf16 %v541_v31, %v540_v30 }
 0x15e   : > { %2570 = vmatmul.mubr.msk.bf16.vlgmr.msra.gmra.mxu0 %vm506_vm1, %v3086_v33 }
 0x15f   : > { %2574 = vmatpush3.bf16.msra.mxu0 %v2806_v32  ;;  %2577 = vmatprep.mubr.msk.bf16.mxu0 %vm2929_vm2, %v2928_v17 }
 0x160   : > { %2575 = vmatprep.subr.bf16.mxu0 %v2928_v17 }
 0x163   : > { %2576 = vmatpush3.bf16.msra.mxu0 %v2807_v34 }
 0x164   : > { %2581 = vmatprep.subr.bf16.mxu0 %v2928_v17 }
 0x166   : > { %2578 = vmatmul.mubr.msk.bf16.vlgmr.msra.gmra.mxu0 %vm506_vm1, %v3086_v33 }
 0x167   : > { %2582 = vmatpush3.bf16.msra.mxu0 %v2808_v35  ;;  %2585 = vmatprep.mubr.msk.bf16.mxu0 %vm2929_vm2, %v2928_v17  ;;  %v2814_v35 = vld [vmem:[%s3034_s14 + $0x18] sm:$0xff]  }
 0x168   : > { %2583 = vmatprep.subr.bf16.mxu0 %v2928_v17 }
 0x16b   : > { %2584 = vmatpush3.bf16.msra.mxu0 %v2809_v36 }
 0x16c   : > { %2595 = vmatprep.subr.bf16.mxu0 %v2928_v17 }
 0x16e   : > { %2586 = vmatmul.mubr.msk.bf16.vlgmr.msra.gmra.mxu0 %vm506_vm1, %v3086_v33 }
 0x16f   : > { %2597 = vmatprep.mubr.msk.bf16.mxu0 %vm2929_vm2, %v2928_v17 }
 0x21e   : > { %v603_v37 = vpop.f32.mrf.mxu0 }
 0x220   : > { %v2571_v38 = vpop.f32.mrf.mxu0 }
 0x222   : > { %v606_v39 = vpop.f32.mrf.mxu0 }
 0x223   : > { %v724_v51 = vpack.c.bf16 %v606_v39, %v603_v37  ;;  %v2815_v37 = vld [vmem:[%s3034_s14 + $0x10] sm:$0xff]  }
 0x224   : > { %v2572_v40 = vpop.f32.mrf.mxu0 }
 0x226   : > { %v660_v41 = vpop.f32.mrf.mxu0 }
 0x228   : > { %v2579_v42 = vpop.f32.mrf.mxu0 }
 0x22a   : > { %v663_v43 = vpop.f32.mrf.mxu0 }
 0x22b   : > { %v725_v44 = vpack.c.bf16 %v663_v43, %v660_v41 }
 0x22c   : > { %v2580_v45 = vpop.f32.mrf.mxu0 }
 0x22d   : > { %v731_v46 = vsel %vm726_vm3, %v725_v44, 0 }
 0x22e   : > { %v717_v47 = vpop.f32.mrf.mxu0  ;;  %2590 = vmatpush3.bf16.xpose.msra.mxu1 %v731_v46 }
 0x22f   : > { %2601 = vmatprep.subr.bf16.mxu1 %v2928_v17 }
 0x230   : > { %v2587_v48 = vpop.f32.mrf.mxu0 }
 0x232   : > { %v720_v49 = vpop.f32.mrf.mxu0 }
 0x233   : > { %v802_v52 = vpack.c.bf16 %v720_v49, %v717_v47 }
 0x234   : > { %v2588_v53 = vpop.f32.mrf.mxu0 }
 0x235   : > { %2592 = vmatmul.mubr.msk.bf16.vlgmr.msra.gmra.mxu1 %vm726_vm3, %v724_v51  ;;  %2596 = vmatpush3.bf16.msra.mxu0 %v802_v52 }
 0x236   : > { %2602 = vmatpush3.bf16.msra.mxu1 %v2810_v50  ;;  %2605 = vmatprep.mubr.msk.bf16.mxu1 %vm2929_vm2, %v2928_v17 }
 0x237   : > { %2603 = vmatprep.subr.bf16.mxu1 %v2928_v17  ;;  %2609 = vmatprep.subr.bf16.mxu0 %v2928_v17 }
 0x23a   : > { %2604 = vmatpush3.bf16.msra.mxu1 %v2811_v54 }
 0x23b   : > { %2617 = vmatprep.subr.bf16.mxu1 %v2928_v17 }
 0x23d   : > { %2606 = vmatmul.mubr.msk.bf16.vlgmr.msra.gmra.mxu1 %vm506_vm1, %v3086_v33 }
 0x23e   : > { %2618 = vmatpush3.bf16.msra.mxu1 %v2812_v55  ;;  %2621 = vmatprep.mubr.msk.bf16.mxu1 %vm2929_vm2, %v2928_v17 }
 0x23f   : > { %2619 = vmatprep.subr.bf16.mxu1 %v2928_v17 }
 0x242   : > { %2620 = vmatpush3.bf16.msra.mxu1 %v2813_v56 }
 0x243   : > { %2631 = vmatprep.subr.bf16.mxu1 %v2928_v17 }
 0x245   : > { %2622 = vmatmul.mubr.msk.bf16.vlgmr.msra.gmra.mxu1 %vm506_vm1, %v3086_v33 }
 0x246   : > { %2633 = vmatprep.mubr.msk.bf16.mxu1 %vm2929_vm2, %v2928_v17 }
 0x2f5   : > { %v767_v60 = vpop.f32.mrf.mxu1 }
 0x2f6   : > { %v774_v62 = vmul.f32 0.35355338, %v767_v60 }
 0x2f7   : > { %v2593_v63 = vpop.f32.mrf.mxu1 }
 0x2f8   : > { %v776_v0 = vsel %vm548_vm4, %v774_v62, -1e+30 }
 0x2f9   : > { %v770_v1 = vpop.f32.mrf.mxu1  ;;  %v779_v2 = vsel %vm778_vm5, %v776_v0, -inf }
 0x2fa   : > { %v775_v3 = vmul.f32 0.35355338, %v770_v1  ;;  %780 = vmax.xlane.f32.xlu0 %v779_v2 }
 0x2fb   : > { %v2594_v4 = vpop.f32.mrf.mxu1 }
 0x2fc   : > { %v777_v5 = vsel %vm549_vm6, %v775_v3, -1e+30 }
 0x2fd   : > { %v900_v6 = vpop.f32.mrf.mxu1  ;;  %v782_v7 = vsel %vm778_vm5, %v777_v5, -inf }
 0x2fe   : > { %783 = vmax.xlane.f32.xlu1 %v782_v7 }
 0x2ff   : > { %v2607_v8 = vpop.f32.mrf.mxu1 }
 0x301   : > { %v903_v9 = vpop.f32.mrf.mxu1 }
 0x302   : > { %v1023_v10 = vpack.c.bf16 %v903_v9, %v900_v6 }
 0x303   : > { %v2608_v11 = vpop.f32.mrf.mxu1 }
 0x305   : > { %v1016_v12 = vpop.f32.mrf.mxu1 }
 0x307   : > { %v2623_v13 = vpop.f32.mrf.mxu1 }
 0x309   : > { %v1019_v14 = vpop.f32.mrf.mxu1 }
 0x30a   : > { %v1099_v15 = vpack.c.bf16 %v1019_v14, %v1016_v12  ;;  %v848_v12 = vld [vmem:[%s3044_s22] sm:$0xf] }
 0x30b   : > { %v2624_v16 = vpop.f32.mrf.mxu1 }
 0x30c   : > { %2632 = vmatpush3.bf16.msra.mxu1 %v1099_v15  ;;  %v1199_v16 = vsel %vm1150_vm7, %v848_v12, 0 }
 0x30d   : > { %2643 = vmatprep.subr.bf16.mxu1 %v2928_v17 }
 0x383   : > { %v781_v18 = vpop.xlane.xlu0 %780 }
 0x384   : > { %v785_v19 = vsub.f32 %v776_v0, %v781_v18  ;;  %v2816_v18 = vld [vmem:[%s3034_s14 + $0x28] sm:$0xff]  }
 0x386   : > { %v787_v20 = vmul.f32 1.442695, %v785_v19  ;;  %v2817_v19 = vld [vmem:[%s3034_s14 + $0x20] sm:$0xff]  }
 0x387   : > { %v784_v21 = vpop.xlane.xlu1 %783 }
 0x388   : > { %2842 = vpow2.f32 %v787_v20  ;;  %v786_v22 = vsub.f32 %v777_v5, %v784_v21  ;;  %v2417_v20 = vld [vmem:[%s3044_s22 + $0x4] sm:$0xf] }
 0x389   : > { %v1152_v21 = vsel %vm1150_vm7, %v2417_v20, 0 }
 0x38a   : > { %v789_v23 = vmul.f32 1.442695, %v786_v22 }
 0x38c   : > { %2844 = vpow2.f32 %v789_v23 }
 0x395   : > { %v2843_v24 = vpop.eup %2842 }
 0x396   : > { %v791_v25 = vsel %vm778_vm5, %v2843_v24, 0.0 }
 0x397   : > { %792 = vadd.xlane.f32.xlu0 %v791_v25  ;;  %v2818_v25 = vld [vmem:[%s3029_s28 + $0x28] sm:$0xff]  }
 0x399   : > { %v2845_v26 = vpop.eup %2844 }
 0x39a   : > { %v794_v27 = vsel %vm778_vm5, %v2845_v26, 0.0 }
 0x39b   : > { %795 = vadd.xlane.f32.xlu1 %v794_v27 }
 0x420   : > { %v793_v28 = vpop.xlane.xlu0 %792 }
 0x421   : > { %2846 = vrcp.f32 %v793_v28 }
 0x424   : > { %v796_v29 = vpop.xlane.xlu1 %795 }
 0x425   : > { %2848 = vrcp.f32 %v796_v29  ;;  %v2819_v29 = vld [vmem:[%s3029_s28 + $0x20] sm:$0xff]  }
 0x42e   : > { %v2847_v30 = vpop.eup %2846 }
 0x42f   : > { %v799_v32 = vmul.f32 %v2847_v30, %v2843_v24 }
 0x432   : > { %v2849_v31 = vpop.eup %2848 }
 0x433   : > { %v800_v34 = vmul.f32 %v2849_v31, %v2845_v26 }
 0x435   : > { %v801_v36 = vpack.c.bf16 %v800_v34, %v799_v32  ;;  %v2820_v32 = vld [vmem:[%s3039_s18 + $0x28] sm:$0xff]  }
 0x437   : > { %2598 = vmatmul.mubr.msk.bf16.vlgmr.msra.gmra.mxu0 %vm778_vm5, %v801_v36  ;;  %v2821_v36 = vld [vmem:[%s3039_s18 + $0x20] sm:$0xff]  }
 0x438   : > { %2610 = vmatpush3.bf16.msra.mxu0 %v2814_v35  ;;  %2613 = vmatprep.mubr.msk.bf16.mxu0 %vm2929_vm2, %v2928_v17 }
 0x439   : > { %2611 = vmatprep.subr.bf16.mxu0 %v2928_v17 }
 0x43c   : > { %2612 = vmatpush3.bf16.msra.mxu0 %v2815_v37 }
 0x43d   : > { %2625 = vmatprep.subr.bf16.mxu0 %v2928_v17 }
 0x43f   : > { %2614 = vmatmul.mubr.msk.bf16.vlgmr.msra.gmra.mxu0 %vm506_vm1, %v3086_v33 }
 0x440   : > { %2627 = vmatprep.mubr.msk.bf16.mxu0 %vm2929_vm2, %v2928_v17 }
 0x4f7   : > { %v840_v38 = vpop.f32.mrf.mxu0 }
 0x4f9   : > { %v2599_v39 = vpop.f32.mrf.mxu0 }
 0x4fb   : > { %v843_v40 = vpop.f32.mrf.mxu0 }
 0x4fc   : > { %v847_v41 = vpack.c.bf16 %v843_v40, %v840_v38 }
 0x4fd   : > { %v2600_v42 = vpop.f32.mrf.mxu0 }
 0x4ff   : > { %v958_v43 = vpop.f32.mrf.mxu0 }
 0x501   : > { %v2615_v44 = vpop.f32.mrf.mxu0 }
 0x503   : > { %v961_v45 = vpop.f32.mrf.mxu0 }
 0x504   : > { %v1024_v46 = vpack.c.bf16 %v961_v45, %v958_v43 }
 0x505   : > { %v2616_v47 = vpop.f32.mrf.mxu0 }
 0x506   : > { %v1029_v48 = vsel %vm726_vm3, %v1024_v46, 0 }
 0x507   : > { %2626 = vmatpush3.bf16.xpose.msra.mxu0 %v1029_v48 }
 0x508   : > { %2637 = vmatprep.subr.bf16.mxu0 %v2928_v17 }
 0x50e   : > { %2628 = vmatmul.mubr.msk.bf16.vlgmr.msra.gmra.mxu0 %vm726_vm3, %v1023_v10 }
 0x50f   : > { %2639 = vmatprep.mubr.msk.bf16.mxu0 %vm2929_vm2, %v2928_v17  ;;  %2638 = vmatpush3.bf16.msra.mxu0 %v1152_v21 }
 0x510   : > { %2649 = vmatprep.subr.bf16.mxu0 %v2928_v17 }
 0x5ce   : > { %v1065_v49 = vpop.f32.mrf.mxu0 }
 0x5cf   : > { %v1072_v50 = vmul.f32 0.35355338, %v1065_v49 }
 0x5d0   : > { %v2629_v51 = vpop.f32.mrf.mxu0 }
 0x5d1   : > { %v1074_v52 = vsel %vm548_vm4, %v1072_v50, -1e+30 }
 0x5d2   : > { %v1068_v53 = vpop.f32.mrf.mxu0  ;;  %v1076_v54 = vsel %vm778_vm5, %v1074_v52, -inf }
 0x5d3   : > { %v1073_v55 = vmul.f32 0.35355338, %v1068_v53  ;;  %1077 = vmax.xlane.f32.xlu0 %v1076_v54 }
 0x5d4   : > { %v2630_v56 = vpop.f32.mrf.mxu0 }
 0x5d5   : > { %v1075_v57 = vsel %vm549_vm6, %v1073_v55, -1e+30 }
 0x5d6   : > { %v1079_v60 = vsel %vm778_vm5, %v1075_v57, -inf }
 0x5d7   : > { %1080 = vmax.xlane.f32.xlu1 %v1079_v60 }
 0x65c   : > { %v1078_v62 = vpop.xlane.xlu0 %1077 }
 0x65d   : > { %v1082_v63 = vsub.f32 %v1074_v52, %v1078_v62 }
 0x65f   : > { %v1084_v0 = vmul.f32 1.442695, %v1082_v63 }
 0x660   : > { %v1081_v1 = vpop.xlane.xlu1 %1080 }
 0x661   : > { %2850 = vpow2.f32 %v1084_v0  ;;  %v1083_v2 = vsub.f32 %v1075_v57, %v1081_v1 }
 0x663   : > { %v1086_v3 = vmul.f32 1.442695, %v1083_v2 }
 0x665   : > { %2852 = vpow2.f32 %v1086_v3 }
 0x66e   : > { %v2851_v4 = vpop.eup %2850 }
 0x66f   : > { %v1088_v5 = vsel %vm778_vm5, %v2851_v4, 0.0 }
 0x670   : > { %1089 = vadd.xlane.f32.xlu0 %v1088_v5 }
 0x672   : > { %v2853_v6 = vpop.eup %2852 }
 0x673   : > { %v1091_v7 = vsel %vm778_vm5, %v2853_v6, 0.0 }
 0x674   : > { %1092 = vadd.xlane.f32.xlu1 %v1091_v7 }
 0x6f9   : > { %v1090_v8 = vpop.xlane.xlu0 %1089 }
 0x6fa   : > { %2854 = vrcp.f32 %v1090_v8 }
 0x6fd   : > { %v1093_v9 = vpop.xlane.xlu1 %1092 }
 0x6fe   : > { %2856 = vrcp.f32 %v1093_v9 }
 0x707   : > { %v2855_v10 = vpop.eup %2854 }
 0x708   : > { %v1096_v13 = vmul.f32 %v2855_v10, %v2851_v4 }
 0x70b   : > { %v2857_v11 = vpop.eup %2856 }
 0x70c   : > { %v1097_v14 = vmul.f32 %v2857_v11, %v2853_v6 }
 0x70e   : > { %v1098_v15 = vpack.c.bf16 %v1097_v14, %v1096_v13 }
 0x710   : > { %2634 = vmatmul.mubr.msk.bf16.vlgmr.msra.gmra.mxu1 %vm778_vm5, %v1098_v15 }
 0x711   : > { %2644 = vmatpush3.bf16.msra.mxu1 %v1199_v16  ;;  %2645 = vmatprep.mubr.msk.bf16.mxu1 %vm2929_vm2, %v2928_v17 }
 0x712   : > { %2657 = vmatprep.subr.bf16.mxu1 %v2928_v17 }
 0x718   : > { %2646 = vmatmul.mubr.msk.bf16.vlgmr.msra.gmra.mxu1 %vm726_vm3, %v847_v41 }
 0x719   : > { %2658 = vmatpush3.bf16.msra.mxu1 %v2816_v18  ;;  %2661 = vmatprep.mubr.msk.bf16.mxu1 %vm2929_vm2, %v2928_v17 }
 0x71a   : > { %2659 = vmatprep.subr.bf16.mxu1 %v2928_v17 }
 0x71d   : > { %2660 = vmatpush3.bf16.msra.mxu1 %v2817_v19 }
 0x71e   : > { %2673 = vmatprep.subr.bf16.mxu1 %v2928_v17 }
 0x720   : > { %2662 = vmatmul.mubr.msk.bf16.vlgmr.msra.gmra.mxu1 %vm506_vm1, %v3086_v33 }
 0x721   : > { %2675 = vmatprep.mubr.msk.bf16.mxu1 %vm2929_vm2, %v2928_v17 }
 0x7d0   : > { %v1137_v22 = vpop.f32.mrf.mxu1 }
 0x7d2   : > { %v2635_v23 = vpop.f32.mrf.mxu1 }
 0x7d4   : > { %v1140_v24 = vpop.f32.mrf.mxu1 }
 0x7d5   : > { %v1144_v26 = vpack.c.bf16 %v1140_v24, %v1137_v22  ;;  %v2822_v22 = vld [vmem:[%s3029_s28 + $0x38] sm:$0xff]   ;;  %v2823_v24 = vld [vmem:[%s3029_s28 + $0x30] sm:$0xff]  }
 0x7d6   : > { %v2636_v27 = vpop.f32.mrf.mxu1 }
 0x7d7   : > { %2640 = vmatmul.mubr.msk.bf16.vlgmr.msra.gmra.mxu0 %vm726_vm3, %v1144_v26  ;;  %v2825_v26 = vld [vmem:[%s3039_s18 + $0x30] sm:$0xff]   ;;  %v2443_v27 = vld [vmem:[%s3044_s22 + $0x8] sm:$0xf] }
 0x7d8   : > { %v3199_v28 = vpop.f32.mrf.mxu1  ;;  %2650 = vmatpush3.bf16.msra.mxu0 %v2818_v25  ;;  %2653 = vmatprep.mubr.msk.bf16.mxu0 %vm2929_vm2, %v2928_v17  ;;  %v2824_v25 = vld [vmem:[%s3039_s18 + $0x38] sm:$0xff]  }
 0x7d9   : > { %2651 = vmatprep.subr.bf16.mxu0 %v2928_v17 }
 0x7da   : > { %v2647_v30 = vpop.f32.mrf.mxu1 }
 0x7dc   : > { %v3205_v31 = vpop.f32.mrf.mxu1  ;;  %2652 = vmatpush3.bf16.msra.mxu0 %v2819_v29  ;;  %v1544_v29 = vsel %vm1150_vm7, %v2443_v27, 0 }
 0x7dd   : > { %2665 = vmatprep.subr.bf16.mxu0 %v2928_v17 }
 0x7de   : > { %v2648_v34 = vpop.f32.mrf.mxu1 }
 0x7df   : > { %2654 = vmatmul.mubr.msk.bf16.vlgmr.msra.gmra.mxu0 %vm506_vm1, %v3086_v33 }
 0x7e0   : > { %v1351_v35 = vpop.f32.mrf.mxu1  ;;  %2666 = vmatpush3.bf16.msra.mxu0 %v2820_v32  ;;  %2669 = vmatprep.mubr.msk.bf16.mxu0 %vm2929_vm2, %v2928_v17 }
 0x7e1   : > { %2667 = vmatprep.subr.bf16.mxu0 %v2928_v17 }
 0x7e2   : > { %v2663_v37 = vpop.f32.mrf.mxu1 }
 0x7e4   : > { %v1354_v38 = vpop.f32.mrf.mxu1  ;;  %2668 = vmatpush3.bf16.msra.mxu0 %v2821_v36 }
 0x7e5   : > { %v1417_v39 = vpack.c.bf16 %v1354_v38, %v1351_v35  ;;  %2679 = vmatprep.subr.bf16.mxu0 %v2928_v17  ;;  %v2826_v35 = vld [vmem:[%s3034_s14 + $0x38] sm:$0xff]  }
 0x7e6   : > { %v2664_v40 = vpop.f32.mrf.mxu1 }
 0x7e7   : > { %v1422_v41 = vsel %vm726_vm3, %v1417_v39, 0  ;;  %2670 = vmatmul.mubr.msk.bf16.vlgmr.msra.gmra.mxu0 %vm506_vm1, %v3086_v33  ;;  %v2827_v39 = vld [vmem:[%s3034_s14 + $0x30] sm:$0xff]  }
 0x7e8   : > { %2674 = vmatpush3.bf16.xpose.msra.mxu1 %v1422_v41  ;;  %2681 = vmatprep.mubr.msk.bf16.mxu0 %vm2929_vm2, %v2928_v17 }
 0x7e9   : > { %2685 = vmatprep.subr.bf16.mxu1 %v2928_v17 }
 0x897   : > { %v3222_v42 = vpop.f32.mrf.mxu0 }
 0x899   : > { %v2641_v43 = vpop.f32.mrf.mxu0 }
 0x89b   : > { %v3224_v44 = vpop.f32.mrf.mxu0 }
 0x89d   : > { %v2642_v45 = vpop.f32.mrf.mxu0 }
 0x89f   : > { %v1293_v46 = vpop.f32.mrf.mxu0 }
 0x8a1   : > { %v2655_v47 = vpop.f32.mrf.mxu0 }
 0x8a3   : > { %v1296_v48 = vpop.f32.mrf.mxu0 }
 0x8a4   : > { %v1416_v49 = vpack.c.bf16 %v1296_v48, %v1293_v46 }
 0x8a5   : > { %v2656_v50 = vpop.f32.mrf.mxu0 }
 0x8a6   : > { %2676 = vmatmul.mubr.msk.bf16.vlgmr.msra.gmra.mxu1 %vm726_vm3, %v1416_v49 }
 0x8a7   : > { %v1409_v51 = vpop.f32.mrf.mxu0  ;;  %2687 = vmatprep.mubr.msk.bf16.mxu1 %vm2929_vm2, %v2928_v17  ;;  %2686 = vmatpush3.bf16.msra.mxu1 %v1544_v29 }
 0x8a8   : > { %2699 = vmatprep.subr.bf16.mxu1 %v2928_v17 }
 0x8a9   : > { %v2671_v52 = vpop.f32.mrf.mxu0 }
 0x8ab   : > { %v1412_v53 = vpop.f32.mrf.mxu0 }
 0x8ac   : > { %v1492_v54 = vpack.c.bf16 %v1412_v53, %v1409_v51  ;;  %v1236_v51 = vadd.f32 %v3199_v28, %v3222_v42 }
 0x8ad   : > { %v2672_v55 = vpop.f32.mrf.mxu0 }
 0x8ae   : > { %2680 = vmatpush3.bf16.msra.mxu0 %v1492_v54 }
 0x8af   : > { %2691 = vmatprep.subr.bf16.mxu0 %v2928_v17 }
 0x966   : > { %v1458_v56 = vpop.f32.mrf.mxu1 }
 0x967   : > { %v1465_v57 = vmul.f32 0.35355338, %v1458_v56 }
 0x968   : > { %v2677_v60 = vpop.f32.mrf.mxu1 }
 0x969   : > { %v1467_v62 = vsel %vm548_vm4, %v1465_v57, -1e+30 }
 0x96a   : > { %v1461_v63 = vpop.f32.mrf.mxu1  ;;  %v1469_v0 = vsel %vm778_vm5, %v1467_v62, -inf }
 0x96b   : > { %v1466_v1 = vmul.f32 0.35355338, %v1461_v63  ;;  %1470 = vmax.xlane.f32.xlu0 %v1469_v0 }
 0x96c   : > { %v2678_v2 = vpop.f32.mrf.mxu1 }
 0x96d   : > { %v1468_v3 = vsel %vm549_vm6, %v1466_v1, -1e+30 }
 0x96e   : > { %v1472_v4 = vsel %vm778_vm5, %v1468_v3, -inf }
 0x96f   : > { %1473 = vmax.xlane.f32.xlu1 %v1472_v4 }
 0x9f4   : > { %v1471_v5 = vpop.xlane.xlu0 %1470 }
 0x9f5   : > { %v1475_v6 = vsub.f32 %v1467_v62, %v1471_v5 }
 0x9f7   : > { %v1477_v7 = vmul.f32 1.442695, %v1475_v6 }
 0x9f8   : > { %v1474_v8 = vpop.xlane.xlu1 %1473 }
 0x9f9   : > { %2858 = vpow2.f32 %v1477_v7  ;;  %v1476_v9 = vsub.f32 %v1468_v3, %v1474_v8 }
 0x9fb   : > { %v1479_v10 = vmul.f32 1.442695, %v1476_v9 }
 0x9fd   : > { %2860 = vpow2.f32 %v1479_v10 }
 0xa06   : > { %v2859_v11 = vpop.eup %2858 }
 0xa07   : > { %v1481_v12 = vsel %vm778_vm5, %v2859_v11, 0.0 }
 0xa08   : > { %1482 = vadd.xlane.f32.xlu0 %v1481_v12 }
 0xa0a   : > { %v2861_v13 = vpop.eup %2860 }
 0xa0b   : > { %v1484_v14 = vsel %vm778_vm5, %v2861_v13, 0.0 }
 0xa0c   : > { %1485 = vadd.xlane.f32.xlu1 %v1484_v14 }
 0xa91   : > { %v1483_v15 = vpop.xlane.xlu0 %1482 }
 0xa92   : > { %2862 = vrcp.f32 %v1483_v15 }
 0xa95   : > { %v1486_v16 = vpop.xlane.xlu1 %1485 }
 0xa96   : > { %2864 = vrcp.f32 %v1486_v16 }
 0xa9f   : > { %v2863_v18 = vpop.eup %2862 }
 0xaa0   : > { %v1489_v20 = vmul.f32 %v2863_v18, %v2859_v11 }
 0xaa3   : > { %v2865_v19 = vpop.eup %2864 }
 0xaa4   : > { %v1490_v21 = vmul.f32 %v2865_v19, %v2861_v13 }
 0xaa6   : > { %v1491_v23 = vpack.c.bf16 %v1490_v21, %v1489_v20 }
 0xaa8   : > { %2682 = vmatmul.mubr.msk.bf16.vlgmr.msra.gmra.mxu0 %vm778_vm5, %v1491_v23 }
 0xaa9   : > { %2692 = vmatpush3.bf16.msra.mxu0 %v2822_v22  ;;  %2695 = vmatprep.mubr.msk.bf16.mxu0 %vm2929_vm2, %v2928_v17 }
 0xaaa   : > { %2693 = vmatprep.subr.bf16.mxu0 %v2928_v17 }
 0xaad   : > { %2694 = vmatpush3.bf16.msra.mxu0 %v2823_v24  ;;  %v2468_v24 = vld [vmem:[%s3044_s22 + $0xc] sm:$0xf] }
 0xaae   : > { %2707 = vmatprep.subr.bf16.mxu0 %v2928_v17 }
 0xab0   : > { %2696 = vmatmul.mubr.msk.bf16.vlgmr.msra.gmra.mxu0 %vm506_vm1, %v3086_v33 }
 0xab1   : > { %2708 = vmatpush3.bf16.msra.mxu0 %v2824_v25  ;;  %2711 = vmatprep.mubr.msk.bf16.mxu0 %vm2929_vm2, %v2928_v17  ;;  %v1891_v25 = vsel %vm1150_vm7, %v2468_v24, 0 }
 0xab2   : > { %2709 = vmatprep.subr.bf16.mxu0 %v2928_v17 }
 0xab5   : > { %2710 = vmatpush3.bf16.msra.mxu0 %v2825_v26 }
 0xab6   : > { %2721 = vmatprep.subr.bf16.mxu0 %v2928_v17 }
 0xab8   : > { %2712 = vmatmul.mubr.msk.bf16.vlgmr.msra.gmra.mxu0 %vm506_vm1, %v3086_v33 }
 0xab9   : > { %2723 = vmatprep.mubr.msk.bf16.mxu0 %vm2929_vm2, %v2928_v17 }
 0xb68   : > { %v1530_v30 = vpop.f32.mrf.mxu0 }
 0xb6a   : > { %v2683_v32 = vpop.f32.mrf.mxu0 }
 0xb6c   : > { %v1533_v34 = vpop.f32.mrf.mxu0 }
 0xb6d   : > { %v1537_v36 = vpack.c.bf16 %v1533_v34, %v1530_v30 }
 0xb6e   : > { %v2684_v37 = vpop.f32.mrf.mxu0 }
 0xb6f   : > { %2688 = vmatmul.mubr.msk.bf16.vlgmr.msra.gmra.mxu1 %vm726_vm3, %v1537_v36  ;;  %v2886_v37 = vld [vmem:[#allocation2] sm:$0xff] }
 0xb70   : > { %v1640_v38 = vpop.f32.mrf.mxu0  ;;  %2700 = vmatpush3.bf16.msra.mxu1 %v2826_v35  ;;  %2703 = vmatprep.mubr.msk.bf16.mxu1 %vm2929_vm2, %v2928_v17 }
 0xb71   : > { %2701 = vmatprep.subr.bf16.mxu1 %v2928_v17 }
 0xb72   : > { %v2697_v40 = vpop.f32.mrf.mxu0 }
 0xb74   : > { %v1643_v41 = vpop.f32.mrf.mxu0  ;;  %2702 = vmatpush3.bf16.msra.mxu1 %v2827_v39 }
 0xb75   : > { %v1763_v43 = vpack.c.bf16 %v1643_v41, %v1640_v38  ;;  %2715 = vmatprep.subr.bf16.mxu1 %v2928_v17 }
 0xb76   : > { %v2698_v45 = vpop.f32.mrf.mxu0 }
 0xb77   : > { %2704 = vmatmul.mubr.msk.bf16.vlgmr.msra.gmra.mxu1 %vm506_vm1, %v3086_v33  ;;  %v1239_v33 = vadd.f32 %v3205_v31, %v3224_v44  ;;  %v2887_v45 = vld [vmem:[#allocation2 + $0x8] sm:$0xff] }
 0xb78   : > { %v1756_v46 = vpop.f32.mrf.mxu0  ;;  %2717 = vmatprep.mubr.msk.bf16.mxu1 %vm2929_vm2, %v2928_v17 }
 0xb7a   : > { %v2713_v47 = vpop.f32.mrf.mxu0 }
 0xb7c   : > { %v1759_v48 = vpop.f32.mrf.mxu0 }
 0xb7d   : > { %v1839_v49 = vpack.c.bf16 %v1759_v48, %v1756_v46 }
 0xb7e   : > { %v2714_v50 = vpop.f32.mrf.mxu0 }
 0xb7f   : > { %2722 = vmatpush3.bf16.msra.mxu0 %v1839_v49 }
 0xb80   : > { %2733 = vmatprep.subr.bf16.mxu0 %v2928_v17 }
 0xc2f   : > { %v1580_v52 = vpop.f32.mrf.mxu1 }
 0xc30   : > { %v3276_v53 = vadd.f32 %v1580_v52, %v1236_v51 }
 0xc31   : > { %v2689_v54 = vpop.f32.mrf.mxu1 }
 0xc33   : > { %v1583_v55 = vpop.f32.mrf.mxu1 }
 0xc34   : > { %v3280_v56 = vadd.f32 %v1583_v55, %v1239_v33 }
 0xc35   : > { %v2690_v57 = vpop.f32.mrf.mxu1 }
 0xc36   : > { %v2828_v57 = vld [vmem:[%s3053_s15 + $0x8] sm:$0xff]  }
 0xc37   : > { %v1698_v60 = vpop.f32.mrf.mxu1 }
 0xc39   : > { %v2705_v62 = vpop.f32.mrf.mxu1 }
 0xc3b   : > { %v1701_v63 = vpop.f32.mrf.mxu1 }
 0xc3c   : > { %v1764_v0 = vpack.c.bf16 %v1701_v63, %v1698_v60  ;;  %v2829_v60 = vld [vmem:[%s3053_s15] sm:$0xff]  }
 0xc3d   : > { %v2706_v1 = vpop.f32.mrf.mxu1 }
 0xc3e   : > { %v1769_v2 = vsel %vm726_vm3, %v1764_v0, 0 }
 0xc3f   : > { %2716 = vmatpush3.bf16.xpose.msra.mxu1 %v1769_v2 }
 0xc40   : > { %2727 = vmatprep.subr.bf16.mxu1 %v2928_v17 }
 0xc46   : > { %2718 = vmatmul.mubr.msk.bf16.vlgmr.msra.gmra.mxu1 %vm726_vm3, %v1763_v43 }
 0xc47   : > { %2729 = vmatprep.mubr.msk.bf16.mxu1 %vm2929_vm2, %v2928_v17  ;;  %2728 = vmatpush3.bf16.msra.mxu1 %v1891_v25 }
 0xc48   : > { %2741 = vmatprep.subr.bf16.mxu1 %v2928_v17 }
 0xd06   : > { %v1805_v28 = vpop.f32.mrf.mxu1 }
 0xd07   : > { %v1812_v31 = vmul.f32 0.35355338, %v1805_v28 }
 0xd08   : > { %v2719_v42 = vpop.f32.mrf.mxu1 }
 0xd09   : > { %v1814_v44 = vsel %vm548_vm4, %v1812_v31, -1e+30 }
 0xd0a   : > { %v1808_v3 = vpop.f32.mrf.mxu1  ;;  %v1816_v4 = vsel %vm778_vm5, %v1814_v44, -inf }
 0xd0b   : > { %v1813_v5 = vmul.f32 0.35355338, %v1808_v3  ;;  %1817 = vmax.xlane.f32.xlu0 %v1816_v4  ;;  %v2470_v3 = vld [vmem:[%s477_s26] ss:$0 sm:$0xff] }
 0xd0c   : > { %v2720_v6 = vpop.f32.mrf.mxu1 }
 0xd0d   : > { %v1815_v7 = vsel %vm549_vm6, %v1813_v5, -1e+30 }
 0xd0e   : > { %v1819_v8 = vsel %vm778_vm5, %v1815_v7, -inf }
 0xd0f   : > { %1820 = vmax.xlane.f32.xlu1 %v1819_v8  ;;  %v2830_v8 = vld [vmem:[%s3058_s12 + $0x38] sm:$0xff]  }
 0xd94   : > { %v1818_v9 = vpop.xlane.xlu0 %1817 }
 0xd95   : > { %v1822_v10 = vsub.f32 %v1814_v44, %v1818_v9  ;;  %v2831_v9 = vld [vmem:[%s3058_s12 + $0x30] sm:$0xff]  }
 0xd97   : > { %v1824_v11 = vmul.f32 1.442695, %v1822_v10  ;;  %v2832_v10 = vld [vmem:[%s3058_s12 + $0x28] sm:$0xff]  }
 0xd98   : > { %v1821_v12 = vpop.xlane.xlu1 %1820 }
 0xd99   : > { %2866 = vpow2.f32 %v1824_v11  ;;  %v1823_v58 = vsub.f32 %v1815_v7, %v1821_v12  ;;  %v2833_v11 = vld [vmem:[%s3058_s12 + $0x20] sm:$0xff]   ;;  %v2834_v12 = vld [vmem:[%s3058_s12 + $0x18] sm:$0xff]  }
 0xd9b   : > { %v1826_v13 = vmul.f32 1.442695, %v1823_v58  ;;  %v2835_v58 = vld [vmem:[%s3058_s12 + $0x10] sm:$0xff]  }
 0xd9d   : > { %2868 = vpow2.f32 %v1826_v13  ;;  %v2836_v13 = vld [vmem:[%s3058_s12 + $0x8] sm:$0xff]  }
 0xda6   : > { %v2867_v14 = vpop.eup %2866 }
 0xda7   : > { %v1828_v15 = vsel %vm778_vm5, %v2867_v14, 0.0 }
 0xda8   : > { %1829 = vadd.xlane.f32.xlu0 %v1828_v15 }
 0xdaa   : > { %v2869_v16 = vpop.eup %2868 }
 0xdab   : > { %v1831_v59 = vsel %vm778_vm5, %v2869_v16, 0.0 }
 0xdac   : > { %1832 = vadd.xlane.f32.xlu1 %v1831_v59 }
 0xe31   : > { %v1830_v61 = vpop.xlane.xlu0 %1829 }
 0xe32   : > { %2870 = vrcp.f32 %v1830_v61 }
 0xe35   : > { %v1833_v18 = vpop.xlane.xlu1 %1832 }
 0xe36   : > { %2872 = vrcp.f32 %v1833_v18 }
 0xe3f   : > { %v2871_v19 = vpop.eup %2870 }
 0xe40   : > { %v1836_v21 = vmul.f32 %v2871_v19, %v2867_v14  ;;  %v2837_v14 = vld [vmem:[%s3058_s12] sm:$0xff]  }
 0xe43   : > { %v2873_v20 = vpop.eup %2872 }
 0xe44   : > { %v1837_v22 = vmul.f32 %v2873_v20, %v2869_v16 }
 0xe46   : > { %v1838_v23 = vpack.c.bf16 %v1837_v22, %v1836_v21 }
 0xe48   : > { %2724 = vmatmul.mubr.msk.bf16.vlgmr.msra.gmra.mxu0 %vm778_vm5, %v1838_v23 }
 0xe49   : > { %2737 = vmatprep.mubr.msk.bf16.mxu0 %vm2929_vm2, %v2928_v17  ;;  %2734 = vmatpush3.bf16.msra.mxu0 %v2828_v57 }
 0xe4a   : > { %2735 = vmatprep.subr.bf16.mxu0 %v2928_v17 }
 0xe4d   : > { %2736 = vmatpush3.bf16.msra.mxu0 %v2829_v60 }
 0xf08   : > { %v1877_v26 = vpop.f32.mrf.mxu0 }
 0xf0a   : > { %v2725_v27 = vpop.f32.mrf.mxu0 }
 0xf0c   : > { %v1880_v29 = vpop.f32.mrf.mxu0 }
 0xf0d   : > { %v1884_v30 = vpack.c.bf16 %v1880_v29, %v1877_v26 }
 0xf0e   : > { %v2726_v32 = vpop.f32.mrf.mxu0 }
 0xf0f   : > { %2730 = vmatmul.mubr.msk.bf16.vlgmr.msra.gmra.mxu1 %vm726_vm3, %v1884_v30 }
 0xf10   : > { %2757 = vmatprep.mubr.msk.bf16.mxu1 %vm2929_vm2, %v2928_v17  ;;  %2742 = vmatpush3.bf16.msra.mxu1 %v2830_v8 }
 0xf11   : > { %2743 = vmatprep.subr.bf16.mxu1 %v2928_v17 }
 0xf14   : > { %2744 = vmatpush3.bf16.msra.mxu1 %v2831_v9 }
 0xf15   : > { %2745 = vmatprep.subr.bf16.mxu1 %v2928_v17 }
 0xf18   : > { %2746 = vmatpush3.bf16.msra.mxu1 %v2832_v10 }
 0xf19   : > { %2747 = vmatprep.subr.bf16.mxu1 %v2928_v17 }
 0xf1c   : > { %2748 = vmatpush3.bf16.msra.mxu1 %v2833_v11 }
 0xf1d   : > { %2749 = vmatprep.subr.bf16.mxu1 %v2928_v17 }
 0xf20   : > { %2750 = vmatpush3.bf16.msra.mxu1 %v2834_v12 }
 0xf21   : > { %2751 = vmatprep.subr.bf16.mxu1 %v2928_v17 }
 0xf24   : > { %2752 = vmatpush3.bf16.msra.mxu1 %v2835_v58 }
 0xf25   : > { %2753 = vmatprep.subr.bf16.mxu1 %v2928_v17 }
 0xf28   : > { %2754 = vmatpush3.bf16.msra.mxu1 %v2836_v13 }
 0xf29   : > { %2755 = vmatprep.subr.bf16.mxu1 %v2928_v17 }
 0xf2c   : > { %2756 = vmatpush3.bf16.msra.mxu1 %v2837_v14 }
 0xfcf   : > { %v1927_v34 = vpop.f32.mrf.mxu1 }
 0xfd0   : > { %v1934_v35 = vadd.f32 %v1927_v34, %v3276_v53 }
 0xfd1   : > { %v2731_v36 = vpop.f32.mrf.mxu1 }
 0xfd2   : > { %v3307_v38 = vadd.f32 %v2886_v37, %v1934_v35 }
 0xfd3   : > { %v1930_v39 = vpop.f32.mrf.mxu1 }
 0xfd4   : > { %v1935_v40 = vadd.f32 %v1930_v39, %v3280_v56  ;;  %v1939_v41 = vsel %vm506_vm1, %v3307_v38, 0.0 }
 0xfd5   : > { %1940 = vadd.xlane.f32.xlu0 %v1939_v41  ;;  %v2732_v43 = vpop.f32.mrf.mxu1 }
 0xfd6   : > { %v3312_v46 = vadd.f32 %v2887_v45, %v1935_v40 }
 0xfd8   : > { %v1942_v47 = vsel %vm506_vm1, %v3312_v46, 0.0 }
 0xfd9   : > { %1943 = vadd.xlane.f32.xlu1 %v1942_v47 }
0x105e   : > { %v1941_v48 = vpop.xlane.xlu0 %1940 }
0x105f   : > { %v1945_v49 = vmul.f32 0.03125, %v1941_v48 }
0x1061   : > { %v1947_v50 = vsub.f32 %v3307_v38, %v1945_v49 }
0x1062   : > { %v1944_v51 = vpop.xlane.xlu1 %1943 }
0x1063   : > { %v1946_v52 = vmul.f32 0.03125, %v1944_v51  ;;  %v1949_v53 = vmul.f32 %v1947_v50, %v1947_v50 }
0x1065   : > { %v1948_v54 = vsub.f32 %v3312_v46, %v1946_v52  ;;  %v1951_v33 = vsel %vm506_vm1, %v1949_v53, 0.0 }
0x1066   : > { %1952 = vadd.xlane.f32.xlu0 %v1951_v33 }
0x1067   : > { %v1950_v55 = vmul.f32 %v1948_v54, %v1948_v54 }
0x1069   : > { %v1954_v56 = vsel %vm506_vm1, %v1950_v55, 0.0 }
0x106a   : > { %1955 = vadd.xlane.f32.xlu1 %v1954_v56 }
0x10ef   : > { %v1953_v62 = vpop.xlane.xlu0 %1952 }
0x10f0   : > { %v1957_v63 = vmul.f32 0.03125, %v1953_v62 }
0x10f2   : > { %v1959_v0 = vadd.f32 1e-05, %v1957_v63 }
0x10f3   : > { %v1956_v1 = vpop.xlane.xlu1 %1955 }
0x10f4   : > { %2874 = vrsqrt.f32 %v1959_v0  ;;  %v1958_v2 = vmul.f32 0.03125, %v1956_v1  ;;  %v2930_v0 = vmov -1.0  }
0x10f6   : > { %v1960_v28 = vadd.f32 1e-05, %v1958_v2 }
0x10f8   : > { %2876 = vrsqrt.f32 %v1960_v28 }
0x1101   : > { %v2875_v31 = vpop.eup %2874 }
0x1102   : > { %v1963_v42 = vmul.f32 %v2875_v31, %v1947_v50 }
0x1104   : > { %v1971_v5 = vmul.f32 %v2470_v3, %v1963_v42 }
0x1105   : > { %v2877_v44 = vpop.eup %2876 }
0x1106   : > { %v1964_v4 = vmul.f32 %v2877_v44, %v1948_v54 }
0x1108   : > { %v1972_v6 = vmul.f32 %v2470_v3, %v1964_v4 }
0x110a   : > { %v1973_v7 = vpack.c.bf16 %v1972_v6, %v1971_v5 }
0x110c   : > { %2738 = vmatmul.mubr.msk.bf16.vlgmr.msra.gmra.mxu0 %vm506_vm1, %v1973_v7 }
0x11cc   : > { %v2027_v15 = vpop.f32.mrf.mxu0 }
0x11cd   : > { %v2036_v16 = vmul.f32 0.70710677, %v2027_v15  ;;  %v2034_v4 = vmul.f32 0.5, %v2027_v15 }
0x11ce   : > { %v2739_v59 = vpop.f32.mrf.mxu0 }
0x11cf   : > { %v2042_v61 = vand.u32 2147483647, %v2036_v16  ;;  %vm2038_vm8 = vcmp.ge.f32.partialorder %v2036_v16, 0.0 }
0x11d0   : > { %v2030_v18 = vpop.f32.mrf.mxu0  ;;  %v2040_v1 = vsel %vm2038_vm8, 1.0, %v2930_v0 }
0x11d1   : > { %v2044_v19 = vmul.f32 0.3275911, %v2042_v61  ;;  %v2037_v20 = vmul.f32 0.70710677, %v2030_v18  ;;  %v2070_v26 = vsub.f32 0.0, %v2042_v61  ;;  %v2035_v5 = vmul.f32 0.5, %v2030_v18 }
0x11d2   : > { %v2740_v21 = vpop.f32.mrf.mxu0 }
0x11d3   : > { %v2046_v22 = vadd.f32 1.0, %v2044_v19  ;;  %v2043_v23 = vand.u32 2147483647, %v2037_v20  ;;  %v2072_v27 = vmul.f32 %v2070_v26, %v2042_v61  ;;  %vm2039_vm9 = vcmp.ge.f32.partialorder %v2037_v20, 0.0 }
0x11d4   : > { %v2041_v42 = vsel %vm2039_vm9, 1.0, %v2930_v0 }
0x11d5   : > { %2878 = vrcp.f32 %v2046_v22  ;;  %v2045_v24 = vmul.f32 0.3275911, %v2043_v23  ;;  %v2071_v29 = vsub.f32 0.0, %v2043_v23  ;;  %v2074_v32 = vmul.f32 1.442695, %v2072_v27 }
0x11d7   : > { %v2047_v25 = vadd.f32 1.0, %v2045_v24  ;;  %v2073_v34 = vmul.f32 %v2071_v29, %v2043_v23 }
0x11d9   : > { %2880 = vrcp.f32 %v2047_v25  ;;  %v2076_v40 = vmul.f32 1.442695, %v2073_v34 }
0x11da   : > { %2882 = vpow2.f32 %v2074_v32 }
0x11db   : > { %2884 = vpow2.f32 %v2076_v40 }
0x11e2   : > { %v2879_v17 = vpop.eup %2878 }
0x11e3   : > { %v2052_v30 = vmul.f32 1.0614054, %v2879_v17 }
0x11e5   : > { %v2054_v35 = vadd.f32 -1.4531521, %v2052_v30 }
0x11e6   : > { %v2881_v36 = vpop.eup %2880 }
0x11e7   : > { %v2056_v37 = vmul.f32 %v2879_v17, %v2054_v35  ;;  %v2053_v39 = vmul.f32 1.0614054, %v2881_v36  ;;  %v2883_v55 = vpop.eup %2882 }
0x11e8   : > { %v2885_v63 = vpop.eup %2884 }
0x11e9   : > { %v2058_v41 = vadd.f32 1.4214138, %v2056_v37  ;;  %v2055_v43 = vadd.f32 -1.4531521, %v2053_v39 }
0x11eb   : > { %v2060_v45 = vmul.f32 %v2879_v17, %v2058_v41  ;;  %v2057_v47 = vmul.f32 %v2881_v36, %v2055_v43 }
0x11ed   : > { %v2062_v48 = vadd.f32 -0.28449672, %v2060_v45  ;;  %v2059_v49 = vadd.f32 1.4214138, %v2057_v47 }
0x11ef   : > { %v2064_v50 = vmul.f32 %v2879_v17, %v2062_v48  ;;  %v2061_v51 = vmul.f32 %v2881_v36, %v2059_v49 }
0x11f1   : > { %v2066_v52 = vadd.f32 0.2548296, %v2064_v50  ;;  %v2063_v53 = vadd.f32 -0.28449672, %v2061_v51 }
0x11f3   : > { %v2068_v54 = vmul.f32 %v2879_v17, %v2066_v52  ;;  %v2065_v33 = vmul.f32 %v2881_v36, %v2063_v53 }
0x11f5   : > { %v2078_v56 = vmul.f32 %v2883_v55, %v2068_v54  ;;  %v2067_v57 = vadd.f32 0.2548296, %v2065_v33 }
0x11f7   : > { %v2080_v60 = vsub.f32 1.0, %v2078_v56  ;;  %v2069_v62 = vmul.f32 %v2881_v36, %v2067_v57 }
0x11f9   : > { %v2082_v2 = vmul.f32 %v2080_v60, %v2040_v1  ;;  %v2079_v28 = vmul.f32 %v2885_v63, %v2069_v62 }
0x11fb   : > { %v2081_v31 = vsub.f32 1.0, %v2079_v28  ;;  %v2084_v44 = vadd.f32 1.0, %v2082_v2 }
0x11fd   : > { %v2083_v3 = vmul.f32 %v2081_v31, %v2041_v42  ;;  %v2086_v7 = vmul.f32 %v2084_v44, %v2034_v4 }
0x11ff   : > { %v2085_v6 = vadd.f32 1.0, %v2083_v3 }
0x1201   : > { %v2087_v8 = vmul.f32 %v2085_v6, %v2035_v5 }
0x1203   : > { %v2088_v9 = vpack.c.bf16 %v2087_v8, %v2086_v7 }
0x1205   : > { %2758 = vmatmul.mubr.bf16.vlgmr.msra.gmra.mxu1 %v2088_v9 }
0x12c5   : > { %v2187_v10 = vpop.f32.mrf.mxu1 }
0x12c6   : > { %v2194_v11 = vadd.f32 %v2187_v10, %v3307_v38 }
0x12c7   : > { %v2759_v12 = vpop.f32.mrf.mxu1 }
0x12c8   : > { %2196 = vst.msk [vmem:[#allocation2] sm:$0xff] %vm506_vm1, %v2194_v11  ;;  %2201 = sbr.rel (%p2482_p8) target bundleno = 4814 (0x12ce), region = 64 }
0x12c9   : > { %v2190_v58 = vpop.f32.mrf.mxu1 }
0x12ca   : > { %v2195_v13 = vadd.f32 %v2190_v58, %v3312_v46 }
0x12cb   : > { %v2760_v14 = vpop.f32.mrf.mxu1 }
0x12cc   : > { %2197 = vst.msk [vmem:[#allocation2 + $0x8] sm:$0xff] %vm506_vm1, %v2195_v13 }
0x12cd   : > { %2202 = vst.msk [vmem:[%s3063_s19] sm:$0xff] %vm506_vm1, %v2194_v11  ;;  %2203 = vst.msk [vmem:[%s3063_s19 + $0x8] sm:$0xff] %vm506_vm1, %v2195_v13 }
0x12ce PF: > { %s19_s13 = sadd.s32 1, %s2926_s13   ;;  %s3391_s10 = sld [smem:[#allocation3_spill]] }
0x12cf   : > { %p16_p9 = scmp.ge.s32.totalorder %s19_s13, 6   ;;  %s3392_s16 = sld [smem:[#allocation4_spill]] }
0x12d0   : > { %s3393_s12 = sld [smem:[#allocation5_spill]]  ;;  %s3394_s30 = smov %s2918_s11 }
0x12d1   :  { %18 = sbr.rel (!%p16_p9) target bundleno = 5 (0x5), region = 130 }
0x12d5   : > { %s3395_s11 = smov %s3392_s16 }

// kernel: squeeze.1
= control target key start
LH: loop header
LB: loop body
LE: loop exit
PB: predicated region body
PF: predicated region fallthrough
CT: control target
= control target key end

     0   :  { %s77_s0 = inlined_call_operand.vmem [shape: s32[16], index: 0, kind: input, shape index: {}]   ;;  %s78_s1 = inlined_call_operand.hbm [shape: s32[2,8], index: 1, kind: output, shape index: {}]  }
   0x1   :  { %v6_v0 = vld [vmem:[%s77_s0] sm:$0x1] }
   0x2   :  { %2 = vsyncpa [#allocation1], 0  ;;  %7 = vst [vmem:[#allocation3] sm:$0x1] %v6_v0  ;;  %vm9_vm0 = vcmask 64512   ;;  %s59_s0 = smov 120  }
   0x3   :  { %s60_s8 = smov [#allocation0]  }
   0x4   :  { %s29_s9 = sshll.u32 %s60_s8, 4  ;;  %s30_s9 = int_to_ptr.vmem [resolvable:$true] %s29_s9 }
   0x5   :  { %s37_s10 = scalar_lea.vmem %s30_s9, 32  ;;  %p42_p1 = scmp.lt.s32.totalorder %s30_s9, %s30_s9 }
   0x6   :  { %p38_p0 = scmp.ne.s32.totalorder %s30_s9, %s37_s10  ;;  %p43_p2 = scmp.lt.s32.totalorder %s37_s10, %s37_s10 }
   0x8   :  { %p44_p3 = por %p43_p2, %p42_p1 }
   0x9   :  { %v11_v1 = vld [vmem:[#allocation3] sm:$0x1]  }
   0xa   :  { %v8_v2 = vld [vmem:[#allocation3] sm:$0x1]   ;;  %12 = vrot.lane.b32.xlu0 %v11_v1, %s59_s0  ;;  %p45_p4 = pnand %p44_p3, %p38_p0 }
   0xb   :  { %10 = vst.msk [vmem:[#allocation2] sm:$0x1] %vm9_vm0, %v8_v2  }
  0x7c   :  { %v13_v3 = vpop.permute.xlu0 %12  }
  0x7d   :  { %16 = vst.msk [vmem:[#allocation2 + $0x1] sm:$0x1] %vm9_vm0, %v13_v3  }
  0x84   :  { %v21_v4 = vld [vmem:[#allocation2] sm:$0x3] }
  0x85   :  { %24 = vst [vmem:[#allocation0] sm:$0x3] %v21_v4 }
  0x86   :  { %48 = shalt.err (!%p45_p4)
}
  0x87   :  { %32 = dma.vmem_to_hbm [thread:$0]  %s30_s9, 32, %s78_s1, [#allocation1]  }
  0x88   :  { %57 = dma.done.wait [#allocation1], 32  }
  0x89   :  { %58 = vsyncadd [#allocation1], 4294967264 }
  0x8a   :  { %34 = vsyncpa [#allocation1], 1 }

// kernel: _lambda_.5
= control target key start
LH: loop header
LB: loop body
LE: loop exit
PB: predicated region body
PF: predicated region fallthrough
CT: control target
= control target key end

     0   :  { %s3431_s0 = inlined_call_operand.vmem [shape: f32[1,8,32], index: 0, kind: input, shape index: {}]   ;;  %s3432_s1 = inlined_call_operand.vmem [shape: f32[2,16,32], index: 1, kind: input, shape index: {}]   ;;  %s3433_s2 = inlined_call_operand.vmem [shape: f32[8,32], index: 2, kind: input, shape index: {}]   ;;  %s3434_s3 = inlined_call_operand.vmem [shape: f32[1,32], index: 3, kind: input, shape index: {}]   ;;  %s3435_s4 = inlined_call_operand.vmem [shape: f32[1,32], index: 4, kind: input, shape index: {}]   ;;  %s3436_s5 = inlined_call_operand.vmem [shape: f32[1,32], index: 5, kind: input, shape index: {}]   ;;  %s3437_s6 = inlined_call_operand.vmem [shape: f32[1,32], index: 6, kind: input, shape index: {}]   ;;  %s3438_s7 = inlined_call_operand.vmem [shape: bf16[4,32,8], index: 7, kind: input, shape index: {}]   ;;  %s3439_s8 = inlined_call_operand.vmem [shape: f32[4,1,8], index: 8, kind: input, shape index: {}]   ;;  %s3440_s9 = inlined_call_operand.vmem [shape: bf16[4,32,8], index: 9, kind: input, shape index: {}]   ;;  %s3441_s10 = inlined_call_operand.vmem [shape: f32[4,1,8], index: 10, kind: input, shape index: {}]   ;;  %s3442_s11 = inlined_call_operand.vmem [shape: bf16[4,32,8], index: 11, kind: input, shape index: {}]   ;;  %s3443_s12 = inlined_call_operand.vmem [shape: f32[4,1,8], index: 12, kind: input, shape index: {}]   ;;  %s3444_s13 = inlined_call_operand.vmem [shape: bf16[4,8,32], index: 13, kind: input, shape index: {}]   ;;  %s3445_s14 = inlined_call_operand.vmem [shape: f32[1,32], index: 14, kind: input, shape index: {}]   ;;  %s3446_s15 = inlined_call_operand.vmem [shape: f32[1,32], index: 15, kind: input, shape index: {}]   ;;  %s3447_s16 = inlined_call_operand.vmem [shape: f32[1,32], index: 16, kind: input, shape index: {}]   ;;  %s3448_s17 = inlined_call_operand.vmem [shape: bf16[32,128], index: 17, kind: input, shape index: {}]   ;;  %s3449_s18 = inlined_call_operand.vmem [shape: f32[1,128], index: 18, kind: input, shape index: {}]   ;;  %s3450_s19 = inlined_call_operand.vmem [shape: bf16[128,32], index: 19, kind: input, shape index: {}]   ;;  %s3451_s20 = inlined_call_operand.vmem [shape: f32[1,32], index: 20, kind: input, shape index: {}]   ;;  %s3452_s21 = inlined_call_operand.vmem [shape: f32[2,8,32], index: 21, kind: output, shape index: {}]  }
   0x1   :  { %3453 = sst [smem:[#allocation2_spill]] %s3431_s0 }
   0x2   :  { %3454 = sst [smem:[#allocation3_spill]] %s3432_s1 }
   0x3   :  { %3455 = sst [smem:[#allocation4_spill]] %s3433_s2  ;;  %s3047_s2 = smov 0  }
   0x4   :  { %3456 = sst [smem:[#allocation5_spill]] %s3434_s3 }
   0x5   :  { %3457 = sst [smem:[#allocation6_spill]] %s3435_s4 }
   0x6   :  { %3458 = sst [smem:[#allocation7_spill]] %s3436_s5 }
   0x7 LB: > { %s2446_s25 = sadd.s32 4294967295, %s2932_s2   ;;  %p2450_p0 = scmp.ge.s32.totalorder %s2932_s2, 1  ;;  %s2932_s2 = sphi %s3047_s2, %s31_s2  }
   0x8   : > { %p587_p1 = scmp.lt.s32.totalorder %s2932_s2, 3 }
   0xa   : > { %p588_p2 = pnand %p2450_p0, %p587_p1 }
   0xb   : > { %s3459_s3 = sld [smem:[#allocation2_spill]] (!%p588_p2)  ;;  %p646_p3 = scmp.lt.s32.totalorder (!%p588_p2), %s2446_s25, 1 }
   0xc   : > { %591 = sbr.rel (%p588_p2) target bundleno = 4761 (0x1299), region = 104  ;;  %s3460_s4 = sld [smem:[#allocation3_spill]] (!%p588_p2) }
   0xd   : > { %s3461_s27 = sld [smem:[#allocation5_spill]] (!%p588_p2) }
   0xe   : > { %s3462_s29 = sld [smem:[#allocation6_spill]] (!%p588_p2) }
  0x11   : > { %v3058_v0 = vld [vmem:[%s3459_s3] sm:$0xff]  ;;  %vm661_vm0 = vcmask 261120   ;;  %s3466_s25 = smov (!%p646_p3, %s2446_s25), 1  ;;  %v2864_v21 = vld [vmem:[%s3438_s7 + $0x8] sm:$0xff]   ;;  %v2934_v22 = vmov 0.0   ;;  %vm2935_vm1 = vmmov 0  }
  0x12   : > { %v662_v1 = vsel %vm661_vm0, %v3058_v0, 0.0  ;;  %s2584_s28 = sshll.u32 %s3466_s25, 4  ;;  %2657 = vmatprep.subr.bf16.mxu0 %v2934_v22  ;;  %2681 = vmatprep.subr.bf16.mxu1 %v2934_v22  ;;  %v2865_v23 = vld [vmem:[%s3438_s7] sm:$0xff]   ;;  %v2866_v41 = vld [vmem:[%s3440_s9 + $0x8] sm:$0xff]   ;;  %vm935_vm2 = vcmask 64512   ;;  %vm983_vm3 = vcmask 130048  }
  0x13   : > { %663 = vadd.xlane.f32.xlu0 %v662_v1  ;;  %s650_s30 = scalar_lea.vmem %s3460_s4, %s2584_s28  ;;  %2658 = vmatpush3.bf16.msra.mxu0 %v2864_v21  ;;  %v2454_v34 = vld [vmem:[%s3461_s27] ss:$0 sm:$0xff]  ;;  %v2868_v52 = vld [vmem:[%s3442_s11 + $0x8] sm:$0xff]   ;;  %vm1350_vm4 = vcmask 1043456   ;;  %s2453_s24 = sshll.u32 %s3466_s25, 3 }
  0x14   : > { %v658_v2 = vld [vmem:[%s650_s30 + $0x8] sm:$0xff]  ;;  %v657_v3 = vld [vmem:[%s650_s30] sm:$0xff]  ;;  %2659 = vmatprep.subr.bf16.mxu0 %v2934_v22  ;;  %2661 = vmatprep.mubr.msk.bf16.mxu0 %vm2935_vm1, %v2934_v22  ;;  %s3463_s30 = sld [smem:[#allocation7_spill]]  ;;  %s654_s0 = scalar_lea.vmem %s3452_s21, %s2453_s24 }
  0x15   : > { %v696_v4 = vsel %vm661_vm0, %v658_v2, 0.0  ;;  %v693_v5 = vsel %vm661_vm0, %v657_v3, 0.0  ;;  %2683 = vmatprep.mubr.msk.bf16.mxu1 %vm2935_vm1, %v2934_v22  ;;  %v2455_v36 = vld [vmem:[%s3462_s29] ss:$0 sm:$0xff]  ;;  %s3464_s3 = sld [smem:[#allocation4_spill]] }
  0x16   : > { %697 = vadd.xlane.f32.xlu1 %v696_v4  ;;  %v2457_v45 = vld [vmem:[%s3437_s6] ss:$0 sm:$0xff] }
  0x17   : > { %694 = vadd.xlane.f32.xlu0 %v693_v5  ;;  %2660 = vmatpush3.bf16.msra.mxu0 %v2865_v23  ;;  %v2867_v49 = vld [vmem:[%s3440_s9] sm:$0xff]  }
  0x18   : > { %2665 = vmatprep.subr.bf16.mxu0 %v2934_v22  ;;  %v2869_v54 = vld [vmem:[%s3442_s11] sm:$0xff]  }
  0x19   : > { %v2462_v60 = vld [vmem:[%s3441_s10] ss:$0 sm:$0xff] }
  0x1a   : > { %v2456_v40 = vld [vmem:[%s3463_s30] ss:$0 sm:$0xff] }
  0x1b   : > { %v2458_v4 = vld [vmem:[%s3439_s8] ss:$0 sm:$0xff] }
  0x9c   : > { %v664_v6 = vpop.xlane.xlu0 %663 }
  0x9d   : > { %v666_v7 = vmul.f32 0.03125, %v664_v6 }
  0x9f   : > { %v667_v8 = vsub.f32 %v3058_v0, %v666_v7  ;;  %v698_v10 = vpop.xlane.xlu1 %697  ;;  %v2466_v7 = vld [vmem:[%s3443_s12] ss:$0 sm:$0xff] }
  0xa0   : > { %v695_v11 = vpop.xlane.xlu0 %694  ;;  %v700_v12 = vmul.f32 0.03125, %v698_v10 }
  0xa1   : > { %v668_v9 = vmul.f32 %v667_v8, %v667_v8  ;;  %v699_v13 = vmul.f32 0.03125, %v695_v11 }
  0xa2   : > { %v702_v15 = vsub.f32 %v658_v2, %v700_v12 }
  0xa3   : > { %v669_v14 = vsel %vm661_vm0, %v668_v9, 0.0  ;;  %v701_v16 = vsub.f32 %v657_v3, %v699_v13 }
  0xa4   : > { %670 = vadd.xlane.f32.xlu1 %v669_v14  ;;  %v704_v17 = vmul.f32 %v702_v15, %v702_v15  ;;  %v2870_v14 = vld [vmem:[%s3438_s7 + $0x18] sm:$0xff]  }
  0xa5   : > { %v703_v18 = vmul.f32 %v701_v16, %v701_v16 }
  0xa6   : > { %v708_v19 = vsel %vm661_vm0, %v704_v17, 0.0  ;;  %v2871_v17 = vld [vmem:[%s3438_s7 + $0x10] sm:$0xff]  }
  0xa7   : > { %v705_v20 = vsel %vm661_vm0, %v703_v18, 0.0  ;;  %v2872_v18 = vld [vmem:[%s3442_s11 + $0x18] sm:$0xff]  }
  0xa8   : > { %709 = vadd.xlane.f32.xlu1 %v708_v19  ;;  %706 = vadd.xlane.f32.xlu0 %v705_v20  ;;  %v2873_v19 = vld [vmem:[%s3442_s11 + $0x10] sm:$0xff]  }
 0x12d   : > { %v671_v24 = vpop.xlane.xlu1 %670 }
 0x12e   : > { %v672_v25 = vmul.f32 0.03125, %v671_v24 }
 0x130   : > { %v673_v26 = vadd.f32 1e-05, %v672_v25 }
 0x131   : > { %v710_v27 = vpop.xlane.xlu1 %709  ;;  %v707_v28 = vpop.xlane.xlu0 %706 }
 0x132   : > { %2898 = vrsqrt.f32 %v673_v26  ;;  %v712_v29 = vmul.f32 0.03125, %v710_v27  ;;  %v711_v30 = vmul.f32 0.03125, %v707_v28 }
 0x134   : > { %v714_v31 = vadd.f32 1e-05, %v712_v29  ;;  %v713_v32 = vadd.f32 1e-05, %v711_v30 }
 0x136   : > { %2900 = vrsqrt.f32 %v714_v31 }
 0x137   : > { %2902 = vrsqrt.f32 %v713_v32  ;;  %v2495_v32 = vld [vmem:[%s3443_s12 + $0x1] ss:$0 sm:$0xff] }
 0x13f   : > { %v2899_v33 = vpop.eup %2898 }
 0x140   : > { %v675_v35 = vmul.f32 %v2899_v33, %v667_v8 }
 0x142   : > { %v682_v37 = vmul.f32 %v2454_v34, %v675_v35 }
 0x143   : > { %v2901_v39 = vpop.eup %2900 }
 0x144   : > { %v689_v38 = vadd.f32 %v2455_v36, %v682_v37  ;;  %v2903_v42 = vpop.eup %2902  ;;  %v718_v43 = vmul.f32 %v2901_v39, %v702_v15 }
 0x145   : > { %v717_v46 = vmul.f32 %v2903_v42, %v701_v16 }
 0x146   : > { %v3100_v44 = vpack.c.bf16 %v689_v38, %v689_v38  ;;  %v726_v47 = vmul.f32 %v2456_v40, %v718_v43 }
 0x147   : > { %v725_v48 = vmul.f32 %v2456_v40, %v717_v46 }
 0x148   : > { %2662 = vmatmul.mubr.msk.bf16.vlgmr.msra.gmra.mxu0 %vm661_vm0, %v3100_v44  ;;  %v734_v50 = vadd.f32 %v2457_v45, %v726_v47 }
 0x149   : > { %2666 = vmatpush3.bf16.msra.mxu0 %v2866_v41  ;;  %2669 = vmatprep.mubr.msk.bf16.mxu0 %vm2935_vm1, %v2934_v22  ;;  %v733_v51 = vadd.f32 %v2457_v45, %v725_v48  ;;  %v2874_v48 = vld [vmem:[%s3440_s9 + $0x18] sm:$0xff]  }
 0x14a   : > { %2667 = vmatprep.subr.bf16.mxu0 %v2934_v22 }
 0x14b   : > { %v3116_v53 = vpack.c.bf16 %v734_v50, %v733_v51  ;;  %v2875_v50 = vld [vmem:[%s3440_s9 + $0x10] sm:$0xff]  }
 0x14d   : > { %2668 = vmatpush3.bf16.msra.mxu0 %v2867_v49 }
 0x14e   : > { %2673 = vmatprep.subr.bf16.mxu0 %v2934_v22 }
 0x150   : > { %2670 = vmatmul.mubr.msk.bf16.vlgmr.msra.gmra.mxu0 %vm661_vm0, %v3116_v53 }
 0x151   : > { %2674 = vmatpush3.bf16.msra.mxu0 %v2868_v52  ;;  %2677 = vmatprep.mubr.msk.bf16.mxu0 %vm2935_vm1, %v2934_v22 }
 0x152   : > { %2675 = vmatprep.subr.bf16.mxu0 %v2934_v22 }
 0x155   : > { %2676 = vmatpush3.bf16.msra.mxu0 %v2869_v54 }
 0x156   : > { %2687 = vmatprep.subr.bf16.mxu0 %v2934_v22 }
 0x158   : > { %2678 = vmatmul.mubr.msk.bf16.vlgmr.msra.gmra.mxu0 %vm661_vm0, %v3116_v53 }
 0x159   : > { %2689 = vmatprep.mubr.msk.bf16.mxu0 %vm2935_vm1, %v2934_v22 }
 0x208   : > { %v804_v55 = vpop.f32.mrf.mxu0 }
 0x209   : > { %v805_v9 = vadd.f32 %v2458_v4, %v804_v55 }
 0x20a   : > { %v2663_v56 = vpop.f32.mrf.mxu0 }
 0x20b   : > { %v933_v15 = vpack.c.bf16 %v805_v9, %v805_v9 }
 0x20c   : > { %v807_v57 = vpop.f32.mrf.mxu0 }
 0x20d   : > { %v2490_v57 = vld [vmem:[%s3441_s10 + $0x1] ss:$0 sm:$0xff] }
 0x20e   : > { %v2664_v58 = vpop.f32.mrf.mxu0 }
 0x210   : > { %v866_v59 = vpop.f32.mrf.mxu0 }
 0x211   : > { %v867_v63 = vadd.f32 %v2462_v60, %v866_v59 }
 0x212   : > { %v2671_v61 = vpop.f32.mrf.mxu0 }
 0x214   : > { %v869_v62 = vpop.f32.mrf.mxu0 }
 0x215   : > { %v870_v1 = vadd.f32 %v2462_v60, %v869_v62 }
 0x216   : > { %v2672_v2 = vpop.f32.mrf.mxu0 }
 0x217   : > { %v934_v3 = vpack.c.bf16 %v870_v1, %v867_v63  ;;  %v2485_v1 = vld [vmem:[%s3439_s8 + $0x1] ss:$0 sm:$0xff] }
 0x218   : > { %v926_v5 = vpop.f32.mrf.mxu0 }
 0x219   : > { %v940_v6 = vsel %vm935_vm2, %v934_v3, 0  ;;  %v927_v11 = vadd.f32 %v2466_v7, %v926_v5 }
 0x21a   : > { %v2679_v8 = vpop.f32.mrf.mxu0  ;;  %2682 = vmatpush3.bf16.xpose.msra.mxu1 %v940_v6 }
 0x21b   : > { %2693 = vmatprep.subr.bf16.mxu1 %v2934_v22 }
 0x21c   : > { %v929_v10 = vpop.f32.mrf.mxu0 }
 0x21d   : > { %v930_v12 = vadd.f32 %v2466_v7, %v929_v10 }
 0x21e   : > { %v2680_v13 = vpop.f32.mrf.mxu0 }
 0x21f   : > { %v996_v16 = vpack.c.bf16 %v930_v12, %v927_v11 }
 0x221   : > { %2684 = vmatmul.mubr.msk.bf16.vlgmr.msra.gmra.mxu1 %vm935_vm2, %v933_v15  ;;  %2688 = vmatpush3.bf16.msra.mxu0 %v996_v16  ;;  %v2501_v16 = vld [vmem:[%s3444_s13 + $0x4] sm:$0xf] }
 0x222   : > { %2694 = vmatpush3.bf16.msra.mxu1 %v2870_v14  ;;  %2697 = vmatprep.mubr.msk.bf16.mxu1 %vm2935_vm1, %v2934_v22 }
 0x223   : > { %2695 = vmatprep.subr.bf16.mxu1 %v2934_v22  ;;  %2701 = vmatprep.subr.bf16.mxu0 %v2934_v22 }
 0x226   : > { %2696 = vmatpush3.bf16.msra.mxu1 %v2871_v17  ;;  %v1352_v17 = vsel %vm1350_vm4, %v2501_v16, 0 }
 0x227   : > { %2709 = vmatprep.subr.bf16.mxu1 %v2934_v22 }
 0x229   : > { %2698 = vmatmul.mubr.msk.bf16.vlgmr.msra.gmra.mxu1 %vm661_vm0, %v3100_v44 }
 0x22a   : > { %2710 = vmatpush3.bf16.msra.mxu1 %v2872_v18  ;;  %2713 = vmatprep.mubr.msk.bf16.mxu1 %vm2935_vm1, %v2934_v22 }
 0x22b   : > { %2711 = vmatprep.subr.bf16.mxu1 %v2934_v22 }
 0x22e   : > { %2712 = vmatpush3.bf16.msra.mxu1 %v2873_v19 }
 0x22f   : > { %2723 = vmatprep.subr.bf16.mxu1 %v2934_v22 }
 0x231   : > { %2714 = vmatmul.mubr.msk.bf16.vlgmr.msra.gmra.mxu1 %vm661_vm0, %v3116_v53 }
 0x232   : > { %2725 = vmatprep.mubr.msk.bf16.mxu1 %vm2935_vm1, %v2934_v22 }
 0x2e1   : > { %v976_v20 = vpop.f32.mrf.mxu1 }
 0x2e2   : > { %v982_v21 = vmul.f32 0.35355338, %v976_v20  ;;  %v1041_v20 = vld [vmem:[%s3444_s13] sm:$0xf] }
 0x2e3   : > { %v2685_v23 = vpop.f32.mrf.mxu1 }
 0x2e4   : > { %v984_v24 = vsel %vm983_vm3, %v982_v21, -inf }
 0x2e5   : > { %985 = vmax.xlane.f32.xlu0 %v984_v24  ;;  %v979_v25 = vpop.f32.mrf.mxu1  ;;  %v1398_v24 = vsel %vm1350_vm4, %v1041_v20, 0 }
 0x2e6   : > { %v2876_v25 = vld [vmem:[%s3440_s9 + $0x28] sm:$0xff]  }
 0x2e7   : > { %v2686_v26 = vpop.f32.mrf.mxu1 }
 0x2e9   : > { %v1111_v27 = vpop.f32.mrf.mxu1 }
 0x2ea   : > { %v1112_v3 = vadd.f32 %v2485_v1, %v1111_v27  ;;  %v2877_v27 = vld [vmem:[%s3440_s9 + $0x20] sm:$0xff]  }
 0x2eb   : > { %v2699_v28 = vpop.f32.mrf.mxu1  ;;  %v2527_v1 = vld [vmem:[%s3443_s12 + $0x2] ss:$0 sm:$0xff] }
 0x2ec   : > { %v1239_v4 = vpack.c.bf16 %v1112_v3, %v1112_v3 }
 0x2ed   : > { %v1114_v29 = vpop.f32.mrf.mxu1 }
 0x2ee   : > { %v2878_v29 = vld [vmem:[%s3438_s7 + $0x28] sm:$0xff]  }
 0x2ef   : > { %v2700_v30 = vpop.f32.mrf.mxu1 }
 0x2f1   : > { %v1232_v31 = vpop.f32.mrf.mxu1 }
 0x2f2   : > { %v1233_v35 = vadd.f32 %v2495_v32, %v1232_v31 }
 0x2f3   : > { %v2715_v33 = vpop.f32.mrf.mxu1 }
 0x2f4   : > { %v2879_v33 = vld [vmem:[%s3438_s7 + $0x20] sm:$0xff]  }
 0x2f5   : > { %v1235_v34 = vpop.f32.mrf.mxu1 }
 0x2f6   : > { %v1236_v36 = vadd.f32 %v2495_v32, %v1235_v34 }
 0x2f7   : > { %v2716_v37 = vpop.f32.mrf.mxu1 }
 0x2f8   : > { %v1300_v38 = vpack.c.bf16 %v1236_v36, %v1233_v35  ;;  %v2880_v36 = vld [vmem:[%s3442_s11 + $0x28] sm:$0xff]  }
 0x2fa   : > { %2724 = vmatpush3.bf16.msra.mxu1 %v1300_v38 }
 0x2fb   : > { %2735 = vmatprep.subr.bf16.mxu1 %v2934_v22 }
 0x36e   : > { %v986_v39 = vpop.xlane.xlu0 %985 }
 0x36f   : > { %v987_v40 = vsub.f32 %v982_v21, %v986_v39  ;;  %v2881_v39 = vld [vmem:[%s3442_s11 + $0x20] sm:$0xff]  }
 0x371   : > { %v988_v41 = vmul.f32 1.442695, %v987_v40 }
 0x373   : > { %2904 = vpow2.f32 %v988_v41 }
 0x380   : > { %v2905_v42 = vpop.eup %2904 }
 0x381   : > { %v990_v43 = vsel %vm983_vm3, %v2905_v42, 0.0 }
 0x382   : > { %991 = vadd.xlane.f32.xlu1 %v990_v43 }
 0x40b   : > { %v992_v45 = vpop.xlane.xlu1 %991 }
 0x40c   : > { %2906 = vrcp.f32 %v992_v45 }
 0x419   : > { %v2907_v46 = vpop.eup %2906 }
 0x41a   : > { %v994_v47 = vmul.f32 %v2907_v46, %v2905_v42  ;;  %v2522_v42 = vld [vmem:[%s3441_s10 + $0x2] ss:$0 sm:$0xff] }
 0x41c   : > { %v995_v49 = vpack.c.bf16 %v994_v47, %v994_v47 }
 0x41e   : > { %2690 = vmatmul.mubr.msk.bf16.vlgmr.msra.gmra.mxu0 %vm983_vm3, %v995_v49 }
 0x41f   : > { %2702 = vmatpush3.bf16.msra.mxu0 %v2874_v48  ;;  %2705 = vmatprep.mubr.msk.bf16.mxu0 %vm2935_vm1, %v2934_v22 }
 0x420   : > { %2703 = vmatprep.subr.bf16.mxu0 %v2934_v22 }
 0x423   : > { %2704 = vmatpush3.bf16.msra.mxu0 %v2875_v50 }
 0x424   : > { %2717 = vmatprep.subr.bf16.mxu0 %v2934_v22 }
 0x426   : > { %2706 = vmatmul.mubr.msk.bf16.vlgmr.msra.gmra.mxu0 %vm661_vm0, %v3116_v53 }
 0x427   : > { %2719 = vmatprep.mubr.msk.bf16.mxu0 %vm2935_vm1, %v2934_v22 }
 0x4de   : > { %v1034_v51 = vpop.f32.mrf.mxu0 }
 0x4df   : > { %v1040_v26 = vpack.c.bf16 %v1034_v51, %v1034_v51 }
 0x4e0   : > { %v2691_v52 = vpop.f32.mrf.mxu0 }
 0x4e2   : > { %v1037_v54 = vpop.f32.mrf.mxu0 }
 0x4e4   : > { %v2692_v55 = vpop.f32.mrf.mxu0 }
 0x4e6   : > { %v1171_v56 = vpop.f32.mrf.mxu0 }
 0x4e7   : > { %v1172_v60 = vadd.f32 %v2490_v57, %v1171_v56  ;;  %v2517_v56 = vld [vmem:[%s3439_s8 + $0x2] ss:$0 sm:$0xff] }
 0x4e8   : > { %v2707_v58 = vpop.f32.mrf.mxu0 }
 0x4ea   : > { %v1174_v59 = vpop.f32.mrf.mxu0 }
 0x4eb   : > { %v1175_v61 = vadd.f32 %v2490_v57, %v1174_v59 }
 0x4ec   : > { %v2708_v62 = vpop.f32.mrf.mxu0 }
 0x4ed   : > { %v1240_v63 = vpack.c.bf16 %v1175_v61, %v1172_v60 }
 0x4ef   : > { %v1245_v2 = vsel %vm935_vm2, %v1240_v63, 0 }
 0x4f0   : > { %2718 = vmatpush3.bf16.xpose.msra.mxu0 %v1245_v2 }
 0x4f1   : > { %2729 = vmatprep.subr.bf16.mxu0 %v2934_v22 }
 0x4f7   : > { %2720 = vmatmul.mubr.msk.bf16.vlgmr.msra.gmra.mxu0 %vm935_vm2, %v1239_v4 }
 0x4f8   : > { %2731 = vmatprep.mubr.msk.bf16.mxu0 %vm2935_vm1, %v2934_v22  ;;  %2730 = vmatpush3.bf16.msra.mxu0 %v1352_v17 }
 0x4f9   : > { %2741 = vmatprep.subr.bf16.mxu0 %v2934_v22 }
 0x5b7   : > { %v1281_v5 = vpop.f32.mrf.mxu0 }
 0x5b8   : > { %v1287_v6 = vmul.f32 0.35355338, %v1281_v5 }
 0x5b9   : > { %v2721_v7 = vpop.f32.mrf.mxu0 }
 0x5ba   : > { %v1288_v8 = vsel %vm983_vm3, %v1287_v6, -inf }
 0x5bb   : > { %1289 = vmax.xlane.f32.xlu0 %v1288_v8  ;;  %v1284_v9 = vpop.f32.mrf.mxu0 }
 0x5bd   : > { %v2722_v10 = vpop.f32.mrf.mxu0 }
 0x644   : > { %v1290_v11 = vpop.xlane.xlu0 %1289 }
 0x645   : > { %v1291_v12 = vsub.f32 %v1287_v6, %v1290_v11 }
 0x647   : > { %v1292_v13 = vmul.f32 1.442695, %v1291_v12 }
 0x649   : > { %2908 = vpow2.f32 %v1292_v13 }
 0x656   : > { %v2909_v14 = vpop.eup %2908 }
 0x657   : > { %v1294_v15 = vsel %vm983_vm3, %v2909_v14, 0.0 }
 0x658   : > { %1295 = vadd.xlane.f32.xlu1 %v1294_v15 }
 0x6e1   : > { %v1296_v18 = vpop.xlane.xlu1 %1295 }
 0x6e2   : > { %2910 = vrcp.f32 %v1296_v18 }
 0x6ef   : > { %v2911_v19 = vpop.eup %2910 }
 0x6f0   : > { %v1298_v21 = vmul.f32 %v2911_v19, %v2909_v14  ;;  %v2533_v19 = vld [vmem:[%s3444_s13 + $0x8] sm:$0xf] }
 0x6f1   : > { %v1749_v20 = vsel %vm1350_vm4, %v2533_v19, 0 }
 0x6f2   : > { %v1299_v23 = vpack.c.bf16 %v1298_v21, %v1298_v21 }
 0x6f4   : > { %2726 = vmatmul.mubr.msk.bf16.vlgmr.msra.gmra.mxu1 %vm983_vm3, %v1299_v23 }
 0x6f5   : > { %2736 = vmatpush3.bf16.msra.mxu1 %v1398_v24  ;;  %2737 = vmatprep.mubr.msk.bf16.mxu1 %vm2935_vm1, %v2934_v22 }
 0x6f6   : > { %2749 = vmatprep.subr.bf16.mxu1 %v2934_v22 }
 0x6fc   : > { %2738 = vmatmul.mubr.msk.bf16.vlgmr.msra.gmra.mxu1 %vm935_vm2, %v1040_v26 }
 0x6fd   : > { %2750 = vmatpush3.bf16.msra.mxu1 %v2876_v25  ;;  %2753 = vmatprep.mubr.msk.bf16.mxu1 %vm2935_vm1, %v2934_v22  ;;  %v2882_v25 = vld [vmem:[%s3438_s7 + $0x38] sm:$0xff]  }
 0x6fe   : > { %2751 = vmatprep.subr.bf16.mxu1 %v2934_v22 }
 0x701   : > { %2752 = vmatpush3.bf16.msra.mxu1 %v2877_v27  ;;  %v2883_v27 = vld [vmem:[%s3438_s7 + $0x30] sm:$0xff]  }
 0x702   : > { %2765 = vmatprep.subr.bf16.mxu1 %v2934_v22 }
 0x704   : > { %2754 = vmatmul.mubr.msk.bf16.vlgmr.msra.gmra.mxu1 %vm661_vm0, %v3116_v53 }
 0x705   : > { %2767 = vmatprep.mubr.msk.bf16.mxu1 %vm2935_vm1, %v2934_v22 }
 0x7b4   : > { %v1338_v28 = vpop.f32.mrf.mxu1 }
 0x7b5   : > { %v1344_v30 = vpack.c.bf16 %v1338_v28, %v1338_v28  ;;  %v2884_v28 = vld [vmem:[%s3442_s11 + $0x38] sm:$0xff]  }
 0x7b6   : > { %v2727_v31 = vpop.f32.mrf.mxu1 }
 0x7b7   : > { %2732 = vmatmul.mubr.msk.bf16.vlgmr.msra.gmra.mxu0 %vm935_vm2, %v1344_v30  ;;  %v2886_v30 = vld [vmem:[%s3440_s9 + $0x38] sm:$0xff]  }
 0x7b8   : > { %v1341_v32 = vpop.f32.mrf.mxu1  ;;  %2742 = vmatpush3.bf16.msra.mxu0 %v2878_v29  ;;  %2745 = vmatprep.mubr.msk.bf16.mxu0 %vm2935_vm1, %v2934_v22  ;;  %v2885_v29 = vld [vmem:[%s3442_s11 + $0x30] sm:$0xff]  }
 0x7b9   : > { %2743 = vmatprep.subr.bf16.mxu0 %v2934_v22 }
 0x7ba   : > { %v2728_v34 = vpop.f32.mrf.mxu1 }
 0x7bb   : > { %v2887_v34 = vld [vmem:[%s3440_s9 + $0x30] sm:$0xff]  }
 0x7bc   : > { %v3243_v35 = vpop.f32.mrf.mxu1  ;;  %2744 = vmatpush3.bf16.msra.mxu0 %v2879_v33 }
 0x7bd   : > { %2757 = vmatprep.subr.bf16.mxu0 %v2934_v22 }
 0x7be   : > { %v2739_v37 = vpop.f32.mrf.mxu1 }
 0x7bf   : > { %2746 = vmatmul.mubr.msk.bf16.vlgmr.msra.gmra.mxu0 %vm661_vm0, %v3100_v44 }
 0x7c0   : > { %v1437_v38 = vpop.f32.mrf.mxu1  ;;  %2758 = vmatpush3.bf16.msra.mxu0 %v2880_v36  ;;  %2761 = vmatprep.mubr.msk.bf16.mxu0 %vm2935_vm1, %v2934_v22 }
 0x7c1   : > { %2759 = vmatprep.subr.bf16.mxu0 %v2934_v22 }
 0x7c2   : > { %v2740_v40 = vpop.f32.mrf.mxu1 }
 0x7c4   : > { %v1569_v41 = vpop.f32.mrf.mxu1  ;;  %2760 = vmatpush3.bf16.msra.mxu0 %v2881_v39 }
 0x7c5   : > { %2771 = vmatprep.subr.bf16.mxu0 %v2934_v22  ;;  %v1570_v46 = vadd.f32 %v2522_v42, %v1569_v41 }
 0x7c6   : > { %v2755_v43 = vpop.f32.mrf.mxu1 }
 0x7c7   : > { %2762 = vmatmul.mubr.msk.bf16.vlgmr.msra.gmra.mxu0 %vm661_vm0, %v3116_v53 }
 0x7c8   : > { %v1572_v45 = vpop.f32.mrf.mxu1  ;;  %2773 = vmatprep.mubr.msk.bf16.mxu0 %vm2935_vm1, %v2934_v22 }
 0x7c9   : > { %v1573_v47 = vadd.f32 %v2522_v42, %v1572_v45  ;;  %v2558_v42 = vld [vmem:[%s3443_s12 + $0x3] ss:$0 sm:$0xff] }
 0x7ca   : > { %v2756_v48 = vpop.f32.mrf.mxu1 }
 0x7cb   : > { %v1638_v49 = vpack.c.bf16 %v1573_v47, %v1570_v46 }
 0x7cd   : > { %v1643_v50 = vsel %vm935_vm2, %v1638_v49, 0 }
 0x7ce   : > { %2766 = vmatpush3.bf16.xpose.msra.mxu1 %v1643_v50 }
 0x7cf   : > { %2777 = vmatprep.subr.bf16.mxu1 %v2934_v22 }
 0x877   : > { %v3267_v51 = vpop.f32.mrf.mxu0 }
 0x879   : > { %v2733_v52 = vpop.f32.mrf.mxu0 }
 0x87b   : > { %v1391_v54 = vpop.f32.mrf.mxu0 }
 0x87d   : > { %v2734_v55 = vpop.f32.mrf.mxu0 }
 0x87f   : > { %v1509_v57 = vpop.f32.mrf.mxu0 }
 0x880   : > { %v1510_v58 = vadd.f32 %v2517_v56, %v1509_v57 }
 0x881   : > { %v2747_v59 = vpop.f32.mrf.mxu0 }
 0x882   : > { %v1637_v60 = vpack.c.bf16 %v1510_v58, %v1510_v58  ;;  %v2553_v58 = vld [vmem:[%s3441_s10 + $0x3] ss:$0 sm:$0xff] }
 0x883   : > { %v1512_v61 = vpop.f32.mrf.mxu0 }
 0x884   : > { %2768 = vmatmul.mubr.msk.bf16.vlgmr.msra.gmra.mxu1 %vm935_vm2, %v1637_v60 }
 0x885   : > { %v2748_v62 = vpop.f32.mrf.mxu0  ;;  %2779 = vmatprep.mubr.msk.bf16.mxu1 %vm2935_vm1, %v2934_v22  ;;  %2778 = vmatpush3.bf16.msra.mxu1 %v1749_v20 }
 0x886   : > { %2791 = vmatprep.subr.bf16.mxu1 %v2934_v22 }
 0x887   : > { %v1630_v63 = vpop.f32.mrf.mxu0 }
 0x888   : > { %v1631_v4 = vadd.f32 %v2527_v1, %v1630_v63 }
 0x889   : > { %v2763_v2 = vpop.f32.mrf.mxu0 }
 0x88b   : > { %v1633_v3 = vpop.f32.mrf.mxu0 }
 0x88c   : > { %v1634_v5 = vadd.f32 %v2527_v1, %v1633_v3 }
 0x88d   : > { %v2764_v6 = vpop.f32.mrf.mxu0 }
 0x88e   : > { %v1698_v7 = vpack.c.bf16 %v1634_v5, %v1631_v4 }
 0x890   : > { %2772 = vmatpush3.bf16.msra.mxu0 %v1698_v7 }
 0x891   : > { %2783 = vmatprep.subr.bf16.mxu0 %v2934_v22 }
 0x944   : > { %v1679_v8 = vpop.f32.mrf.mxu1 }
 0x945   : > { %v1685_v9 = vmul.f32 0.35355338, %v1679_v8 }
 0x946   : > { %v2769_v10 = vpop.f32.mrf.mxu1 }
 0x947   : > { %v1686_v11 = vsel %vm983_vm3, %v1685_v9, -inf }
 0x948   : > { %1687 = vmax.xlane.f32.xlu0 %v1686_v11  ;;  %v1682_v12 = vpop.f32.mrf.mxu1 }
 0x94a   : > { %v2770_v13 = vpop.f32.mrf.mxu1 }
 0x9d1   : > { %v1688_v14 = vpop.xlane.xlu0 %1687 }
 0x9d2   : > { %v1689_v15 = vsub.f32 %v1685_v9, %v1688_v14 }
 0x9d4   : > { %v1690_v16 = vmul.f32 1.442695, %v1689_v15  ;;  %v2564_v15 = vld [vmem:[%s3444_s13 + $0xc] sm:$0xf] }
 0x9d6   : > { %2912 = vpow2.f32 %v1690_v16  ;;  %v2101_v16 = vsel %vm1350_vm4, %v2564_v15, 0 }
 0x9e3   : > { %v2913_v17 = vpop.eup %2912 }
 0x9e4   : > { %v1692_v18 = vsel %vm983_vm3, %v2913_v17, 0.0 }
 0x9e5   : > { %1693 = vadd.xlane.f32.xlu1 %v1692_v18 }
 0xa6e   : > { %v1694_v21 = vpop.xlane.xlu1 %1693 }
 0xa6f   : > { %2914 = vrcp.f32 %v1694_v21 }
 0xa7c   : > { %v2915_v23 = vpop.eup %2914 }
 0xa7d   : > { %v1696_v24 = vmul.f32 %v2915_v23, %v2913_v17 }
 0xa7f   : > { %v1697_v26 = vpack.c.bf16 %v1696_v24, %v1696_v24 }
 0xa81   : > { %2774 = vmatmul.mubr.msk.bf16.vlgmr.msra.gmra.mxu0 %vm983_vm3, %v1697_v26 }
 0xa82   : > { %2784 = vmatpush3.bf16.msra.mxu0 %v2882_v25  ;;  %2787 = vmatprep.mubr.msk.bf16.mxu0 %vm2935_vm1, %v2934_v22 }
 0xa83   : > { %2785 = vmatprep.subr.bf16.mxu0 %v2934_v22 }
 0xa86   : > { %2786 = vmatpush3.bf16.msra.mxu0 %v2883_v27 }
 0xa87   : > { %2799 = vmatprep.subr.bf16.mxu0 %v2934_v22 }
 0xa89   : > { %2788 = vmatmul.mubr.msk.bf16.vlgmr.msra.gmra.mxu0 %vm661_vm0, %v3100_v44 }
 0xa8a   : > { %2800 = vmatpush3.bf16.msra.mxu0 %v2884_v28  ;;  %2803 = vmatprep.mubr.msk.bf16.mxu0 %vm2935_vm1, %v2934_v22 }
 0xa8b   : > { %2801 = vmatprep.subr.bf16.mxu0 %v2934_v22 }
 0xa8e   : > { %2802 = vmatpush3.bf16.msra.mxu0 %v2885_v29  ;;  %v2566_v29 = vld [vmem:[%s3445_s14] ss:$0 sm:$0xff] }
 0xa8f   : > { %2813 = vmatprep.subr.bf16.mxu0 %v2934_v22 }
 0xa91   : > { %2804 = vmatmul.mubr.msk.bf16.vlgmr.msra.gmra.mxu0 %vm661_vm0, %v3116_v53 }
 0xa92   : > { %2815 = vmatprep.mubr.msk.bf16.mxu0 %vm2935_vm1, %v2934_v22 }
 0xb41   : > { %v1736_v44 = vpop.f32.mrf.mxu0 }
 0xb42   : > { %v1742_v31 = vpack.c.bf16 %v1736_v44, %v1736_v44 }
 0xb43   : > { %v2775_v32 = vpop.f32.mrf.mxu0 }
 0xb44   : > { %2780 = vmatmul.mubr.msk.bf16.vlgmr.msra.gmra.mxu1 %vm935_vm2, %v1742_v31 }
 0xb45   : > { %v1739_v33 = vpop.f32.mrf.mxu0  ;;  %2792 = vmatpush3.bf16.msra.mxu1 %v2886_v30  ;;  %2795 = vmatprep.mubr.msk.bf16.mxu1 %vm2935_vm1, %v2934_v22 }
 0xb46   : > { %2793 = vmatprep.subr.bf16.mxu1 %v2934_v22 }
 0xb47   : > { %v2776_v36 = vpop.f32.mrf.mxu0 }
 0xb49   : > { %v1861_v37 = vpop.f32.mrf.mxu0  ;;  %2794 = vmatpush3.bf16.msra.mxu1 %v2887_v34 }
 0xb4a   : > { %2807 = vmatprep.subr.bf16.mxu1 %v2934_v22 }
 0xb4b   : > { %v2789_v38 = vpop.f32.mrf.mxu0 }
 0xb4c   : > { %2796 = vmatmul.mubr.msk.bf16.vlgmr.msra.gmra.mxu1 %vm661_vm0, %v3116_v53  ;;  %v1435_v53 = vadd.f32 %v3243_v35, %v3267_v51  ;;  %v2548_v35 = vld [vmem:[%s3439_s8 + $0x3] ss:$0 sm:$0xff] }
 0xb4d   : > { %v1864_v39 = vpop.f32.mrf.mxu0  ;;  %2809 = vmatprep.mubr.msk.bf16.mxu1 %vm2935_vm1, %v2934_v22  ;;  %v1862_v2 = vadd.f32 %v2548_v35, %v1861_v37 }
 0xb4f   : > { %v2790_v40 = vpop.f32.mrf.mxu0  ;;  %v1989_v3 = vpack.c.bf16 %v1862_v2, %v1862_v2 }
 0xb51   : > { %v1982_v41 = vpop.f32.mrf.mxu0 }
 0xb52   : > { %v1983_v46 = vadd.f32 %v2558_v42, %v1982_v41  ;;  %v2889_v41 = vld [vmem:[%s3448_s17] sm:$0xff]  }
 0xb53   : > { %v2805_v43 = vpop.f32.mrf.mxu0 }
 0xb55   : > { %v1985_v45 = vpop.f32.mrf.mxu0 }
 0xb56   : > { %v1986_v47 = vadd.f32 %v2558_v42, %v1985_v45 }
 0xb57   : > { %v2806_v48 = vpop.f32.mrf.mxu0 }
 0xb58   : > { %v2050_v49 = vpack.c.bf16 %v1986_v47, %v1983_v46  ;;  %v2567_v47 = vld [vmem:[%s3446_s15] ss:$0 sm:$0xff] }
 0xb5a   : > { %2814 = vmatpush3.bf16.msra.mxu0 %v2050_v49  ;;  %v2568_v49 = vld [vmem:[%s3447_s16] ss:$0 sm:$0xff] }
 0xb5b   : > { %2825 = vmatprep.subr.bf16.mxu0 %v2934_v22 }
 0xc04   : > { %v1785_v50 = vpop.f32.mrf.mxu1 }
 0xc05   : > { %v1791_v52 = vadd.f32 %v1785_v50, %v1435_v53 }
 0xc06   : > { %v2781_v54 = vpop.f32.mrf.mxu1 }
 0xc07   : > { %v2890_v54 = vld [vmem:[%s3450_s19 + $0x38] sm:$0xff]  }
 0xc08   : > { %v1788_v55 = vpop.f32.mrf.mxu1 }
 0xc09   : > { %v2891_v55 = vld [vmem:[%s3450_s19 + $0x30] sm:$0xff]  }
 0xc0a   : > { %v2782_v56 = vpop.f32.mrf.mxu1 }
 0xc0b   : > { %v2892_v56 = vld [vmem:[%s3450_s19 + $0x28] sm:$0xff]  }
 0xc0c   : > { %v1921_v57 = vpop.f32.mrf.mxu1 }
 0xc0d   : > { %v1922_v61 = vadd.f32 %v2553_v58, %v1921_v57  ;;  %v2893_v57 = vld [vmem:[%s3450_s19 + $0x20] sm:$0xff]  }
 0xc0e   : > { %v2797_v59 = vpop.f32.mrf.mxu1 }
 0xc0f   : > { %v2895_v59 = vld [vmem:[%s3450_s19 + $0x10] sm:$0xff]  }
 0xc10   : > { %v1924_v60 = vpop.f32.mrf.mxu1 }
 0xc11   : > { %v1925_v62 = vadd.f32 %v2553_v58, %v1924_v60  ;;  %v2894_v58 = vld [vmem:[%s3450_s19 + $0x18] sm:$0xff]   ;;  %v2896_v60 = vld [vmem:[%s3450_s19 + $0x8] sm:$0xff]  }
 0xc12   : > { %v2798_v63 = vpop.f32.mrf.mxu1 }
 0xc13   : > { %v1990_v1 = vpack.c.bf16 %v1925_v62, %v1922_v61  ;;  %v2897_v61 = vld [vmem:[%s3450_s19] sm:$0xff]  }
 0xc14   : > { %v2569_v62 = vld [vmem:[%s3449_s18] ss:$0 sm:$0xff] }
 0xc15   : > { %v1995_v51 = vsel %vm935_vm2, %v1990_v1, 0 }
 0xc16   : > { %2808 = vmatpush3.bf16.xpose.msra.mxu1 %v1995_v51 }
 0xc17   : > { %2819 = vmatprep.subr.bf16.mxu1 %v2934_v22 }
 0xc1d   : > { %2810 = vmatmul.mubr.msk.bf16.vlgmr.msra.gmra.mxu1 %vm935_vm2, %v1989_v3 }
 0xc1e   : > { %2821 = vmatprep.mubr.msk.bf16.mxu1 %vm2935_vm1, %v2934_v22  ;;  %2820 = vmatpush3.bf16.msra.mxu1 %v2101_v16 }
 0xc1f   : > { %2833 = vmatprep.subr.bf16.mxu1 %v2934_v22 }
 0xcdd   : > { %v2031_v4 = vpop.f32.mrf.mxu1 }
 0xcde   : > { %v2037_v5 = vmul.f32 0.35355338, %v2031_v4 }
 0xcdf   : > { %v2811_v6 = vpop.f32.mrf.mxu1 }
 0xce0   : > { %v2038_v7 = vsel %vm983_vm3, %v2037_v5, -inf }
 0xce1   : > { %2039 = vmax.xlane.f32.xlu0 %v2038_v7  ;;  %v2034_v8 = vpop.f32.mrf.mxu1 }
 0xce3   : > { %v2812_v9 = vpop.f32.mrf.mxu1 }
 0xd6a   : > { %v2040_v10 = vpop.xlane.xlu0 %2039 }
 0xd6b   : > { %v2041_v11 = vsub.f32 %v2037_v5, %v2040_v10 }
 0xd6d   : > { %v2042_v12 = vmul.f32 1.442695, %v2041_v11 }
 0xd6f   : > { %2916 = vpow2.f32 %v2042_v12 }
 0xd7c   : > { %v2917_v13 = vpop.eup %2916 }
 0xd7d   : > { %v2044_v14 = vsel %vm983_vm3, %v2917_v13, 0.0 }
 0xd7e   : > { %2045 = vadd.xlane.f32.xlu1 %v2044_v14 }
 0xe07   : > { %v2046_v17 = vpop.xlane.xlu1 %2045 }
 0xe08   : > { %2918 = vrcp.f32 %v2046_v17 }
 0xe15   : > { %v2919_v18 = vpop.eup %2918 }
 0xe16   : > { %v2048_v19 = vmul.f32 %v2919_v18, %v2917_v13 }
 0xe18   : > { %v2049_v20 = vpack.c.bf16 %v2048_v19, %v2048_v19 }
 0xe1a   : > { %2816 = vmatmul.mubr.msk.bf16.vlgmr.msra.gmra.mxu0 %vm983_vm3, %v2049_v20 }
 0xe1b   : > { %2829 = vmatprep.mubr.msk.bf16.mxu0 %vm2935_vm1, %v2934_v22 }
 0xeda   : > { %v2088_v21 = vpop.f32.mrf.mxu0 }
 0xedb   : > { %v2094_v23 = vpack.c.bf16 %v2088_v21, %v2088_v21 }
 0xedc   : > { %v2817_v24 = vpop.f32.mrf.mxu0 }
 0xedd   : > { %2822 = vmatmul.mubr.msk.bf16.vlgmr.msra.gmra.mxu1 %vm935_vm2, %v2094_v23  ;;  %v2936_v23 = vmov -1.0  }
 0xede   : > { %v2091_v25 = vpop.f32.mrf.mxu0  ;;  %2849 = vmatprep.mubr.msk.bf16.mxu1 %vm2935_vm1, %v2934_v22  ;;  %2834 = vmatpush3.bf16.msra.mxu1 %v2890_v54 }
 0xedf   : > { %2835 = vmatprep.subr.bf16.mxu1 %v2934_v22 }
 0xee0   : > { %v2818_v26 = vpop.f32.mrf.mxu0 }
 0xee2   : > { %2836 = vmatpush3.bf16.msra.mxu1 %v2891_v55 }
 0xee3   : > { %2837 = vmatprep.subr.bf16.mxu1 %v2934_v22 }
 0xee6   : > { %2838 = vmatpush3.bf16.msra.mxu1 %v2892_v56 }
 0xee7   : > { %2839 = vmatprep.subr.bf16.mxu1 %v2934_v22 }
 0xeea   : > { %2840 = vmatpush3.bf16.msra.mxu1 %v2893_v57 }
 0xeeb   : > { %2841 = vmatprep.subr.bf16.mxu1 %v2934_v22 }
 0xeee   : > { %2842 = vmatpush3.bf16.msra.mxu1 %v2894_v58 }
 0xeef   : > { %2843 = vmatprep.subr.bf16.mxu1 %v2934_v22 }
 0xef2   : > { %2844 = vmatpush3.bf16.msra.mxu1 %v2895_v59 }
 0xef3   : > { %2845 = vmatprep.subr.bf16.mxu1 %v2934_v22 }
 0xef6   : > { %2846 = vmatpush3.bf16.msra.mxu1 %v2896_v60 }
 0xef7   : > { %2847 = vmatprep.subr.bf16.mxu1 %v2934_v22 }
 0xefa   : > { %2848 = vmatpush3.bf16.msra.mxu1 %v2897_v61 }
 0xf9d   : > { %v2137_v27 = vpop.f32.mrf.mxu1 }
 0xf9e   : > { %v2143_v28 = vadd.f32 %v2137_v27, %v1791_v52 }
 0xf9f   : > { %v2823_v44 = vpop.f32.mrf.mxu1 }
 0xfa0   : > { %v2144_v30 = vadd.f32 %v2143_v28, %v3058_v0  ;;  %v2888_v0 = vld [vmem:[%s3448_s17 + $0x8] sm:$0xff]  }
 0xfa1   : > { %v2140_v31 = vpop.f32.mrf.mxu1  ;;  %2826 = vmatpush3.bf16.msra.mxu0 %v2888_v0 }
 0xfa2   : > { %v3362_v32 = vadd.f32 %v2566_v29, %v2144_v30  ;;  %2827 = vmatprep.subr.bf16.mxu0 %v2934_v22  ;;  %v2581_v30 = vld [vmem:[%s3451_s20] ss:$0 sm:$0xff] }
 0xfa3   : > { %v2824_v33 = vpop.f32.mrf.mxu1 }
 0xfa4   : > { %v2155_v34 = vsel %vm661_vm0, %v3362_v32, 0.0  ;;  %v2390_v33 = vld [vmem:[%s3464_s3] sm:$0xff] }
 0xfa5   : > { %2156 = vadd.xlane.f32.xlu0 %v2155_v34  ;;  %2828 = vmatpush3.bf16.msra.mxu0 %v2889_v41 }
0x102e   : > { %v2157_v36 = vpop.xlane.xlu0 %2156 }
0x102f   : > { %v2158_v37 = vmul.f32 0.03125, %v2157_v36 }
0x1031   : > { %v2159_v38 = vsub.f32 %v3362_v32, %v2158_v37 }
0x1033   : > { %v2160_v39 = vmul.f32 %v2159_v38, %v2159_v38 }
0x1035   : > { %v2161_v40 = vsel %vm661_vm0, %v2160_v39, 0.0 }
0x1036   : > { %2162 = vadd.xlane.f32.xlu1 %v2161_v40 }
0x10bf   : > { %v2163_v42 = vpop.xlane.xlu1 %2162 }
0x10c0   : > { %v2164_v43 = vmul.f32 0.03125, %v2163_v42 }
0x10c2   : > { %v2165_v45 = vadd.f32 1e-05, %v2164_v43 }
0x10c4   : > { %2920 = vrsqrt.f32 %v2165_v45 }
0x10d1   : > { %v2921_v46 = vpop.eup %2920 }
0x10d2   : > { %v2167_v48 = vmul.f32 %v2921_v46, %v2159_v38 }
0x10d4   : > { %v2174_v53 = vmul.f32 %v2567_v47, %v2167_v48 }
0x10d6   : > { %v2181_v50 = vadd.f32 %v2568_v49, %v2174_v53 }
0x10d8   : > { %v2182_v52 = vpack.c.bf16 %v2181_v50, %v2181_v50 }
0x10da   : > { %2830 = vmatmul.mubr.msk.bf16.vlgmr.msra.gmra.mxu0 %vm661_vm0, %v2182_v52 }
0x119a   : > { %v2243_v63 = vpop.f32.mrf.mxu0 }
0x119b   : > { %v2244_v1 = vadd.f32 %v2569_v62, %v2243_v63 }
0x119c   : > { %v2831_v35 = vpop.f32.mrf.mxu0 }
0x119d   : > { %v2250_v51 = vmul.f32 0.70710677, %v2244_v1  ;;  %v2249_v26 = vmul.f32 0.5, %v2244_v1 }
0x119e   : > { %v2246_v2 = vpop.f32.mrf.mxu0 }
0x119f   : > { %v2253_v3 = vand.u32 2147483647, %v2250_v51  ;;  %vm2251_vm5 = vcmp.ge.f32.partialorder %v2250_v51, 0.0 }
0x11a0   : > { %v2832_v4 = vpop.f32.mrf.mxu0  ;;  %v2252_v24 = vsel %vm2251_vm5, 1.0, %v2936_v23 }
0x11a1   : > { %v2254_v5 = vmul.f32 0.3275911, %v2253_v3  ;;  %v2267_v22 = vsub.f32 0.0, %v2253_v3 }
0x11a3   : > { %v2255_v6 = vadd.f32 1.0, %v2254_v5  ;;  %v2268_v7 = vmul.f32 %v2267_v22, %v2253_v3 }
0x11a5   : > { %2922 = vrcp.f32 %v2255_v6  ;;  %v2269_v10 = vmul.f32 1.442695, %v2268_v7 }
0x11a7   : > { %2924 = vpow2.f32 %v2269_v10 }
0x11b2   : > { %v2923_v8 = vpop.eup %2922 }
0x11b3   : > { %v2258_v9 = vmul.f32 1.0614054, %v2923_v8 }
0x11b4   : > { %v2925_v19 = vpop.eup %2924 }
0x11b5   : > { %v2259_v11 = vadd.f32 -1.4531521, %v2258_v9 }
0x11b7   : > { %v2260_v12 = vmul.f32 %v2923_v8, %v2259_v11 }
0x11b9   : > { %v2261_v13 = vadd.f32 1.4214138, %v2260_v12 }
0x11bb   : > { %v2262_v14 = vmul.f32 %v2923_v8, %v2261_v13 }
0x11bd   : > { %v2263_v15 = vadd.f32 -0.28449672, %v2262_v14 }
0x11bf   : > { %v2264_v16 = vmul.f32 %v2923_v8, %v2263_v15 }
0x11c1   : > { %v2265_v17 = vadd.f32 0.2548296, %v2264_v16 }
0x11c3   : > { %v2266_v18 = vmul.f32 %v2923_v8, %v2265_v17 }
0x11c5   : > { %v2271_v20 = vmul.f32 %v2925_v19, %v2266_v18 }
0x11c7   : > { %v2272_v21 = vsub.f32 1.0, %v2271_v20 }
0x11c9   : > { %v2273_v25 = vmul.f32 %v2272_v21, %v2252_v24 }
0x11cb   : > { %v2274_v27 = vadd.f32 1.0, %v2273_v25 }
0x11cd   : > { %v2275_v28 = vmul.f32 %v2274_v27, %v2249_v26 }
0x11cf   : > { %v2276_v29 = vpack.c.bf16 %v2275_v28, %v2275_v28 }
0x11d1   : > { %2850 = vmatmul.mubr.bf16.vlgmr.msra.gmra.mxu1 %v2276_v29 }
0x1291   : > { %v2375_v44 = vpop.f32.mrf.mxu1 }
0x1292   : > { %v2381_v31 = vadd.f32 %v2375_v44, %v3362_v32 }
0x1293   : > { %v2851_v34 = vpop.f32.mrf.mxu1 }
0x1294   : > { %v2389_v36 = vadd.f32 %v2581_v30, %v2381_v31 }
0x1295   : > { %v2378_v37 = vpop.f32.mrf.mxu1 }
0x1296   : > { %v2391_v38 = vadd.f32 %v2390_v33, %v2389_v36 }
0x1297   : > { %v2852_v39 = vpop.f32.mrf.mxu1 }
0x1298   : > { %2392 = vst.msk [vmem:[%s654_s0] sm:$0xff] %vm661_vm0, %v2391_v38 }
0x1299 PF: > { %s31_s2 = sadd.s32 1, %s2932_s2  }
0x129a   : > { %p28_p4 = scmp.ge.s32.totalorder %s31_s2, 4  }
0x129c   :  { %30 = sbr.rel (!%p28_p4) target bundleno = 7 (0x7), region = 155 }

// kernel: _lambda_.6
= control target key start
LH: loop header
LB: loop body
LE: loop exit
PB: predicated region body
PF: predicated region fallthrough
CT: control target
= control target key end

     0   :  { %s2788_s30 = smov 0   ;;  %s2790_s10 = smov 0   ;;  %s3146_s0 = inlined_call_operand.vmem [shape: f32[2,8,32], index: 0, kind: input, shape index: {}]   ;;  %s3147_s1 = inlined_call_operand.vmem [shape: f32[1,1,32], index: 1, kind: input, shape index: {}]   ;;  %s3148_s2 = inlined_call_operand.vmem [shape: bf16[1,4,32,8], index: 2, kind: input, shape index: {}]   ;;  %s3149_s3 = inlined_call_operand.vmem [shape: bf16[1,4,32,8], index: 3, kind: input, shape index: {}]   ;;  %s3150_s4 = inlined_call_operand.vmem [shape: bf16[1,4,32,8], index: 4, kind: input, shape index: {}]   ;;  %s3151_s5 = inlined_call_operand.vmem [shape: bf16[1,4,8,32], index: 5, kind: input, shape index: {}]   ;;  %s3152_s6 = inlined_call_operand.vmem [shape: f32[1,1,32], index: 6, kind: input, shape index: {}]   ;;  %s3153_s7 = inlined_call_operand.vmem [shape: bf16[1,32,128], index: 7, kind: input, shape index: {}]   ;;  %s3154_s8 = inlined_call_operand.vmem [shape: bf16[1,128,32], index: 8, kind: input, shape index: {}]   ;;  %s3155_s9 = inlined_call_operand.vmem [shape: f32[2,8,32], index: 9, kind: output, shape index: {}]  }
   0x1   :  { %s2792_s11 = smov 0  }
   0x2 LB: > { %s31_s12 = sadd.s32 1, %s2729_s10  ;;  %p2253_p0 = scmp.ge.s32.totalorder %s2733_s11, 1  ;;  %s2733_s11 = sphi %s2792_s11, %s19_s11   ;;  %s2729_s10 = sphi %s2790_s10, %s3157_s10   ;;  %s2725_s30 = sphi %s2788_s30, %s3156_s30  }
   0x3   : > { %p33_p1 = scmp.ge.s32.totalorder %s31_s12, 2  ;;  %p374_p2 = scmp.lt.s32.totalorder %s2733_s11, 3 }
   0x5   : > { %s3159_s12 = smov (%p33_p1, %s31_s12), 0  ;;  %p375_p3 = pnand %p2253_p0, %p374_p2 }
   0x6   : > { %p444_p4 = scmp.lt.s32.totalorder (!%p375_p3), %s2725_s30, 1 }
   0x7   : > { %378 = sbr.rel (%p375_p3) target bundleno = 4742 (0x1286), region = 56 }
   0xc   : > { %s3161_s30 = smov (!%p444_p4, %s2725_s30), 1  ;;  %vm494_vm0 = vcmask 261120   ;;  %v2653_v8 = vld [vmem:[%s3148_s2 + $0x8] sm:$0xff]   ;;  %v2735_v9 = vmov 0.0   ;;  %v2654_v10 = vld [vmem:[%s3148_s2] sm:$0xff]   ;;  %vm2736_vm1 = vmmov 0   ;;  %v521_v44 = vlaneseq }
   0xd   : > { %s2254_s13 = sshll.u32 %s3161_s30, 3  ;;  %2430 = vmatprep.subr.bf16.mxu0 %v2735_v9  ;;  %2454 = vmatprep.subr.bf16.mxu1 %v2735_v9  ;;  %v2256_v15 = vld [vmem:[%s3147_s1] ss:$0 sm:$0xff]  ;;  %v2655_v18 = vld [vmem:[%s3149_s3 + $0x8] sm:$0xff]   ;;  %vm699_vm2 = vcmask 64512   ;;  %vm764_vm3 = vcmask 1043456  }
   0xe   : > { %s447_s16 = scalar_lea.vmem %s3146_s0, %s2254_s13  ;;  %2431 = vmatpush3.bf16.msra.mxu0 %v2653_v8  ;;  %2434 = vmatprep.mubr.msk.bf16.mxu0 %vm2736_vm1, %v2735_v9  ;;  %v2656_v20 = vld [vmem:[%s3149_s3] sm:$0xff]   ;;  %v2657_v21 = vld [vmem:[%s3150_s4 + $0x8] sm:$0xff]   ;;  %v2659_v34 = vld [vmem:[%s3148_s2 + $0x18] sm:$0xff]   ;;  %v2899_v45 = vshrl.u32 %v521_v44, 7  ;;  %v2901_v46 = vand.u32 127, %v521_v44  ;;  %s487_s19 = scalar_lea.vmem %s3155_s9, %s2254_s13 }
   0xf   : > { %v493_v0 = vld [vmem:[%s447_s16] sm:$0xff]  ;;  %2432 = vmatprep.subr.bf16.mxu0 %v2735_v9  ;;  %2456 = vmatprep.mubr.msk.bf16.mxu1 %vm2736_vm1, %v2735_v9  ;;  %v2660_v40 = vld [vmem:[%s3148_s2 + $0x10] sm:$0xff]   ;;  %v2661_v42 = vld [vmem:[%s3150_s4 + $0x18] sm:$0xff]  }
  0x10   : > { %495 = vst.msk [vmem:[#allocation2] sm:$0xff] %vm494_vm0, %v493_v0  ;;  %v2658_v22 = vld [vmem:[%s3150_s4] sm:$0xff]   ;;  %v2662_v43 = vld [vmem:[%s3150_s4 + $0x10] sm:$0xff]   ;;  %vm525_vm4 = vcmp.le.s32.totalorder %v2901_v46, %v2899_v45 }
  0x12   : > { %2433 = vmatpush3.bf16.msra.mxu0 %v2654_v10  ;;  %v2663_v10 = vld [vmem:[%s3149_s3 + $0x18] sm:$0xff]  }
  0x13   : > { %2438 = vmatprep.subr.bf16.mxu0 %v2735_v9 }
  0x17   : > { %v2815_v1 = vld [vmem:[#allocation2] sm:$0xff] }
  0x18   : > { %v499_v2 = vsel %vm494_vm0, %v2815_v1, 0.0 }
  0x19   : > { %500 = vadd.xlane.f32.xlu0 %v499_v2 }
  0xa2   : > { %v501_v3 = vpop.xlane.xlu0 %500 }
  0xa3   : > { %v503_v4 = vmul.f32 0.03125, %v501_v3 }
  0xa5   : > { %v504_v5 = vsub.f32 %v2815_v1, %v503_v4 }
  0xa7   : > { %v505_v6 = vmul.f32 %v504_v5, %v504_v5 }
  0xa9   : > { %v506_v7 = vsel %vm494_vm0, %v505_v6, 0.0 }
  0xaa   : > { %507 = vadd.xlane.f32.xlu0 %v506_v7 }
 0x133   : > { %v508_v11 = vpop.xlane.xlu0 %507 }
 0x134   : > { %v509_v12 = vmul.f32 0.03125, %v508_v11 }
 0x136   : > { %v510_v13 = vadd.f32 1e-05, %v509_v12  ;;  %v2664_v12 = vld [vmem:[%s3149_s3 + $0x10] sm:$0xff]  }
 0x138   : > { %2687 = vrsqrt.f32 %v510_v13 }
 0x145   : > { %v2688_v14 = vpop.eup %2687 }
 0x146   : > { %v512_v16 = vmul.f32 %v2688_v14, %v504_v5 }
 0x148   : > { %v519_v17 = vmul.f32 %v2256_v15, %v512_v16 }
 0x14a   : > { %v2841_v19 = vpack.c.bf16 %v519_v17, %v519_v17 }
 0x14c   : > { %2435 = vmatmul.mubr.msk.bf16.vlgmr.msra.gmra.mxu0 %vm494_vm0, %v2841_v19 }
 0x14d   : > { %2439 = vmatpush3.bf16.msra.mxu0 %v2655_v18  ;;  %2442 = vmatprep.mubr.msk.bf16.mxu0 %vm2736_vm1, %v2735_v9 }
 0x14e   : > { %2440 = vmatprep.subr.bf16.mxu0 %v2735_v9 }
 0x151   : > { %2441 = vmatpush3.bf16.msra.mxu0 %v2656_v20 }
 0x152   : > { %2446 = vmatprep.subr.bf16.mxu0 %v2735_v9 }
 0x154   : > { %2443 = vmatmul.mubr.msk.bf16.vlgmr.msra.gmra.mxu0 %vm494_vm0, %v2841_v19 }
 0x155   : > { %2447 = vmatpush3.bf16.msra.mxu0 %v2657_v21  ;;  %2450 = vmatprep.mubr.msk.bf16.mxu0 %vm2736_vm1, %v2735_v9 }
 0x156   : > { %2448 = vmatprep.subr.bf16.mxu0 %v2735_v9 }
 0x159   : > { %2449 = vmatpush3.bf16.msra.mxu0 %v2658_v22 }
 0x15a   : > { %2460 = vmatprep.subr.bf16.mxu0 %v2735_v9 }
 0x15c   : > { %2451 = vmatmul.mubr.msk.bf16.vlgmr.msra.gmra.mxu0 %vm494_vm0, %v2841_v19 }
 0x15d   : > { %2462 = vmatprep.mubr.msk.bf16.mxu0 %vm2736_vm1, %v2735_v9 }
 0x20c   : > { %v579_v23 = vpop.f32.mrf.mxu0 }
 0x20d   : > { %v697_v35 = vpack.c.bf16 %v579_v23, %v579_v23 }
 0x20e   : > { %v2436_v24 = vpop.f32.mrf.mxu0 }
 0x210   : > { %v582_v25 = vpop.f32.mrf.mxu0 }
 0x212   : > { %v2437_v26 = vpop.f32.mrf.mxu0 }
 0x214   : > { %v635_v27 = vpop.f32.mrf.mxu0 }
 0x215   : > { %v698_v28 = vpack.c.bf16 %v635_v27, %v635_v27 }
 0x216   : > { %v2444_v29 = vpop.f32.mrf.mxu0 }
 0x217   : > { %v704_v30 = vsel %vm699_vm2, %v698_v28, 0 }
 0x218   : > { %v638_v31 = vpop.f32.mrf.mxu0  ;;  %2455 = vmatpush3.bf16.xpose.msra.mxu1 %v704_v30 }
 0x219   : > { %2466 = vmatprep.subr.bf16.mxu1 %v2735_v9 }
 0x21a   : > { %v2445_v32 = vpop.f32.mrf.mxu0 }
 0x21c   : > { %v691_v33 = vpop.f32.mrf.mxu0 }
 0x21d   : > { %v760_v36 = vpack.c.bf16 %v691_v33, %v691_v33 }
 0x21e   : > { %v2452_v37 = vpop.f32.mrf.mxu0 }
 0x21f   : > { %v766_v38 = vsel %vm764_vm3, %v760_v36, 0  ;;  %2457 = vmatmul.mubr.msk.bf16.vlgmr.msra.gmra.mxu1 %vm699_vm2, %v697_v35  ;;  %v2291_v37 = vld [vmem:[%s3151_s5 + $0x4] sm:$0xf] }
 0x220   : > { %v694_v39 = vpop.f32.mrf.mxu0  ;;  %2461 = vmatpush3.bf16.msra.mxu0 %v766_v38  ;;  %2467 = vmatpush3.bf16.msra.mxu1 %v2659_v34  ;;  %v1097_v38 = vsel %vm764_vm3, %v2291_v37, 0 }
 0x221   : > { %2468 = vmatprep.subr.bf16.mxu1 %v2735_v9  ;;  %2470 = vmatprep.mubr.msk.bf16.mxu1 %vm2736_vm1, %v2735_v9 }
 0x222   : > { %v2453_v41 = vpop.f32.mrf.mxu0  ;;  %2474 = vmatprep.subr.bf16.mxu0 %v2735_v9 }
 0x223   : > { %v809_v41 = vld [vmem:[%s3151_s5] sm:$0xf] }
 0x224   : > { %2469 = vmatpush3.bf16.msra.mxu1 %v2660_v40  ;;  %v1143_v44 = vsel %vm764_vm3, %v809_v41, 0 }
 0x225   : > { %2482 = vmatprep.subr.bf16.mxu1 %v2735_v9 }
 0x227   : > { %2471 = vmatmul.mubr.msk.bf16.vlgmr.msra.gmra.mxu1 %vm494_vm0, %v2841_v19 }
 0x228   : > { %2483 = vmatpush3.bf16.msra.mxu1 %v2661_v42  ;;  %2486 = vmatprep.mubr.msk.bf16.mxu1 %vm2736_vm1, %v2735_v9 }
 0x229   : > { %2484 = vmatprep.subr.bf16.mxu1 %v2735_v9 }
 0x22c   : > { %2485 = vmatpush3.bf16.msra.mxu1 %v2662_v43 }
 0x22d   : > { %2496 = vmatprep.subr.bf16.mxu1 %v2735_v9 }
 0x22f   : > { %2487 = vmatmul.mubr.msk.bf16.vlgmr.msra.gmra.mxu1 %vm494_vm0, %v2841_v19 }
 0x230   : > { %2498 = vmatprep.mubr.msk.bf16.mxu1 %vm2736_vm1, %v2735_v9 }
 0x2df   : > { %v740_v47 = vpop.f32.mrf.mxu1 }
 0x2e0   : > { %v746_v48 = vmul.f32 0.35355338, %v740_v47  ;;  %v2665_v47 = vld [vmem:[%s3149_s3 + $0x28] sm:$0xff]  }
 0x2e1   : > { %v2458_v49 = vpop.f32.mrf.mxu1 }
 0x2e2   : > { %v747_v50 = vsel %vm525_vm4, %v746_v48, -1e+30  ;;  %v2666_v49 = vld [vmem:[%s3149_s3 + $0x20] sm:$0xff]  }
 0x2e3   : > { %v743_v51 = vpop.f32.mrf.mxu1  ;;  %v748_v52 = vsel %vm699_vm2, %v747_v50, -inf }
 0x2e4   : > { %749 = vmax.xlane.f32.xlu1 %v748_v52  ;;  %v2667_v51 = vld [vmem:[%s3148_s2 + $0x28] sm:$0xff]  }
 0x2e5   : > { %v2459_v53 = vpop.f32.mrf.mxu1 }
 0x2e7   : > { %v861_v54 = vpop.f32.mrf.mxu1 }
 0x2e8   : > { %v981_v24 = vpack.c.bf16 %v861_v54, %v861_v54 }
 0x2e9   : > { %v2472_v55 = vpop.f32.mrf.mxu1 }
 0x2ea   : > { %v2668_v55 = vld [vmem:[%s3148_s2 + $0x20] sm:$0xff]  }
 0x2eb   : > { %v864_v56 = vpop.f32.mrf.mxu1 }
 0x2ed   : > { %v2473_v57 = vpop.f32.mrf.mxu1 }
 0x2ef   : > { %v975_v58 = vpop.f32.mrf.mxu1 }
 0x2f0   : > { %v1043_v59 = vpack.c.bf16 %v975_v58, %v975_v58  ;;  %v2669_v58 = vld [vmem:[%s3150_s4 + $0x28] sm:$0xff]  }
 0x2f1   : > { %v2488_v60 = vpop.f32.mrf.mxu1 }
 0x2f2   : > { %v1048_v61 = vsel %vm764_vm3, %v1043_v59, 0 }
 0x2f3   : > { %v978_v62 = vpop.f32.mrf.mxu1  ;;  %2497 = vmatpush3.bf16.msra.mxu1 %v1048_v61  ;;  %v2670_v61 = vld [vmem:[%s3150_s4 + $0x20] sm:$0xff]  }
 0x2f4   : > { %2508 = vmatprep.subr.bf16.mxu1 %v2735_v9 }
 0x2f5   : > { %v2489_v63 = vpop.f32.mrf.mxu1 }
 0x36d   : > { %v750_v0 = vpop.xlane.xlu1 %749 }
 0x36e   : > { %v751_v2 = vsub.f32 %v747_v50, %v750_v0 }
 0x370   : > { %v752_v3 = vmul.f32 1.442695, %v751_v2 }
 0x372   : > { %2689 = vpow2.f32 %v752_v3 }
 0x37f   : > { %v2690_v4 = vpop.eup %2689 }
 0x380   : > { %v754_v5 = vsel %vm699_vm2, %v2690_v4, 0.0 }
 0x381   : > { %755 = vadd.xlane.f32.xlu1 %v754_v5 }
 0x40a   : > { %v756_v6 = vpop.xlane.xlu1 %755 }
 0x40b   : > { %2691 = vrcp.f32 %v756_v6 }
 0x418   : > { %v2692_v7 = vpop.eup %2691 }
 0x419   : > { %v758_v8 = vmul.f32 %v2692_v7, %v2690_v4 }
 0x41b   : > { %v759_v11 = vpack.c.bf16 %v758_v8, %v758_v8 }
 0x41d   : > { %2463 = vmatmul.mubr.msk.bf16.vlgmr.msra.gmra.mxu0 %vm699_vm2, %v759_v11 }
 0x41e   : > { %2475 = vmatpush3.bf16.msra.mxu0 %v2663_v10  ;;  %2478 = vmatprep.mubr.msk.bf16.mxu0 %vm2736_vm1, %v2735_v9 }
 0x41f   : > { %2476 = vmatprep.subr.bf16.mxu0 %v2735_v9 }
 0x422   : > { %2477 = vmatpush3.bf16.msra.mxu0 %v2664_v12 }
 0x423   : > { %2490 = vmatprep.subr.bf16.mxu0 %v2735_v9 }
 0x425   : > { %2479 = vmatmul.mubr.msk.bf16.vlgmr.msra.gmra.mxu0 %vm494_vm0, %v2841_v19 }
 0x426   : > { %2492 = vmatprep.mubr.msk.bf16.mxu0 %vm2736_vm1, %v2735_v9 }
 0x4dd   : > { %v802_v13 = vpop.f32.mrf.mxu0 }
 0x4de   : > { %v808_v48 = vpack.c.bf16 %v802_v13, %v802_v13 }
 0x4df   : > { %v2464_v14 = vpop.f32.mrf.mxu0 }
 0x4e1   : > { %v805_v15 = vpop.f32.mrf.mxu0 }
 0x4e3   : > { %v2465_v16 = vpop.f32.mrf.mxu0 }
 0x4e5   : > { %v918_v17 = vpop.f32.mrf.mxu0 }
 0x4e6   : > { %v982_v18 = vpack.c.bf16 %v918_v17, %v918_v17 }
 0x4e7   : > { %v2480_v20 = vpop.f32.mrf.mxu0 }
 0x4e8   : > { %v987_v21 = vsel %vm699_vm2, %v982_v18, 0 }
 0x4e9   : > { %v921_v22 = vpop.f32.mrf.mxu0  ;;  %2491 = vmatpush3.bf16.xpose.msra.mxu0 %v987_v21 }
 0x4ea   : > { %2502 = vmatprep.subr.bf16.mxu0 %v2735_v9 }
 0x4eb   : > { %v2481_v23 = vpop.f32.mrf.mxu0 }
 0x4f0   : > { %2493 = vmatmul.mubr.msk.bf16.vlgmr.msra.gmra.mxu0 %vm699_vm2, %v981_v24 }
 0x4f1   : > { %2504 = vmatprep.mubr.msk.bf16.mxu0 %vm2736_vm1, %v2735_v9  ;;  %2503 = vmatpush3.bf16.msra.mxu0 %v1097_v38 }
 0x4f2   : > { %2514 = vmatprep.subr.bf16.mxu0 %v2735_v9 }
 0x5b0   : > { %v1023_v25 = vpop.f32.mrf.mxu0 }
 0x5b1   : > { %v1029_v26 = vmul.f32 0.35355338, %v1023_v25 }
 0x5b2   : > { %v2494_v27 = vpop.f32.mrf.mxu0 }
 0x5b3   : > { %v1030_v28 = vsel %vm525_vm4, %v1029_v26, -1e+30 }
 0x5b4   : > { %v1026_v29 = vpop.f32.mrf.mxu0  ;;  %v1031_v30 = vsel %vm699_vm2, %v1030_v28, -inf }
 0x5b5   : > { %1032 = vmax.xlane.f32.xlu0 %v1031_v30 }
 0x5b6   : > { %v2495_v31 = vpop.f32.mrf.mxu0 }
 0x63e   : > { %v1033_v32 = vpop.xlane.xlu0 %1032 }
 0x63f   : > { %v1034_v33 = vsub.f32 %v1030_v28, %v1033_v32 }
 0x641   : > { %v1035_v34 = vmul.f32 1.442695, %v1034_v33 }
 0x643   : > { %2693 = vpow2.f32 %v1035_v34 }
 0x650   : > { %v2694_v35 = vpop.eup %2693 }
 0x651   : > { %v1037_v36 = vsel %vm699_vm2, %v2694_v35, 0.0 }
 0x652   : > { %1038 = vadd.xlane.f32.xlu1 %v1037_v36 }
 0x6db   : > { %v1039_v39 = vpop.xlane.xlu1 %1038 }
 0x6dc   : > { %2695 = vrcp.f32 %v1039_v39 }
 0x6e9   : > { %v2696_v40 = vpop.eup %2695 }
 0x6ea   : > { %v1041_v42 = vmul.f32 %v2696_v40, %v2694_v35  ;;  %v2317_v35 = vld [vmem:[%s3151_s5 + $0x8] sm:$0xf]  ;;  %v2671_v40 = vld [vmem:[%s3148_s2 + $0x38] sm:$0xff]  }
 0x6eb   : > { %v1472_v36 = vsel %vm764_vm3, %v2317_v35, 0 }
 0x6ec   : > { %v1042_v43 = vpack.c.bf16 %v1041_v42, %v1041_v42  ;;  %v2672_v42 = vld [vmem:[%s3148_s2 + $0x30] sm:$0xff]  }
 0x6ee   : > { %2499 = vmatmul.mubr.msk.bf16.vlgmr.msra.gmra.mxu1 %vm699_vm2, %v1042_v43  ;;  %v2673_v43 = vld [vmem:[%s3150_s4 + $0x38] sm:$0xff]  }
 0x6ef   : > { %2509 = vmatpush3.bf16.msra.mxu1 %v1143_v44  ;;  %2510 = vmatprep.mubr.msk.bf16.mxu1 %vm2736_vm1, %v2735_v9  ;;  %v2674_v44 = vld [vmem:[%s3150_s4 + $0x30] sm:$0xff]  }
 0x6f0   : > { %2522 = vmatprep.subr.bf16.mxu1 %v2735_v9 }
 0x6f6   : > { %2511 = vmatmul.mubr.msk.bf16.vlgmr.msra.gmra.mxu1 %vm699_vm2, %v808_v48  ;;  %v2675_v48 = vld [vmem:[%s3149_s3 + $0x38] sm:$0xff]  }
 0x6f7   : > { %2523 = vmatpush3.bf16.msra.mxu1 %v2665_v47  ;;  %2526 = vmatprep.mubr.msk.bf16.mxu1 %vm2736_vm1, %v2735_v9 }
 0x6f8   : > { %2524 = vmatprep.subr.bf16.mxu1 %v2735_v9 }
 0x6fb   : > { %2525 = vmatpush3.bf16.msra.mxu1 %v2666_v49 }
 0x6fc   : > { %2538 = vmatprep.subr.bf16.mxu1 %v2735_v9 }
 0x6fe   : > { %2527 = vmatmul.mubr.msk.bf16.vlgmr.msra.gmra.mxu1 %vm494_vm0, %v2841_v19 }
 0x6ff   : > { %2540 = vmatprep.mubr.msk.bf16.mxu1 %vm2736_vm1, %v2735_v9 }
 0x7ae   : > { %v1084_v50 = vpop.f32.mrf.mxu1 }
 0x7af   : > { %v1090_v52 = vpack.c.bf16 %v1084_v50, %v1084_v50 }
 0x7b0   : > { %v2500_v53 = vpop.f32.mrf.mxu1 }
 0x7b1   : > { %2505 = vmatmul.mubr.msk.bf16.vlgmr.msra.gmra.mxu0 %vm699_vm2, %v1090_v52  ;;  %v2676_v52 = vld [vmem:[%s3149_s3 + $0x30] sm:$0xff]  }
 0x7b2   : > { %v1087_v54 = vpop.f32.mrf.mxu1  ;;  %2515 = vmatpush3.bf16.msra.mxu0 %v2667_v51  ;;  %2518 = vmatprep.mubr.msk.bf16.mxu0 %vm2736_vm1, %v2735_v9 }
 0x7b3   : > { %2516 = vmatprep.subr.bf16.mxu0 %v2735_v9 }
 0x7b4   : > { %v2501_v56 = vpop.f32.mrf.mxu1 }
 0x7b6   : > { %v2975_v57 = vpop.f32.mrf.mxu1  ;;  %2517 = vmatpush3.bf16.msra.mxu0 %v2668_v55 }
 0x7b7   : > { %2530 = vmatprep.subr.bf16.mxu0 %v2735_v9 }
 0x7b8   : > { %v2512_v59 = vpop.f32.mrf.mxu1 }
 0x7b9   : > { %2519 = vmatmul.mubr.msk.bf16.vlgmr.msra.gmra.mxu0 %vm494_vm0, %v2841_v19 }
 0x7ba   : > { %v1182_v60 = vpop.f32.mrf.mxu1  ;;  %2531 = vmatpush3.bf16.msra.mxu0 %v2669_v58  ;;  %2534 = vmatprep.mubr.msk.bf16.mxu0 %vm2736_vm1, %v2735_v9 }
 0x7bb   : > { %2532 = vmatprep.subr.bf16.mxu0 %v2735_v9 }
 0x7bc   : > { %v2513_v62 = vpop.f32.mrf.mxu1 }
 0x7be   : > { %v1293_v63 = vpop.f32.mrf.mxu1  ;;  %2533 = vmatpush3.bf16.msra.mxu0 %v2670_v61 }
 0x7bf   : > { %v1357_v0 = vpack.c.bf16 %v1293_v63, %v1293_v63  ;;  %2544 = vmatprep.subr.bf16.mxu0 %v2735_v9 }
 0x7c0   : > { %v2528_v2 = vpop.f32.mrf.mxu1 }
 0x7c1   : > { %v1362_v3 = vsel %vm699_vm2, %v1357_v0, 0  ;;  %2535 = vmatmul.mubr.msk.bf16.vlgmr.msra.gmra.mxu0 %vm494_vm0, %v2841_v19 }
 0x7c2   : > { %v1296_v4 = vpop.f32.mrf.mxu1  ;;  %2539 = vmatpush3.bf16.xpose.msra.mxu1 %v1362_v3  ;;  %2546 = vmatprep.mubr.msk.bf16.mxu0 %vm2736_vm1, %v2735_v9 }
 0x7c3   : > { %2550 = vmatprep.subr.bf16.mxu1 %v2735_v9 }
 0x7c4   : > { %v2529_v5 = vpop.f32.mrf.mxu1 }
 0x871   : > { %v2996_v6 = vpop.f32.mrf.mxu0 }
 0x872   : > { %v1180_v2 = vadd.f32 %v2975_v57, %v2996_v6 }
 0x873   : > { %v2506_v7 = vpop.f32.mrf.mxu0 }
 0x875   : > { %v1136_v8 = vpop.f32.mrf.mxu0 }
 0x877   : > { %v2507_v10 = vpop.f32.mrf.mxu0 }
 0x879   : > { %v1236_v11 = vpop.f32.mrf.mxu0 }
 0x87a   : > { %v1356_v12 = vpack.c.bf16 %v1236_v11, %v1236_v11 }
 0x87b   : > { %v2520_v13 = vpop.f32.mrf.mxu0 }
 0x87c   : > { %2541 = vmatmul.mubr.msk.bf16.vlgmr.msra.gmra.mxu1 %vm699_vm2, %v1356_v12 }
 0x87d   : > { %v1239_v14 = vpop.f32.mrf.mxu0  ;;  %2552 = vmatprep.mubr.msk.bf16.mxu1 %vm2736_vm1, %v2735_v9  ;;  %2551 = vmatpush3.bf16.msra.mxu1 %v1472_v36 }
 0x87e   : > { %2564 = vmatprep.subr.bf16.mxu1 %v2735_v9 }
 0x87f   : > { %v2521_v15 = vpop.f32.mrf.mxu0 }
 0x881   : > { %v1350_v16 = vpop.f32.mrf.mxu0 }
 0x882   : > { %v1418_v17 = vpack.c.bf16 %v1350_v16, %v1350_v16 }
 0x883   : > { %v2536_v18 = vpop.f32.mrf.mxu0 }
 0x884   : > { %v1423_v20 = vsel %vm764_vm3, %v1418_v17, 0 }
 0x885   : > { %v1353_v21 = vpop.f32.mrf.mxu0  ;;  %2545 = vmatpush3.bf16.msra.mxu0 %v1423_v20 }
 0x886   : > { %2556 = vmatprep.subr.bf16.mxu0 %v2735_v9 }
 0x887   : > { %v2537_v22 = vpop.f32.mrf.mxu0 }
 0x93c   : > { %v1398_v23 = vpop.f32.mrf.mxu1 }
 0x93d   : > { %v1404_v24 = vmul.f32 0.35355338, %v1398_v23 }
 0x93e   : > { %v2542_v25 = vpop.f32.mrf.mxu1 }
 0x93f   : > { %v1405_v26 = vsel %vm525_vm4, %v1404_v24, -1e+30 }
 0x940   : > { %v1401_v27 = vpop.f32.mrf.mxu1  ;;  %v1406_v28 = vsel %vm699_vm2, %v1405_v26, -inf }
 0x941   : > { %1407 = vmax.xlane.f32.xlu0 %v1406_v28  ;;  %v2342_v27 = vld [vmem:[%s3151_s5 + $0xc] sm:$0xf] }
 0x942   : > { %v2543_v29 = vpop.f32.mrf.mxu1  ;;  %v1802_v45 = vsel %vm764_vm3, %v2342_v27, 0 }
 0x9ca   : > { %v1408_v30 = vpop.xlane.xlu0 %1407 }
 0x9cb   : > { %v1409_v31 = vsub.f32 %v1405_v26, %v1408_v30 }
 0x9cd   : > { %v1410_v32 = vmul.f32 1.442695, %v1409_v31 }
 0x9cf   : > { %2697 = vpow2.f32 %v1410_v32 }
 0x9dc   : > { %v2698_v33 = vpop.eup %2697 }
 0x9dd   : > { %v1412_v34 = vsel %vm699_vm2, %v2698_v33, 0.0 }
 0x9de   : > { %1413 = vadd.xlane.f32.xlu1 %v1412_v34 }
 0xa67   : > { %v1414_v37 = vpop.xlane.xlu1 %1413 }
 0xa68   : > { %2699 = vrcp.f32 %v1414_v37 }
 0xa75   : > { %v2700_v38 = vpop.eup %2699 }
 0xa76   : > { %v1416_v39 = vmul.f32 %v2700_v38, %v2698_v33 }
 0xa78   : > { %v1417_v41 = vpack.c.bf16 %v1416_v39, %v1416_v39 }
 0xa7a   : > { %2547 = vmatmul.mubr.msk.bf16.vlgmr.msra.gmra.mxu0 %vm699_vm2, %v1417_v41 }
 0xa7b   : > { %2557 = vmatpush3.bf16.msra.mxu0 %v2671_v40  ;;  %2560 = vmatprep.mubr.msk.bf16.mxu0 %vm2736_vm1, %v2735_v9 }
 0xa7c   : > { %2558 = vmatprep.subr.bf16.mxu0 %v2735_v9 }
 0xa7f   : > { %2559 = vmatpush3.bf16.msra.mxu0 %v2672_v42 }
 0xa80   : > { %2572 = vmatprep.subr.bf16.mxu0 %v2735_v9 }
 0xa82   : > { %2561 = vmatmul.mubr.msk.bf16.vlgmr.msra.gmra.mxu0 %vm494_vm0, %v2841_v19 }
 0xa83   : > { %2573 = vmatpush3.bf16.msra.mxu0 %v2673_v43  ;;  %2576 = vmatprep.mubr.msk.bf16.mxu0 %vm2736_vm1, %v2735_v9 }
 0xa84   : > { %2574 = vmatprep.subr.bf16.mxu0 %v2735_v9 }
 0xa87   : > { %2575 = vmatpush3.bf16.msra.mxu0 %v2674_v44 }
 0xa88   : > { %2586 = vmatprep.subr.bf16.mxu0 %v2735_v9 }
 0xa8a   : > { %2577 = vmatmul.mubr.msk.bf16.vlgmr.msra.gmra.mxu0 %vm494_vm0, %v2841_v19 }
 0xa8b   : > { %2588 = vmatprep.mubr.msk.bf16.mxu0 %vm2736_vm1, %v2735_v9 }
 0xb3a   : > { %v1459_v47 = vpop.f32.mrf.mxu0 }
 0xb3b   : > { %v1465_v49 = vpack.c.bf16 %v1459_v47, %v1459_v47 }
 0xb3c   : > { %v2548_v50 = vpop.f32.mrf.mxu0 }
 0xb3d   : > { %2553 = vmatmul.mubr.msk.bf16.vlgmr.msra.gmra.mxu1 %vm699_vm2, %v1465_v49  ;;  %v2677_v50 = vld [vmem:[%s3153_s7 + $0x8] sm:$0xff]  }
 0xb3e   : > { %v1462_v51 = vpop.f32.mrf.mxu0  ;;  %2565 = vmatpush3.bf16.msra.mxu1 %v2675_v48  ;;  %2568 = vmatprep.mubr.msk.bf16.mxu1 %vm2736_vm1, %v2735_v9 }
 0xb3f   : > { %2566 = vmatprep.subr.bf16.mxu1 %v2735_v9 }
 0xb40   : > { %v2549_v53 = vpop.f32.mrf.mxu0 }
 0xb42   : > { %v1566_v54 = vpop.f32.mrf.mxu0  ;;  %2567 = vmatpush3.bf16.msra.mxu1 %v2676_v52 }
 0xb43   : > { %2580 = vmatprep.subr.bf16.mxu1 %v2735_v9  ;;  %v1686_v15 = vpack.c.bf16 %v1566_v54, %v1566_v54 }
 0xb44   : > { %v2562_v55 = vpop.f32.mrf.mxu0 }
 0xb45   : > { %2569 = vmatmul.mubr.msk.bf16.vlgmr.msra.gmra.mxu1 %vm494_vm0, %v2841_v19  ;;  %v2344_v55 = vld [vmem:[%s3152_s6] ss:$0 sm:$0xff] }
 0xb46   : > { %v1569_v56 = vpop.f32.mrf.mxu0  ;;  %2582 = vmatprep.mubr.msk.bf16.mxu1 %vm2736_vm1, %v2735_v9 }
 0xb48   : > { %v2563_v58 = vpop.f32.mrf.mxu0 }
 0xb4a   : > { %v1680_v59 = vpop.f32.mrf.mxu0 }
 0xb4b   : > { %v1748_v60 = vpack.c.bf16 %v1680_v59, %v1680_v59 }
 0xb4c   : > { %v2578_v61 = vpop.f32.mrf.mxu0 }
 0xb4d   : > { %v1753_v62 = vsel %vm764_vm3, %v1748_v60, 0  ;;  %v2679_v60 = vld [vmem:[%s3154_s8 + $0x38] sm:$0xff]   ;;  %v2680_v61 = vld [vmem:[%s3154_s8 + $0x30] sm:$0xff]  }
 0xb4e   : > { %v1683_v63 = vpop.f32.mrf.mxu0  ;;  %2587 = vmatpush3.bf16.msra.mxu0 %v1753_v62  ;;  %v2681_v62 = vld [vmem:[%s3154_s8 + $0x28] sm:$0xff]  }
 0xb4f   : > { %2598 = vmatprep.subr.bf16.mxu0 %v2735_v9  ;;  %v2682_v63 = vld [vmem:[%s3154_s8 + $0x20] sm:$0xff]  }
 0xb50   : > { %v2579_v0 = vpop.f32.mrf.mxu0 }
 0xb51   : > { %v2683_v0 = vld [vmem:[%s3154_s8 + $0x18] sm:$0xff]  }
 0xbfd   : > { %v1508_v3 = vpop.f32.mrf.mxu1 }
 0xbfe   : > { %v1514_v19 = vadd.f32 %v1508_v3, %v1180_v2  ;;  %v2684_v2 = vld [vmem:[%s3154_s8 + $0x10] sm:$0xff]   ;;  %v2685_v3 = vld [vmem:[%s3154_s8 + $0x8] sm:$0xff]  }
 0xbff   : > { %v2554_v4 = vpop.f32.mrf.mxu1 }
 0xc01   : > { %v1511_v5 = vpop.f32.mrf.mxu1 }
 0xc03   : > { %v2555_v7 = vpop.f32.mrf.mxu1 }
 0xc05   : > { %v1623_v8 = vpop.f32.mrf.mxu1 }
 0xc06   : > { %v1687_v10 = vpack.c.bf16 %v1623_v8, %v1623_v8 }
 0xc07   : > { %v2570_v11 = vpop.f32.mrf.mxu1 }
 0xc08   : > { %v1692_v12 = vsel %vm699_vm2, %v1687_v10, 0 }
 0xc09   : > { %v1626_v13 = vpop.f32.mrf.mxu1  ;;  %2581 = vmatpush3.bf16.xpose.msra.mxu1 %v1692_v12 }
 0xc0a   : > { %2592 = vmatprep.subr.bf16.mxu1 %v2735_v9 }
 0xc0b   : > { %v2571_v14 = vpop.f32.mrf.mxu1 }
 0xc10   : > { %2583 = vmatmul.mubr.msk.bf16.vlgmr.msra.gmra.mxu1 %vm699_vm2, %v1686_v15 }
 0xc11   : > { %2594 = vmatprep.mubr.msk.bf16.mxu1 %vm2736_vm1, %v2735_v9  ;;  %2593 = vmatpush3.bf16.msra.mxu1 %v1802_v45  ;;  %v2737_v45 = vmov -1.0  }
 0xc12   : > { %2606 = vmatprep.subr.bf16.mxu1 %v2735_v9 }
 0xcd0   : > { %v1728_v57 = vpop.f32.mrf.mxu1 }
 0xcd1   : > { %v1734_v6 = vmul.f32 0.35355338, %v1728_v57 }
 0xcd2   : > { %v2584_v16 = vpop.f32.mrf.mxu1 }
 0xcd3   : > { %v1735_v17 = vsel %vm525_vm4, %v1734_v6, -1e+30 }
 0xcd4   : > { %v1731_v18 = vpop.f32.mrf.mxu1  ;;  %v1736_v20 = vsel %vm699_vm2, %v1735_v17, -inf }
 0xcd5   : > { %1737 = vmax.xlane.f32.xlu0 %v1736_v20 }
 0xcd6   : > { %v2585_v21 = vpop.f32.mrf.mxu1 }
 0xd5e   : > { %v1738_v22 = vpop.xlane.xlu0 %1737 }
 0xd5f   : > { %v1739_v23 = vsub.f32 %v1735_v17, %v1738_v22 }
 0xd61   : > { %v1740_v24 = vmul.f32 1.442695, %v1739_v23 }
 0xd63   : > { %2701 = vpow2.f32 %v1740_v24 }
 0xd70   : > { %v2702_v25 = vpop.eup %2701 }
 0xd71   : > { %v1742_v26 = vsel %vm699_vm2, %v2702_v25, 0.0 }
 0xd72   : > { %1743 = vadd.xlane.f32.xlu1 %v1742_v26 }
 0xdfb   : > { %v1744_v46 = vpop.xlane.xlu1 %1743 }
 0xdfc   : > { %2703 = vrcp.f32 %v1744_v46 }
 0xe09   : > { %v2704_v28 = vpop.eup %2703 }
 0xe0a   : > { %v1746_v29 = vmul.f32 %v2704_v28, %v2702_v25 }
 0xe0c   : > { %v1747_v30 = vpack.c.bf16 %v1746_v29, %v1746_v29 }
 0xe0e   : > { %2589 = vmatmul.mubr.msk.bf16.vlgmr.msra.gmra.mxu0 %vm699_vm2, %v1747_v30 }
 0xe0f   : > { %2602 = vmatprep.mubr.msk.bf16.mxu0 %vm2736_vm1, %v2735_v9  ;;  %2599 = vmatpush3.bf16.msra.mxu0 %v2677_v50 }
 0xe10   : > { %2600 = vmatprep.subr.bf16.mxu0 %v2735_v9 }
 0xece   : > { %v1789_v31 = vpop.f32.mrf.mxu0 }
 0xecf   : > { %v1795_v32 = vpack.c.bf16 %v1789_v31, %v1789_v31 }
 0xed0   : > { %v2590_v33 = vpop.f32.mrf.mxu0 }
 0xed1   : > { %2595 = vmatmul.mubr.msk.bf16.vlgmr.msra.gmra.mxu1 %vm699_vm2, %v1795_v32 }
 0xed2   : > { %v1792_v34 = vpop.f32.mrf.mxu0  ;;  %2622 = vmatprep.mubr.msk.bf16.mxu1 %vm2736_vm1, %v2735_v9  ;;  %2607 = vmatpush3.bf16.msra.mxu1 %v2679_v60 }
 0xed3   : > { %2608 = vmatprep.subr.bf16.mxu1 %v2735_v9 }
 0xed4   : > { %v2591_v35 = vpop.f32.mrf.mxu0 }
 0xed6   : > { %2609 = vmatpush3.bf16.msra.mxu1 %v2680_v61 }
 0xed7   : > { %2610 = vmatprep.subr.bf16.mxu1 %v2735_v9 }
 0xeda   : > { %2611 = vmatpush3.bf16.msra.mxu1 %v2681_v62 }
 0xedb   : > { %2612 = vmatprep.subr.bf16.mxu1 %v2735_v9 }
 0xede   : > { %2613 = vmatpush3.bf16.msra.mxu1 %v2682_v63 }
 0xedf   : > { %2614 = vmatprep.subr.bf16.mxu1 %v2735_v9 }
 0xee2   : > { %2615 = vmatpush3.bf16.msra.mxu1 %v2683_v0 }
 0xee3   : > { %2616 = vmatprep.subr.bf16.mxu1 %v2735_v9 }
 0xee6   : > { %2617 = vmatpush3.bf16.msra.mxu1 %v2684_v2 }
 0xee7   : > { %2618 = vmatprep.subr.bf16.mxu1 %v2735_v9 }
 0xeea   : > { %2619 = vmatpush3.bf16.msra.mxu1 %v2685_v3 }
 0xeeb   : > { %2620 = vmatprep.subr.bf16.mxu1 %v2735_v9 }
 0xf91   : > { %v1838_v36 = vpop.f32.mrf.mxu1 }
 0xf92   : > { %v1844_v37 = vadd.f32 %v1838_v36, %v1514_v19  ;;  %v2686_v19 = vld [vmem:[%s3154_s8] sm:$0xff]  }
 0xf93   : > { %v2596_v38 = vpop.f32.mrf.mxu1  ;;  %2621 = vmatpush3.bf16.msra.mxu1 %v2686_v19 }
 0xf94   : > { %v3081_v39 = vadd.f32 %v1844_v37, %v2815_v1  ;;  %v2678_v1 = vld [vmem:[%s3153_s7] sm:$0xff]  }
 0xf95   : > { %v1841_v40 = vpop.f32.mrf.mxu1  ;;  %2601 = vmatpush3.bf16.msra.mxu0 %v2678_v1 }
 0xf96   : > { %v1847_v41 = vsel %vm494_vm0, %v3081_v39, 0.0 }
 0xf97   : > { %1848 = vadd.xlane.f32.xlu0 %v1847_v41  ;;  %v2597_v42 = vpop.f32.mrf.mxu1 }
0x1020   : > { %v1849_v43 = vpop.xlane.xlu0 %1848 }
0x1021   : > { %v1850_v44 = vmul.f32 0.03125, %v1849_v43 }
0x1023   : > { %v1851_v47 = vsub.f32 %v3081_v39, %v1850_v44 }
0x1025   : > { %v1852_v48 = vmul.f32 %v1851_v47, %v1851_v47 }
0x1027   : > { %v1853_v49 = vsel %vm494_vm0, %v1852_v48, 0.0 }
0x1028   : > { %1854 = vadd.xlane.f32.xlu1 %v1853_v49 }
0x10b1   : > { %v1855_v51 = vpop.xlane.xlu1 %1854 }
0x10b2   : > { %v1856_v52 = vmul.f32 0.03125, %v1855_v51 }
0x10b4   : > { %v1857_v53 = vadd.f32 1e-05, %v1856_v52 }
0x10b6   : > { %2705 = vrsqrt.f32 %v1857_v53 }
0x10c3   : > { %v2706_v54 = vpop.eup %2705 }
0x10c4   : > { %v1859_v56 = vmul.f32 %v2706_v54, %v1851_v47 }
0x10c6   : > { %v1866_v58 = vmul.f32 %v2344_v55, %v1859_v56 }
0x10c8   : > { %v1867_v59 = vpack.c.bf16 %v1866_v58, %v1866_v58 }
0x10ca   : > { %2603 = vmatmul.mubr.msk.bf16.vlgmr.msra.gmra.mxu0 %vm494_vm0, %v1867_v59 }
0x118a   : > { %v1921_v4 = vpop.f32.mrf.mxu0 }
0x118b   : > { %v1928_v5 = vmul.f32 0.70710677, %v1921_v4  ;;  %v1927_v29 = vmul.f32 0.5, %v1921_v4 }
0x118c   : > { %v2604_v7 = vpop.f32.mrf.mxu0 }
0x118d   : > { %v1931_v8 = vand.u32 2147483647, %v1928_v5  ;;  %vm1929_vm5 = vcmp.ge.f32.partialorder %v1928_v5, 0.0 }
0x118e   : > { %v1924_v10 = vpop.f32.mrf.mxu0  ;;  %v1930_v46 = vsel %vm1929_vm5, 1.0, %v2737_v45 }
0x118f   : > { %v1932_v11 = vmul.f32 0.3275911, %v1931_v8  ;;  %v1945_v14 = vsub.f32 0.0, %v1931_v8 }
0x1190   : > { %v2605_v12 = vpop.f32.mrf.mxu0 }
0x1191   : > { %v1933_v13 = vadd.f32 1.0, %v1932_v11  ;;  %v1946_v15 = vmul.f32 %v1945_v14, %v1931_v8 }
0x1193   : > { %2707 = vrcp.f32 %v1933_v13  ;;  %v1947_v16 = vmul.f32 1.442695, %v1946_v15 }
0x1195   : > { %2709 = vpow2.f32 %v1947_v16 }
0x11a0   : > { %v2708_v57 = vpop.eup %2707 }
0x11a1   : > { %v1936_v6 = vmul.f32 1.0614054, %v2708_v57 }
0x11a2   : > { %v2710_v25 = vpop.eup %2709 }
0x11a3   : > { %v1937_v9 = vadd.f32 -1.4531521, %v1936_v6 }
0x11a5   : > { %v1938_v17 = vmul.f32 %v2708_v57, %v1937_v9 }
0x11a7   : > { %v1939_v18 = vadd.f32 1.4214138, %v1938_v17 }
0x11a9   : > { %v1940_v20 = vmul.f32 %v2708_v57, %v1939_v18 }
0x11ab   : > { %v1941_v21 = vadd.f32 -0.28449672, %v1940_v20 }
0x11ad   : > { %v1942_v22 = vmul.f32 %v2708_v57, %v1941_v21 }
0x11af   : > { %v1943_v23 = vadd.f32 0.2548296, %v1942_v22 }
0x11b1   : > { %v1944_v24 = vmul.f32 %v2708_v57, %v1943_v23 }
0x11b3   : > { %v1949_v26 = vmul.f32 %v2710_v25, %v1944_v24 }
0x11b5   : > { %v1950_v27 = vsub.f32 1.0, %v1949_v26 }
0x11b7   : > { %v1951_v28 = vmul.f32 %v1950_v27, %v1930_v46 }
0x11b9   : > { %v1952_v30 = vadd.f32 1.0, %v1951_v28 }
0x11bb   : > { %v1953_v31 = vmul.f32 %v1952_v30, %v1927_v29 }
0x11bd   : > { %v1954_v32 = vpack.c.bf16 %v1953_v31, %v1953_v31 }
0x11bf   : > { %2623 = vmatmul.mubr.bf16.vlgmr.msra.gmra.mxu1 %v1954_v32 }
0x127f   : > { %v2053_v33 = vpop.f32.mrf.mxu1 }
0x1280   : > { %v2059_v34 = vadd.f32 %v2053_v33, %v3081_v39 }
0x1281   : > { %v2624_v35 = vpop.f32.mrf.mxu1 }
0x1282   : > { %2060 = vst.msk [vmem:[#allocation2] sm:$0xff] %vm494_vm0, %v2059_v34  ;;  %2064 = vst.msk [vmem:[%s487_s19] sm:$0xff] %vm494_vm0, %v2059_v34 }
0x1283   : > { %v2056_v36 = vpop.f32.mrf.mxu1 }
0x1285   : > { %v2625_v37 = vpop.f32.mrf.mxu1 }
0x1286 PF: > { %s19_s11 = sadd.s32 1, %s2733_s11   ;;  %s3156_s30 = smov %s2729_s10 }
0x1287   : > { %p16_p5 = scmp.ge.s32.totalorder %s19_s11, 4   ;;  %s3157_s10 = smov %s3159_s12 }
0x1289   :  { %18 = sbr.rel (!%p16_p5) target bundleno = 2 (0x2), region = 130 }

</bundles_post_ra>
